<compile_context>
chip_gen: v6e
topology: v6e:2x2x1
jax: 0.10.0
libtpu: 0.0.40
codegen_flags: <defaults>
</compile_context>

<pallas_src>
import math
from functools import partial

import jax
import jax.numpy as jnp
from jax import lax
from jax.experimental import pallas as pl
from jax.experimental.pallas import tpu as pltpu


def _leaky_relu(v, slope=0.01):
    return jnp.where(v > 0, v, slope * v)


def conv3d_gl_kernel(x_ref, mp_ref, wlg_ref, wl_ref, out_ref, xp_ref, *, T, H, K):
    # x_ref  : (Tp, Hp, Wp*Cin)          zero-padded input, W folded into lanes
    # mp_ref : (Hp, Wp*Cin)              {0,1} mask_p per padded H row (pre-broadcast)
    # wlg_ref: (K*K, Wp*Cin, 2*W*Cout)   banded [convdl | convdg] weights per (kt,kh)
    # wl_ref : (K*K, Wp*Cin, W*Cout)     banded convdl weights only
    # out_ref: (T*H, 2*W*Cout)           [ outg | feature_p ]  (lane-dense, 128 wide)
    # xp_ref : (Tp, Hp, Wp*Cin)          VMEM scratch for x * mask_p (hoisted multiply)
    WpC = x_ref.shape[-1]
    WC = wl_ref.shape[-1]
    TH = T * H

    # Hoisted mask multiply: one broadcast + one multiply per grid step (not per tap).
    xp_ref[...] = x_ref[...] * mp_ref[...][None, :, :]

    acc_lg = jnp.zeros((TH, 2 * WC), jnp.float32)   # [ convdl(x) | convdg(x) ]
    acc_lp = jnp.zeros((TH, WC), jnp.float32)       # convdl(x * mask_p)

    # K = 3: fully unrolled so tap/weight indices and slice offsets are static.
    for kt in range(K):
        for kh in range(K):
            idx = kt * K + kh
            s = x_ref[pl.ds(kt, T), pl.ds(kh, H), :].reshape(TH, WpC)
            sp = xp_ref[pl.ds(kt, T), pl.ds(kh, H), :].reshape(TH, WpC)
            acc_lg = acc_lg + jnp.dot(s, wlg_ref[idx],
                                      precision=lax.Precision.HIGHEST,
                                      preferred_element_type=jnp.float32)
            acc_lp = acc_lp + jnp.dot(sp, wl_ref[idx],
                                      precision=lax.Precision.HIGHEST,
                                      preferred_element_type=jnp.float32)

    acc_ls = acc_lg[:, :WC]          # convdl(x)
    acc_g = acc_lg[:, WC:]           # convdg(x)
    # feature_p = leaky(convdl(x*mask_p)) + leaky(convdl(x*mask_q))
    #           = leaky(acc_lp)           + leaky(acc_ls - acc_lp)   (mask_q = 1 - mask_p)
    featp = _leaky_relu(acc_lp) + _leaky_relu(acc_ls - acc_lp)
    out_ref[...] = jnp.concatenate(
        [_leaky_relu(acc_g), featp], axis=1).astype(out_ref.dtype)


def _band_weights(w5, Wp, W):
    """(Cout, Cin, K, K, K) Conv3d weight -> (K*K, Wp*Cin, W*Cout) banded weights.

    band[kt*K+kh, wp*Cin+ci, w*Cout+co] = w5[co, ci, kt, kh, wp-w] if 0 <= wp-w < K else 0
    so   out[(t,h), w*Cout+co] = sum_{kt,kh} x_pad[t+kt, h+kh].flatten() @ band[kt*K+kh]
    """
    Cout, Cin, K = w5.shape[0], w5.shape[1], w5.shape[2]
    wt = jnp.transpose(w5, (2, 3, 4, 1, 0))                      # (kt, kh, kw, ci, co)
    kw = jnp.arange(Wp)[:, None] - jnp.arange(W)[None, :]        # (Wp, W)
    valid = ((kw >= 0) & (kw < K)).astype(w5.dtype)
    kw_c = jnp.clip(kw, 0, K - 1)
    band = wt[:, :, kw_c, :, :]                                  # (K, K, Wp, W, Cin, Cout)
    band = band * valid[None, None, :, :, None, None]
    band = jnp.transpose(band, (0, 1, 2, 4, 3, 5))               # (K, K, Wp, Cin, W, Cout)
    return band.reshape(K * K, Wp * Cin, W * Cout)


def basic_conv3d_gl(x_ncthw, w_l, w_g, mask_rows):
    """Forward pass of BasicConv3d_gl.

    x_ncthw   : (n, c, t, h, w) float32
    w_l, w_g  : (planes, inplanes, K, K, K) float32  (convdl / convdg, bias=False)
    mask_rows : (h,) float32 in {0,1}; 1 -> row in mask_p, 0 -> mask_q
    returns   : (n, planes, t, 2*h, w) float32  (torch.cat along H)
    """
    n, c, t, h, w = x_ncthw.shape
    planes, K = w_l.shape[0], w_l.shape[2]
    pad = (K - 1) // 2
    Tp, Hp, Wp = t + 2 * pad, h + 2 * pad, w + 2 * pad
    WpC, WC, TH = Wp * c, w * planes, t * h

    # --- glue: layout, padding, mask, band-weight build --------------------
    x_cl = jnp.transpose(x_ncthw, (0, 2, 3, 4, 1))               # (n, t, h, w, c)
    x_pad = jnp.pad(x_cl, ((0, 0), (pad, pad), (pad, pad), (pad, pad), (0, 0)))
    x_in = x_pad.reshape(n, Tp, Hp, WpC)                         # lane dim = Wp*Cin

    mp_rows = jnp.pad(mask_rows.astype(x_in.dtype), (pad, pad))  # (Hp,)
    mp_in = jnp.broadcast_to(mp_rows[:, None], (Hp, WpC))        # (Hp, WpC)

    wl_band = _band_weights(w_l, Wp, w)                          # (K*K, WpC, WC)
    wg_band = _band_weights(w_g, Wp, w)
    wlg_band = jnp.concatenate([wl_band, wg_band], axis=-1)      # (K*K, WpC, 2*WC)

    kernel = partial(conv3d_gl_kernel, T=t, H=h, K=K)

    out = pl.pallas_call(
        kernel,
        out_shape=jax.ShapeDtypeStruct((n, TH, 2 * WC), jnp.float32),
        grid_spec=pltpu.PrefetchScalarGridSpec(
            num_scalar_prefetch=0,
            grid=(n,),
            in_specs=[
                pl.BlockSpec((None, Tp, Hp, WpC), lambda i: (i, 0, 0, 0)),
                pl.BlockSpec((Hp, WpC), lambda i: (0, 0)),
                pl.BlockSpec((K * K, WpC, 2 * WC), lambda i: (0, 0, 0)),
                pl.BlockSpec((K * K, WpC, WC), lambda i: (0, 0, 0)),
            ],
            out_specs=pl.BlockSpec((None, TH, 2 * WC), lambda i: (i, 0, 0)),
            scratch_shapes=[pltpu.VMEM((Tp, Hp, WpC), jnp.float32)],
        ),
        compiler_params=pltpu.CompilerParams(
            dimension_semantics=("parallel",),
            # tiny working set at test shapes; re-derive when W is grid-tiled (v7x).
            vmem_limit_bytes=32 * 1024 * 1024),
    )(x_in, mp_in, wlg_band, wl_band)

    # (n, t*h, [outg(w,c) | featp(w,c)])  ->  torch.cat((outg, feature_p), dim=3) in NCTHW
    out = out.reshape(n, t, h, 2, w, planes)
    out = jnp.transpose(out, (0, 1, 3, 2, 4, 5)).reshape(n, t, 2 * h, w, planes)
    return jnp.transpose(out, (0, 4, 1, 2, 3))                   # (n, planes, t, 2h, w)


def _reference(x, w_l, w_g, mask_rows):
    """Pure-JAX (XLA conv) reference of BasicConv3d_gl.forward."""
    n, c, t, h, w = x.shape
    K = w_l.shape[2]
    pad = (K - 1) // 2
    dn = ('NCDHW', 'OIDHW', 'NCDHW')

    def conv(v, wt):
        return lax.conv_general_dilated(v, wt, (1, 1, 1), [(pad, pad)] * 3,
                                        dimension_numbers=dn,
                                        precision=lax.Precision.HIGHEST)

    mp = mask_rows.reshape(1, 1, 1, h, 1)
    fp = _leaky_relu(conv(x * mp, w_l)) + _leaky_relu(conv(x * (1.0 - mp), w_l))
    og = _leaky_relu(conv(x, w_g))
    return jnp.concatenate([og, fp], axis=3)


if __name__ == "__main__":
    key = jax.random.PRNGKey(0)
    k_x, k_wl, k_wg, k_idx = jax.random.split(key, 4)

    # small shapes consistent with the module: NCTHW
    n, c, t, h, w = 2, 4, 4, 8, 8
    planes, K = 8, 3

    x = jax.random.normal(k_x, (n, c, t, h, w), dtype=jnp.float32)

    # deterministic Conv3d-style init (kaiming-uniform bound = 1/sqrt(fan_in)), bias=False
    fan_in = c * K * K * K
    bound = 1.0 / math.sqrt(fan_in)
    w_l = jax.random.uniform(k_wl, (planes, c, K, K, K), jnp.float32, -bound, bound)
    w_g = jax.random.uniform(k_wg, (planes, c, K, K, K), jnp.float32, -bound, bound)

    # deterministic stand-in for np.random.choice(range(h), int(h*0.7), replace=False)
    dim_mask = int(h * 0.7)
    chosen = jax.random.permutation(k_idx, h)[:dim_mask]
    mask_rows = jnp.zeros((h,), jnp.float32).at[chosen].set(1.0)

    out = basic_conv3d_gl(x, w_l, w_g, mask_rows)
    jax.block_until_ready(out)
    assert out.shape == (n, planes, t, 2 * h, w), out.shape

    # numerical check against an XLA-conv reference (all-f32 path -> tight tolerance)
    ref = _reference(x, w_l, w_g, mask_rows)
    assert bool(jnp.allclose(out, ref, atol=1e-4, rtol=1e-4)), \
        float(jnp.max(jnp.abs(out - ref)))

    print("KERNEL_OK")
</pallas_src>

<mosaic_0001>
module attributes {stable_mosaic.version = 11 : i64} {
  func.func @conv3d_gl_kernel(%arg0: i32, %arg1: memref<1x6x10x40xf32, #tpu.memory_space<vmem>>, %arg2: memref<10x40xf32, #tpu.memory_space<vmem>>, %arg3: memref<9x40x128xf32, #tpu.memory_space<vmem>>, %arg4: memref<9x40x64xf32, #tpu.memory_space<vmem>>, %arg5: memref<1x32x128xf32, #tpu.memory_space<vmem>>, %arg6: memref<6x10x40xf32, #tpu.memory_space<vmem>>) attributes {dimension_semantics = [#tpu.dimension_semantics<parallel>], iteration_bounds = array<i64: 2>, scalar_prefetch = 0 : i64, scratch_operands = 1 : i64, tpu.core_type = #tpu.core_type<tc>, window_params = [{transform_indices = @transform_0, window_bounds = array<i64: 1, 6, 10, 40>}, {pipeline_mode = #tpu.pipeline_mode<synchronous>, transform_indices = @transform_1, window_bounds = array<i64: 10, 40>}, {pipeline_mode = #tpu.pipeline_mode<synchronous>, transform_indices = @transform_2, window_bounds = array<i64: 9, 40, 128>}, {pipeline_mode = #tpu.pipeline_mode<synchronous>, transform_indices = @transform_3, window_bounds = array<i64: 9, 40, 64>}, {transform_indices = @transform_4, window_bounds = array<i64: 1, 32, 128>}]} {
    %c0 = arith.constant 0 : index
    %c0_0 = arith.constant 0 : index
    %c0_1 = arith.constant 0 : index
    %c0_2 = arith.constant 0 : index
    %0 = vector.load %arg1[%c0, %c0_0, %c0_1, %c0_2] : memref<1x6x10x40xf32, #tpu.memory_space<vmem>>, vector<1x6x10x40xf32>
    %1 = vector.shape_cast %0 : vector<1x6x10x40xf32> to vector<6x10x40xf32>
    %c0_3 = arith.constant 0 : index
    %c0_4 = arith.constant 0 : index
    %2 = vector.load %arg2[%c0_3, %c0_4] : memref<10x40xf32, #tpu.memory_space<vmem>>, vector<10x40xf32>
    %3 = vector.shape_cast %2 : vector<10x40xf32> to vector<1x10x40xf32>
    %4 = vector.broadcast %3 : vector<1x10x40xf32> to vector<6x10x40xf32>
    %5 = arith.mulf %1, %4 : vector<6x10x40xf32>
    %c0_5 = arith.constant 0 : index
    %c0_6 = arith.constant 0 : index
    %c0_7 = arith.constant 0 : index
    %6 = vector.load %arg6[%c0_5, %c0_6, %c0_7] : memref<6x10x40xf32, #tpu.memory_space<vmem>>, vector<6x10x40xf32>
    tpu.vector_store %arg6[%c0_5, %c0_6, %c0_7], %5 {strides = array<i32>} : memref<6x10x40xf32, #tpu.memory_space<vmem>>, vector<6x10x40xf32>,
    %cst = arith.constant 0.000000e+00 : f32
    %7 = vector.broadcast %cst : f32 to vector<32x128xf32>
    %cst_8 = arith.constant 0.000000e+00 : f32
    %8 = vector.broadcast %cst_8 : f32 to vector<32x64xf32>
    %c0_9 = arith.constant 0 : index
    %c0_10 = arith.constant 0 : index
    %c0_11 = arith.constant 0 : index
    %c0_12 = arith.constant 0 : index
    %9 = vector.load %arg1[%c0_9, %c0_10, %c0_11, %c0_12] : memref<1x6x10x40xf32, #tpu.memory_space<vmem>>, vector<1x4x8x40xf32>
    %10 = vector.shape_cast %9 : vector<1x4x8x40xf32> to vector<4x8x40xf32>
    %11 = vector.shape_cast %10 : vector<4x8x40xf32> to vector<32x40xf32>
    %c0_13 = arith.constant 0 : index
    %c0_14 = arith.constant 0 : index
    %c0_15 = arith.constant 0 : index
    %12 = vector.load %arg6[%c0_13, %c0_14, %c0_15] : memref<6x10x40xf32, #tpu.memory_space<vmem>>, vector<4x8x40xf32>
    %13 = vector.shape_cast %12 : vector<4x8x40xf32> to vector<32x40xf32>
    %c0_16 = arith.constant 0 : index
    %c0_17 = arith.constant 0 : index
    %c0_18 = arith.constant 0 : index
    %14 = vector.load %arg3[%c0_16, %c0_17, %c0_18] : memref<9x40x128xf32, #tpu.memory_space<vmem>>, vector<1x40x128xf32>
    %15 = vector.shape_cast %14 : vector<1x40x128xf32> to vector<40x128xf32>
    %cst_19 = arith.constant dense<0.000000e+00> : vector<32x128xf32>
    %16 = tpu.matmul %11, %15, %cst_19 {dimension_numbers = #tpu.dot_dimension_numbers<[1], [0], [0], [1], [0, 0, 1, 1], [], []>, precision = #tpu.contract_precision<fp32>} : vector<32x40xf32>, vector<40x128xf32>, vector<32x128xf32> -> vector<32x128xf32>
    %17 = arith.addf %7, %16 : vector<32x128xf32>
    %c0_20 = arith.constant 0 : index
    %c0_21 = arith.constant 0 : index
    %c0_22 = arith.constant 0 : index
    %18 = vector.load %arg4[%c0_20, %c0_21, %c0_22] : memref<9x40x64xf32, #tpu.memory_space<vmem>>, vector<1x40x64xf32>
    %19 = vector.shape_cast %18 : vector<1x40x64xf32> to vector<40x64xf32>
    %cst_23 = arith.constant dense<0.000000e+00> : vector<32x64xf32>
    %20 = tpu.matmul %13, %19, %cst_23 {dimension_numbers = #tpu.dot_dimension_numbers<[1], [0], [0], [1], [0, 0, 1, 1], [], []>, precision = #tpu.contract_precision<fp32>} : vector<32x40xf32>, vector<40x64xf32>, vector<32x64xf32> -> vector<32x64xf32>
    %21 = arith.addf %8, %20 : vector<32x64xf32>
    %c0_24 = arith.constant 0 : index
    %c0_25 = arith.constant 0 : index
    %c1 = arith.constant 1 : index
    %c0_26 = arith.constant 0 : index
    %22 = vector.load %arg1[%c0_24, %c0_25, %c1, %c0_26] : memref<1x6x10x40xf32, #tpu.memory_space<vmem>>, vector<1x4x8x40xf32>
    %23 = vector.shape_cast %22 : vector<1x4x8x40xf32> to vector<4x8x40xf32>
    %24 = vector.shape_cast %23 : vector<4x8x40xf32> to vector<32x40xf32>
    %c0_27 = arith.constant 0 : index
    %c1_28 = arith.constant 1 : index
    %c0_29 = arith.constant 0 : index
    %25 = vector.load %arg6[%c0_27, %c1_28, %c0_29] : memref<6x10x40xf32, #tpu.memory_space<vmem>>, vector<4x8x40xf32>
    %26 = vector.shape_cast %25 : vector<4x8x40xf32> to vector<32x40xf32>
    %c1_30 = arith.constant 1 : index
    %c0_31 = arith.constant 0 : index
    %c0_32 = arith.constant 0 : index
    %27 = vector.load %arg3[%c1_30, %c0_31, %c0_32] : memref<9x40x128xf32, #tpu.memory_space<vmem>>, vector<1x40x128xf32>
    %28 = vector.shape_cast %27 : vector<1x40x128xf32> to vector<40x128xf32>
    %cst_33 = arith.constant dense<0.000000e+00> : vector<32x128xf32>
    %29 = tpu.matmul %24, %28, %cst_33 {dimension_numbers = #tpu.dot_dimension_numbers<[1], [0], [0], [1], [0, 0, 1, 1], [], []>, precision = #tpu.contract_precision<fp32>} : vector<32x40xf32>, vector<40x128xf32>, vector<32x128xf32> -> vector<32x128xf32>
    %30 = arith.addf %17, %29 : vector<32x128xf32>
    %c1_34 = arith.constant 1 : index
    %c0_35 = arith.constant 0 : index
    %c0_36 = arith.constant 0 : index
    %31 = vector.load %arg4[%c1_34, %c0_35, %c0_36] : memref<9x40x64xf32, #tpu.memory_space<vmem>>, vector<1x40x64xf32>
    %32 = vector.shape_cast %31 : vector<1x40x64xf32> to vector<40x64xf32>
    %cst_37 = arith.constant dense<0.000000e+00> : vector<32x64xf32>
    %33 = tpu.matmul %26, %32, %cst_37 {dimension_numbers = #tpu.dot_dimension_numbers<[1], [0], [0], [1], [0, 0, 1, 1], [], []>, precision = #tpu.contract_precision<fp32>} : vector<32x40xf32>, vector<40x64xf32>, vector<32x64xf32> -> vector<32x64xf32>
    %34 = arith.addf %21, %33 : vector<32x64xf32>
    %c0_38 = arith.constant 0 : index
    %c0_39 = arith.constant 0 : index
    %c2 = arith.constant 2 : index
    %c0_40 = arith.constant 0 : index
    %35 = vector.load %arg1[%c0_38, %c0_39, %c2, %c0_40] : memref<1x6x10x40xf32, #tpu.memory_space<vmem>>, vector<1x4x8x40xf32>
    %36 = vector.shape_cast %35 : vector<1x4x8x40xf32> to vector<4x8x40xf32>
    %37 = vector.shape_cast %36 : vector<4x8x40xf32> to vector<32x40xf32>
    %c0_41 = arith.constant 0 : index
    %c2_42 = arith.constant 2 : index
    %c0_43 = arith.constant 0 : index
    %38 = vector.load %arg6[%c0_41, %c2_42, %c0_43] : memref<6x10x40xf32, #tpu.memory_space<vmem>>, vector<4x8x40xf32>
    %39 = vector.shape_cast %38 : vector<4x8x40xf32> to vector<32x40xf32>
    %c2_44 = arith.constant 2 : index
    %c0_45 = arith.constant 0 : index
    %c0_46 = arith.constant 0 : index
    %40 = vector.load %arg3[%c2_44, %c0_45, %c0_46] : memref<9x40x128xf32, #tpu.memory_space<vmem>>, vector<1x40x128xf32>
    %41 = vector.shape_cast %40 : vector<1x40x128xf32> to vector<40x128xf32>
    %cst_47 = arith.constant dense<0.000000e+00> : vector<32x128xf32>
    %42 = tpu.matmul %37, %41, %cst_47 {dimension_numbers = #tpu.dot_dimension_numbers<[1], [0], [0], [1], [0, 0, 1, 1], [], []>, precision = #tpu.contract_precision<fp32>} : vector<32x40xf32>, vector<40x128xf32>, vector<32x128xf32> -> vector<32x128xf32>
    %43 = arith.addf %30, %42 : vector<32x128xf32>
    %c2_48 = arith.constant 2 : index
    %c0_49 = arith.constant 0 : index
    %c0_50 = arith.constant 0 : index
    %44 = vector.load %arg4[%c2_48, %c0_49, %c0_50] : memref<9x40x64xf32, #tpu.memory_space<vmem>>, vector<1x40x64xf32>
    %45 = vector.shape_cast %44 : vector<1x40x64xf32> to vector<40x64xf32>
    %cst_51 = arith.constant dense<0.000000e+00> : vector<32x64xf32>
    %46 = tpu.matmul %39, %45, %cst_51 {dimension_numbers = #tpu.dot_dimension_numbers<[1], [0], [0], [1], [0, 0, 1, 1], [], []>, precision = #tpu.contract_precision<fp32>} : vector<32x40xf32>, vector<40x64xf32>, vector<32x64xf32> -> vector<32x64xf32>
    %47 = arith.addf %34, %46 : vector<32x64xf32>
    %c0_52 = arith.constant 0 : index
    %c1_53 = arith.constant 1 : index
    %c0_54 = arith.constant 0 : index
    %c0_55 = arith.constant 0 : index
    %48 = vector.load %arg1[%c0_52, %c1_53, %c0_54, %c0_55] : memref<1x6x10x40xf32, #tpu.memory_space<vmem>>, vector<1x4x8x40xf32>
    %49 = vector.shape_cast %48 : vector<1x4x8x40xf32> to vector<4x8x40xf32>
    %50 = vector.shape_cast %49 : vector<4x8x40xf32> to vector<32x40xf32>
    %c1_56 = arith.constant 1 : index
    %c0_57 = arith.constant 0 : index
    %c0_58 = arith.constant 0 : index
    %51 = vector.load %arg6[%c1_56, %c0_57, %c0_58] : memref<6x10x40xf32, #tpu.memory_space<vmem>>, vector<4x8x40xf32>
    %52 = vector.shape_cast %51 : vector<4x8x40xf32> to vector<32x40xf32>
    %c3 = arith.constant 3 : index
    %c0_59 = arith.constant 0 : index
    %c0_60 = arith.constant 0 : index
    %53 = vector.load %arg3[%c3, %c0_59, %c0_60] : memref<9x40x128xf32, #tpu.memory_space<vmem>>, vector<1x40x128xf32>
    %54 = vector.shape_cast %53 : vector<1x40x128xf32> to vector<40x128xf32>
    %cst_61 = arith.constant dense<0.000000e+00> : vector<32x128xf32>
    %55 = tpu.matmul %50, %54, %cst_61 {dimension_numbers = #tpu.dot_dimension_numbers<[1], [0], [0], [1], [0, 0, 1, 1], [], []>, precision = #tpu.contract_precision<fp32>} : vector<32x40xf32>, vector<40x128xf32>, vector<32x128xf32> -> vector<32x128xf32>
    %56 = arith.addf %43, %55 : vector<32x128xf32>
    %c3_62 = arith.constant 3 : index
    %c0_63 = arith.constant 0 : index
    %c0_64 = arith.constant 0 : index
    %57 = vector.load %arg4[%c3_62, %c0_63, %c0_64] : memref<9x40x64xf32, #tpu.memory_space<vmem>>, vector<1x40x64xf32>
    %58 = vector.shape_cast %57 : vector<1x40x64xf32> to vector<40x64xf32>
    %cst_65 = arith.constant dense<0.000000e+00> : vector<32x64xf32>
    %59 = tpu.matmul %52, %58, %cst_65 {dimension_numbers = #tpu.dot_dimension_numbers<[1], [0], [0], [1], [0, 0, 1, 1], [], []>, precision = #tpu.contract_precision<fp32>} : vector<32x40xf32>, vector<40x64xf32>, vector<32x64xf32> -> vector<32x64xf32>
    %60 = arith.addf %47, %59 : vector<32x64xf32>
    %c0_66 = arith.constant 0 : index
    %c1_67 = arith.constant 1 : index
    %c1_68 = arith.constant 1 : index
    %c0_69 = arith.constant 0 : index
    %61 = vector.load %arg1[%c0_66, %c1_67, %c1_68, %c0_69] : memref<1x6x10x40xf32, #tpu.memory_space<vmem>>, vector<1x4x8x40xf32>
    %62 = vector.shape_cast %61 : vector<1x4x8x40xf32> to vector<4x8x40xf32>
    %63 = vector.shape_cast %62 : vector<4x8x40xf32> to vector<32x40xf32>
    %c1_70 = arith.constant 1 : index
    %c1_71 = arith.constant 1 : index
    %c0_72 = arith.constant 0 : index
    %64 = vector.load %arg6[%c1_70, %c1_71, %c0_72] : memref<6x10x40xf32, #tpu.memory_space<vmem>>, vector<4x8x40xf32>
    %65 = vector.shape_cast %64 : vector<4x8x40xf32> to vector<32x40xf32>
    %c4 = arith.constant 4 : index
    %c0_73 = arith.constant 0 : index
    %c0_74 = arith.constant 0 : index
    %66 = vector.load %arg3[%c4, %c0_73, %c0_74] : memref<9x40x128xf32, #tpu.memory_space<vmem>>, vector<1x40x128xf32>
    %67 = vector.shape_cast %66 : vector<1x40x128xf32> to vector<40x128xf32>
    %cst_75 = arith.constant dense<0.000000e+00> : vector<32x128xf32>
    %68 = tpu.matmul %63, %67, %cst_75 {dimension_numbers = #tpu.dot_dimension_numbers<[1], [0], [0], [1], [0, 0, 1, 1], [], []>, precision = #tpu.contract_precision<fp32>} : vector<32x40xf32>, vector<40x128xf32>, vector<32x128xf32> -> vector<32x128xf32>
    %69 = arith.addf %56, %68 : vector<32x128xf32>
    %c4_76 = arith.constant 4 : index
    %c0_77 = arith.constant 0 : index
    %c0_78 = arith.constant 0 : index
    %70 = vector.load %arg4[%c4_76, %c0_77, %c0_78] : memref<9x40x64xf32, #tpu.memory_space<vmem>>, vector<1x40x64xf32>
    %71 = vector.shape_cast %70 : vector<1x40x64xf32> to vector<40x64xf32>
    %cst_79 = arith.constant dense<0.000000e+00> : vector<32x64xf32>
    %72 = tpu.matmul %65, %71, %cst_79 {dimension_numbers = #tpu.dot_dimension_numbers<[1], [0], [0], [1], [0, 0, 1, 1], [], []>, precision = #tpu.contract_precision<fp32>} : vector<32x40xf32>, vector<40x64xf32>, vector<32x64xf32> -> vector<32x64xf32>
    %73 = arith.addf %60, %72 : vector<32x64xf32>
    %c0_80 = arith.constant 0 : index
    %c1_81 = arith.constant 1 : index
    %c2_82 = arith.constant 2 : index
    %c0_83 = arith.constant 0 : index
    %74 = vector.load %arg1[%c0_80, %c1_81, %c2_82, %c0_83] : memref<1x6x10x40xf32, #tpu.memory_space<vmem>>, vector<1x4x8x40xf32>
    %75 = vector.shape_cast %74 : vector<1x4x8x40xf32> to vector<4x8x40xf32>
    %76 = vector.shape_cast %75 : vector<4x8x40xf32> to vector<32x40xf32>
    %c1_84 = arith.constant 1 : index
    %c2_85 = arith.constant 2 : index
    %c0_86 = arith.constant 0 : index
    %77 = vector.load %arg6[%c1_84, %c2_85, %c0_86] : memref<6x10x40xf32, #tpu.memory_space<vmem>>, vector<4x8x40xf32>
    %78 = vector.shape_cast %77 : vector<4x8x40xf32> to vector<32x40xf32>
    %c5 = arith.constant 5 : index
    %c0_87 = arith.constant 0 : index
    %c0_88 = arith.constant 0 : index
    %79 = vector.load %arg3[%c5, %c0_87, %c0_88] : memref<9x40x128xf32, #tpu.memory_space<vmem>>, vector<1x40x128xf32>
    %80 = vector.shape_cast %79 : vector<1x40x128xf32> to vector<40x128xf32>
    %cst_89 = arith.constant dense<0.000000e+00> : vector<32x128xf32>
    %81 = tpu.matmul %76, %80, %cst_89 {dimension_numbers = #tpu.dot_dimension_numbers<[1], [0], [0], [1], [0, 0, 1, 1], [], []>, precision = #tpu.contract_precision<fp32>} : vector<32x40xf32>, vector<40x128xf32>, vector<32x128xf32> -> vector<32x128xf32>
    %82 = arith.addf %69, %81 : vector<32x128xf32>
    %c5_90 = arith.constant 5 : index
    %c0_91 = arith.constant 0 : index
    %c0_92 = arith.constant 0 : index
    %83 = vector.load %arg4[%c5_90, %c0_91, %c0_92] : memref<9x40x64xf32, #tpu.memory_space<vmem>>, vector<1x40x64xf32>
    %84 = vector.shape_cast %83 : vector<1x40x64xf32> to vector<40x64xf32>
    %cst_93 = arith.constant dense<0.000000e+00> : vector<32x64xf32>
    %85 = tpu.matmul %78, %84, %cst_93 {dimension_numbers = #tpu.dot_dimension_numbers<[1], [0], [0], [1], [0, 0, 1, 1], [], []>, precision = #tpu.contract_precision<fp32>} : vector<32x40xf32>, vector<40x64xf32>, vector<32x64xf32> -> vector<32x64xf32>
    %86 = arith.addf %73, %85 : vector<32x64xf32>
    %c0_94 = arith.constant 0 : index
    %c2_95 = arith.constant 2 : index
    %c0_96 = arith.constant 0 : index
    %c0_97 = arith.constant 0 : index
    %87 = vector.load %arg1[%c0_94, %c2_95, %c0_96, %c0_97] : memref<1x6x10x40xf32, #tpu.memory_space<vmem>>, vector<1x4x8x40xf32>
    %88 = vector.shape_cast %87 : vector<1x4x8x40xf32> to vector<4x8x40xf32>
    %89 = vector.shape_cast %88 : vector<4x8x40xf32> to vector<32x40xf32>
    %c2_98 = arith.constant 2 : index
    %c0_99 = arith.constant 0 : index
    %c0_100 = arith.constant 0 : index
    %90 = vector.load %arg6[%c2_98, %c0_99, %c0_100] : memref<6x10x40xf32, #tpu.memory_space<vmem>>, vector<4x8x40xf32>
    %91 = vector.shape_cast %90 : vector<4x8x40xf32> to vector<32x40xf32>
    %c6 = arith.constant 6 : index
    %c0_101 = arith.constant 0 : index
    %c0_102 = arith.constant 0 : index
    %92 = vector.load %arg3[%c6, %c0_101, %c0_102] : memref<9x40x128xf32, #tpu.memory_space<vmem>>, vector<1x40x128xf32>
    %93 = vector.shape_cast %92 : vector<1x40x128xf32> to vector<40x128xf32>
    %cst_103 = arith.constant dense<0.000000e+00> : vector<32x128xf32>
    %94 = tpu.matmul %89, %93, %cst_103 {dimension_numbers = #tpu.dot_dimension_numbers<[1], [0], [0], [1], [0, 0, 1, 1], [], []>, precision = #tpu.contract_precision<fp32>} : vector<32x40xf32>, vector<40x128xf32>, vector<32x128xf32> -> vector<32x128xf32>
    %95 = arith.addf %82, %94 : vector<32x128xf32>
    %c6_104 = arith.constant 6 : index
    %c0_105 = arith.constant 0 : index
    %c0_106 = arith.constant 0 : index
    %96 = vector.load %arg4[%c6_104, %c0_105, %c0_106] : memref<9x40x64xf32, #tpu.memory_space<vmem>>, vector<1x40x64xf32>
    %97 = vector.shape_cast %96 : vector<1x40x64xf32> to vector<40x64xf32>
    %cst_107 = arith.constant dense<0.000000e+00> : vector<32x64xf32>
    %98 = tpu.matmul %91, %97, %cst_107 {dimension_numbers = #tpu.dot_dimension_numbers<[1], [0], [0], [1], [0, 0, 1, 1], [], []>, precision = #tpu.contract_precision<fp32>} : vector<32x40xf32>, vector<40x64xf32>, vector<32x64xf32> -> vector<32x64xf32>
    %99 = arith.addf %86, %98 : vector<32x64xf32>
    %c0_108 = arith.constant 0 : index
    %c2_109 = arith.constant 2 : index
    %c1_110 = arith.constant 1 : index
    %c0_111 = arith.constant 0 : index
    %100 = vector.load %arg1[%c0_108, %c2_109, %c1_110, %c0_111] : memref<1x6x10x40xf32, #tpu.memory_space<vmem>>, vector<1x4x8x40xf32>
    %101 = vector.shape_cast %100 : vector<1x4x8x40xf32> to vector<4x8x40xf32>
    %102 = vector.shape_cast %101 : vector<4x8x40xf32> to vector<32x40xf32>
    %c2_112 = arith.constant 2 : index
    %c1_113 = arith.constant 1 : index
    %c0_114 = arith.constant 0 : index
    %103 = vector.load %arg6[%c2_112, %c1_113, %c0_114] : memref<6x10x40xf32, #tpu.memory_space<vmem>>, vector<4x8x40xf32>
    %104 = vector.shape_cast %103 : vector<4x8x40xf32> to vector<32x40xf32>
    %c7 = arith.constant 7 : index
    %c0_115 = arith.constant 0 : index
    %c0_116 = arith.constant 0 : index
    %105 = vector.load %arg3[%c7, %c0_115, %c0_116] : memref<9x40x128xf32, #tpu.memory_space<vmem>>, vector<1x40x128xf32>
    %106 = vector.shape_cast %105 : vector<1x40x128xf32> to vector<40x128xf32>
    %cst_117 = arith.constant dense<0.000000e+00> : vector<32x128xf32>
    %107 = tpu.matmul %102, %106, %cst_117 {dimension_numbers = #tpu.dot_dimension_numbers<[1], [0], [0], [1], [0, 0, 1, 1], [], []>, precision = #tpu.contract_precision<fp32>} : vector<32x40xf32>, vector<40x128xf32>, vector<32x128xf32> -> vector<32x128xf32>
    %108 = arith.addf %95, %107 : vector<32x128xf32>
    %c7_118 = arith.constant 7 : index
    %c0_119 = arith.constant 0 : index
    %c0_120 = arith.constant 0 : index
    %109 = vector.load %arg4[%c7_118, %c0_119, %c0_120] : memref<9x40x64xf32, #tpu.memory_space<vmem>>, vector<1x40x64xf32>
    %110 = vector.shape_cast %109 : vector<1x40x64xf32> to vector<40x64xf32>
    %cst_121 = arith.constant dense<0.000000e+00> : vector<32x64xf32>
    %111 = tpu.matmul %104, %110, %cst_121 {dimension_numbers = #tpu.dot_dimension_numbers<[1], [0], [0], [1], [0, 0, 1, 1], [], []>, precision = #tpu.contract_precision<fp32>} : vector<32x40xf32>, vector<40x64xf32>, vector<32x64xf32> -> vector<32x64xf32>
    %112 = arith.addf %99, %111 : vector<32x64xf32>
    %c0_122 = arith.constant 0 : index
    %c2_123 = arith.constant 2 : index
    %c2_124 = arith.constant 2 : index
    %c0_125 = arith.constant 0 : index
    %113 = vector.load %arg1[%c0_122, %c2_123, %c2_124, %c0_125] : memref<1x6x10x40xf32, #tpu.memory_space<vmem>>, vector<1x4x8x40xf32>
    %114 = vector.shape_cast %113 : vector<1x4x8x40xf32> to vector<4x8x40xf32>
    %115 = vector.shape_cast %114 : vector<4x8x40xf32> to vector<32x40xf32>
    %c2_126 = arith.constant 2 : index
    %c2_127 = arith.constant 2 : index
    %c0_128 = arith.constant 0 : index
    %116 = vector.load %arg6[%c2_126, %c2_127, %c0_128] : memref<6x10x40xf32, #tpu.memory_space<vmem>>, vector<4x8x40xf32>
    %117 = vector.shape_cast %116 : vector<4x8x40xf32> to vector<32x40xf32>
    %c8 = arith.constant 8 : index
    %c0_129 = arith.constant 0 : index
    %c0_130 = arith.constant 0 : index
    %118 = vector.load %arg3[%c8, %c0_129, %c0_130] : memref<9x40x128xf32, #tpu.memory_space<vmem>>, vector<1x40x128xf32>
    %119 = vector.shape_cast %118 : vector<1x40x128xf32> to vector<40x128xf32>
    %cst_131 = arith.constant dense<0.000000e+00> : vector<32x128xf32>
    %120 = tpu.matmul %115, %119, %cst_131 {dimension_numbers = #tpu.dot_dimension_numbers<[1], [0], [0], [1], [0, 0, 1, 1], [], []>, precision = #tpu.contract_precision<fp32>} : vector<32x40xf32>, vector<40x128xf32>, vector<32x128xf32> -> vector<32x128xf32>
    %121 = arith.addf %108, %120 : vector<32x128xf32>
    %c8_132 = arith.constant 8 : index
    %c0_133 = arith.constant 0 : index
    %c0_134 = arith.constant 0 : index
    %122 = vector.load %arg4[%c8_132, %c0_133, %c0_134] : memref<9x40x64xf32, #tpu.memory_space<vmem>>, vector<1x40x64xf32>
    %123 = vector.shape_cast %122 : vector<1x40x64xf32> to vector<40x64xf32>
    %cst_135 = arith.constant dense<0.000000e+00> : vector<32x64xf32>
    %124 = tpu.matmul %117, %123, %cst_135 {dimension_numbers = #tpu.dot_dimension_numbers<[1], [0], [0], [1], [0, 0, 1, 1], [], []>, precision = #tpu.contract_precision<fp32>} : vector<32x40xf32>, vector<40x64xf32>, vector<32x64xf32> -> vector<32x64xf32>
    %125 = arith.addf %112, %124 : vector<32x64xf32>
    %126 = vector.extract_strided_slice %121 {offsets = [0, 0], sizes = [32, 64], strides = [1, 1]} : vector<32x128xf32> to vector<32x64xf32>
    %127 = vector.extract_strided_slice %121 {offsets = [0, 64], sizes = [32, 64], strides = [1, 1]} : vector<32x128xf32> to vector<32x64xf32>
    %cst_136 = arith.constant 0.000000e+00 : f32
    %128 = vector.broadcast %cst_136 : f32 to vector<32x64xf32>
    %129 = arith.cmpf ogt, %125, %128 : vector<32x64xf32>
    %cst_137 = arith.constant 0.00999999977 : f32
    %130 = vector.broadcast %cst_137 : f32 to vector<32x64xf32>
    %131 = arith.mulf %130, %125 : vector<32x64xf32>
    %132 = arith.select %129, %125, %131 : vector<32x64xi1>, vector<32x64xf32>
    %133 = arith.subf %126, %125 : vector<32x64xf32>
    %cst_138 = arith.constant 0.000000e+00 : f32
    %134 = vector.broadcast %cst_138 : f32 to vector<32x64xf32>
    %135 = arith.cmpf ogt, %133, %134 : vector<32x64xf32>
    %cst_139 = arith.constant 0.00999999977 : f32
    %136 = vector.broadcast %cst_139 : f32 to vector<32x64xf32>
    %137 = arith.mulf %136, %133 : vector<32x64xf32>
    %138 = arith.select %135, %133, %137 : vector<32x64xi1>, vector<32x64xf32>
    %139 = arith.addf %132, %138 : vector<32x64xf32>
    %cst_140 = arith.constant 0.000000e+00 : f32
    %140 = vector.broadcast %cst_140 : f32 to vector<32x64xf32>
    %141 = arith.cmpf ogt, %127, %140 : vector<32x64xf32>
    %cst_141 = arith.constant 0.00999999977 : f32
    %142 = vector.broadcast %cst_141 : f32 to vector<32x64xf32>
    %143 = arith.mulf %142, %127 : vector<32x64xf32>
    %144 = arith.select %141, %127, %143 : vector<32x64xi1>, vector<32x64xf32>
    %145 = tpu.concatenate %144, %139 in 1 : vector<32x64xf32>, vector<32x64xf32> -> vector<32x128xf32>
    %c0_142 = arith.constant 0 : index
    %c0_143 = arith.constant 0 : index
    %c0_144 = arith.constant 0 : index
    %146 = vector.load %arg5[%c0_142, %c0_143, %c0_144] : memref<1x32x128xf32, #tpu.memory_space<vmem>>, vector<1x32x128xf32>
    %147 = vector.shape_cast %146 : vector<1x32x128xf32> to vector<32x128xf32>
    %148 = vector.shape_cast %145 : vector<32x128xf32> to vector<1x32x128xf32>
    tpu.vector_store %arg5[%c0_142, %c0_143, %c0_144], %148 {strides = array<i32>} : memref<1x32x128xf32, #tpu.memory_space<vmem>>, vector<1x32x128xf32>,
    return
  }
  func.func @transform_0(%arg0: i32) -> (i32, i32, i32, i32) {
    %c0_i32 = arith.constant 0 : i32
    %c0_i32_0 = arith.constant 0 : i32
    %c0_i32_1 = arith.constant 0 : i32
    %c0_i32_2 = arith.constant 0 : i32
    return %arg0, %c0_i32, %c0_i32_0, %c0_i32_1 : i32, i32, i32, i32
  }
  func.func @transform_1(%arg0: i32) -> (i32, i32) {
    %c0_i32 = arith.constant 0 : i32
    %c0_i32_0 = arith.constant 0 : i32
    %c0_i32_1 = arith.constant 0 : i32
    return %c0_i32, %c0_i32_0 : i32, i32
  }
  func.func @transform_2(%arg0: i32) -> (i32, i32, i32) {
    %c0_i32 = arith.constant 0 : i32
    %c0_i32_0 = arith.constant 0 : i32
    %c0_i32_1 = arith.constant 0 : i32
    %c0_i32_2 = arith.constant 0 : i32
    return %c0_i32, %c0_i32_0, %c0_i32_1 : i32, i32, i32
  }
  func.func @transform_3(%arg0: i32) -> (i32, i32, i32) {
    %c0_i32 = arith.constant 0 : i32
    %c0_i32_0 = arith.constant 0 : i32
    %c0_i32_1 = arith.constant 0 : i32
    %c0_i32_2 = arith.constant 0 : i32
    return %c0_i32, %c0_i32_0, %c0_i32_1 : i32, i32, i32
  }
  func.func @transform_4(%arg0: i32) -> (i32, i32, i32) {
    %c0_i32 = arith.constant 0 : i32
    %c0_i32_0 = arith.constant 0 : i32
    %c0_i32_1 = arith.constant 0 : i32
    return %arg0, %c0_i32, %c0_i32_0 : i32, i32, i32
  }
}

</mosaic_0001>

<bundles_post_ra>
// kernel: tpu_custom_call.1
= control target key start
LH: loop header
LB: loop body
LE: loop exit
PB: predicated region body
PF: predicated region fallthrough
CT: control target
= control target key end

     0   :  { %9 = vsyncpa [#allocation4], 0  ;;  %s18823_s0 = inlined_call_operand.vmem [shape: f32[2,6,10,40], index: 0, kind: input, shape index: {}]   ;;  %s18824_s1 = inlined_call_operand.vmem [shape: f32[10,40], index: 1, kind: input, shape index: {}]   ;;  %s18825_s2 = inlined_call_operand.hbm [shape: f32[9,40,128], index: 2, kind: input, shape index: {}]   ;;  %s18826_s3 = inlined_call_operand.hbm [shape: f32[9,40,64], index: 3, kind: input, shape index: {}]   ;;  %s18827_s4 = inlined_call_operand.hbm [shape: f32[2,32,128], index: 4, kind: output, shape index: {}]  }
   0x1   :  { %10 = vsyncpa [#allocation7], 0 }
   0x2   :  { %11 = vsyncpa [#allocation5], 0 }
   0x3   :  { %13 = vsyncpa [#allocation5 + $0x1], 0  ;;  %s15153_s15 = smov 0   ;;  %s15155_s16 = smov 0  }
   0x4   :  { %s15157_s17 = smov 0   ;;  %s15159_s18 = smov 0  }
   0x5 LB: > { %s15174_s19 = sadd.s32 4294967295, %s15118_s18   ;;  %s12189_s20 = sadd.s32 4294967294, %s15118_s18   ;;  %s15118_s18 = sphi %s15159_s18, %s19071_s18   ;;  %s15114_s17 = sphi %s15157_s17, %s19070_s17   ;;  %s15110_s16 = sphi %s15155_s16, %s19069_s16   ;;  %s15106_s15 = sphi %s15153_s15, %s19068_s15  }
   0x6   : > { %s15178_s21 = sadd.s32 1, %s15118_s18   ;;  %s115_s22 = sadd.s32 1, %s15114_s17 }
   0x7   : > { %s112_s23 = ssub.s32 %s15118_s18, %s15178_s21  ;;  %p125_p0 = scmp.ne.s32.totalorder %s15114_s17, %s15110_s16 }
   0x8   : > { %p113_p1 = scmp.eq.s32.totalorder %s112_s23, 0  ;;  %p126_p2 = scmp.eq.s32.totalorder %s15174_s19, 1 }
   0x9   : > { %p131_p3 = scmp.ne.s32.totalorder %s15110_s16, %s15106_s15  ;;  %p132_p4 = scmp.eq.s32.totalorder %s12189_s20, 1 }
   0xa   : > { %s15189_s24 = scalar_select %p113_p1, %s15114_s17, %s115_s22  }
   0xb   : > { %p15191_p5 = por %p126_p2, %p125_p0  ;;  %p15195_p6 = por %p132_p4, %p131_p3 }
   0xc   : > { %p12190_p7 = scmp.ge.s32.totalorder %s15118_s18, 1  ;;  %p139_p8 = scmp.lt.s32.totalorder %s15118_s18, 3 }
   0xd   : > { %s18840_s26 = scalar_select %p15195_p6, 1, 0 }
   0xe   : > { %p18828_p9 = scmp.eq.s32.totalorder %s15174_s19, 0  ;;  %p15202_p10 = pnand %p12190_p7, %p139_p8 }
   0xf   : > { %s15120_s28 = smov [#allocation3]   ;;  %s15121_s5 = smov [#allocation6]  }
  0x10   : > { %s154_s29 = sshll.u32 %s15120_s28, 4  ;;  %p14940_p11 = pneg %p15202_p10  ;;  %s155_s29 = int_to_ptr.vmem [resolvable:$true] %s154_s29 }
  0x11   : > { %s167_s6 = sshll.u32 %s15121_s5, 4  ;;  %s15009_s7 = scalar_lea.vmem %s155_s29, 5760  ;;  %s168_s6 = int_to_ptr.vmem [resolvable:$true] %s167_s6 }
  0x12   : > { %p15210_p12 = pnand %p18828_p9, %p14940_p11  ;;  %p15010_p0 = scmp.ne.s32.totalorder %s155_s29, %s15009_s7 }
  0x13   : > { %p15017_p3 = scmp.lt.s32.totalorder %s155_s29, %s155_s29  ;;  %p15018_p4 = scmp.lt.s32.totalorder %s15009_s7, %s15009_s7 }
  0x14   : > { %p15000_p13 = pneg %p15210_p12 }
  0x15   : > { %p15019_p7 = por %p15018_p4, %p15017_p3 }
  0x16   : > { %p15012_p1 = pnand %p15010_p0, %p15000_p13 }
  0x18   : > { %p15013_p2 = pneg %p15012_p1 }
  0x1a   : > { %p15020_p8 = pnand %p15019_p7, %p15013_p2 }
  0x1c   : > { %15023 = shalt.err (!%p15020_p8)
}
  0x1d   : > { %s15122_s8 = smov 128   ;;  %s15123_s9 = smov 8  }
  0x1e   : > { %14943 = dma.hbm_to_vmem [thread:$0]  (!%p15210_p12), %s18825_s2, 5760, %s155_s29, [#allocation4], %s15122_s8, %s15122_s8, %s15123_s9  }
  0x1f   : > { %s15035_s12 = scalar_lea.vmem %s168_s6, 5760  ;;  %p15043_p9 = scmp.lt.s32.totalorder %s168_s6, %s168_s6 }
  0x20   : > { %p15036_p11 = scmp.ne.s32.totalorder %s168_s6, %s15035_s12  ;;  %p15044_p6 = scmp.lt.s32.totalorder %s15035_s12, %s15035_s12 }
  0x22   : > { %p15038_p0 = pnand %p15036_p11, %p15000_p13  ;;  %p15045_p3 = por %p15044_p6, %p15043_p9 }
  0x24   : > { %p15039_p1 = pneg %p15038_p0 }
  0x26   : > { %p15046_p2 = pnand %p15045_p3, %p15039_p1 }
  0x28   : > { %15049 = shalt.err (!%p15046_p2)
}
  0x29   : > { %14946 = dma.hbm_to_vmem [thread:$0]  (!%p15210_p12), %s18826_s3, 5760, %s168_s6, [#allocation7], %s15122_s8, %s15122_s8, %s15123_s9  }
  0x2a   : > { %191 = sbr.rel (%p15202_p10) target bundleno = 1159 (0x487), region = 36 }
  0x2f   : > { %p18843_p4 = scmp.eq.s32.totalorder %s15174_s19, 0 }
  0x31   : > { %15093 = dma.done.wait (%p18843_p4), [#allocation4], 5760   ;;  %p18844_p13 = pmov %p18843_p4 }
  0x32   : > { %p18845_p7 = pmov %p18843_p4 }
  0x33   : > { %15095 = vsyncadd (%p18844_p13), [#allocation4], 4294961536 }
  0x34   : > { %15097 = dma.done.wait (%p18845_p7), [#allocation7], 5760   ;;  %p18846_p6 = pmov %p18843_p4 }
  0x35   : > { %p221_p9 = scmp.lt.s32.totalorder %s15174_s19, 1  ;;  %vm252_vm0 = vcmask 326656   ;;  %v297_v0 = vld [vmem:[#allocation3 + $0x48] sm:$0xff]  ;;  %v296_v1 = vld [vmem:[#allocation3 + $0x40] sm:$0xff]  ;;  %v295_v2 = vld [vmem:[#allocation3 + $0x38] sm:$0xff]  ;;  %vm254_vm1 = vcmask 320512  }
  0x36   : > { %15099 = vsyncadd (%p18846_p6), [#allocation7], 4294961536  ;;  %v15249_v3 = vand.u32 4294901760, %v297_v0  ;;  %v15251_v4 = vand.u32 4294901760, %v296_v1  ;;  %v15253_v5 = vand.u32 4294901760, %v295_v2  ;;  %v294_v6 = vld [vmem:[#allocation3 + $0x30] sm:$0xff] }
  0x37   : > { %s222_s20 = scalar_select %p221_p9, %s15174_s19, 1  ;;  %v293_v7 = vld [vmem:[#allocation3 + $0x28] sm:$0xff]  ;;  %v15256_v9 = vand.u32 4294901760, %v294_v6  ;;  %v15346_v59 = vld [vmem:[%s18824_s1] sm:$0xff]  ;;  %vm12082_vm14 = vcmask 523264  }
  0x38   : > { %v15258_v10 = vand.u32 4294901760, %v293_v7  ;;  %13201 = vmatprep.subr.mxu0 %v15249_v3  ;;  %v444_v14 = vsub.f32 %v297_v0, %v15249_v3  ;;  %v451_v16 = vsub.f32 %v296_v1, %v15251_v4  ;;  %v458_v20 = vsub.f32 %v295_v2, %v15253_v5  ;;  %v239_v60 = vld [vmem:[%s18824_s1 + $0x8] sm:$0x3]  ;;  %s15124_s13 = smov 64   ;;  %s218_s14 = sand.u32 1, %s15110_s16  }
  0x39   : > { %s14929_s22 = smul.u32 96, %s222_s20  ;;  %13202 = vmatpush3.msra.mxu0 %v15249_v3  ;;  %v15275_v21 = vsub.f32 %v294_v6, %v15256_v9  ;;  %s12197_s20 = sshll.u32 %s218_s14, 5 }
  0x3a   : > { %13203 = vmatprep.subr.mxu0 %v15251_v4  ;;  %v15279_v23 = vand.u32 4294901760, %v444_v14  ;;  %v15284_v25 = vand.u32 4294901760, %v451_v16  ;;  %v15293_v28 = vand.u32 4294901760, %v458_v20  ;;  %v472_v47 = vsub.f32 %v293_v7, %v15258_v10  ;;  %s12228_s27 = sshll.u32 %s15174_s19, 9  ;;  %s18783_s19 = scalar_lea.sflag [#allocation5], %s218_s14 }
  0x3b   : > { %s15247_s28 = scalar_lea.vmem %s18823_s0, %s14929_s22  ;;  %13204 = vmatpush3.msra.mxu0 %v15251_v4  ;;  %v15296_v29 = vand.u32 4294901760, %v15275_v21  ;;  %s220_s22 = scalar_lea.vmem [#allocation8], %s12197_s20 }
  0x3c   : > { %v284_v8 = vld [vmem:[%s15247_s28 + $0x1] sm:$0xff]  ;;  %v285_v12 = vld [vmem:[%s15247_s28 + $0x11] sm:$0xff]  ;;  %13205 = vmatprep.subr.mxu0 %v15253_v5  ;;  %v446_v31 = vsub.f32 %v444_v14, %v15279_v23  ;;  %v453_v33 = vsub.f32 %v451_v16, %v15284_v25  ;;  %v460_v36 = vsub.f32 %v458_v20, %v15293_v28  ;;  %v15332_v51 = vand.u32 4294901760, %v472_v47  ;;  %s12105_s23 = sshll.u32 %s220_s22, 4  ;;  %s18780_s30 = scalar_lea.hbm %s18827_s4, %s12228_s27  ;;  %s18774_s23 = int_to_ptr.vmem [resolvable:$true] %s12105_s23 }
  0x3d   : > { %v299_v11 = vsel %vm252_vm0, %v284_v8, 0  ;;  %v286_v13 = vld [vmem:[%s15247_s28 + $0x21] sm:$0xff]  ;;  %v302_v17 = vsel %vm252_vm0, %v285_v12, 0  ;;  %v287_v18 = vld [vmem:[%s15247_s28 + $0x31] sm:$0xff]  ;;  %13206 = vmatpush3.msra.mxu0 %v15253_v5  ;;  %v467_v43 = vsub.f32 %v15275_v21, %v15296_v29  ;;  %s15050_s5 = scalar_lea.vmem %s18774_s23, 512  ;;  %s15125_s6 = smov [#allocation8]  }
  0x3e   : > { %v15265_v15 = vand.u32 4294901760, %v299_v11  ;;  %v15271_v19 = vand.u32 4294901760, %v302_v17  ;;  %v305_v22 = vsel %vm252_vm0, %v286_v13, 0  ;;  %v308_v30 = vsel %vm252_vm0, %v287_v18, 0  ;;  %13207 = vmatprep.subr.mxu0 %v15256_v9  ;;  %v227_v58 = vld [vmem:[%s15247_s28 + $0x8] sm:$0x3]  ;;  %p15051_p10 = scmp.ne.s32.totalorder %s18774_s23, %s15050_s5 }
  0x3f   : > { %v15286_v26 = vand.u32 4294901760, %v305_v22  ;;  %v15309_v37 = vand.u32 4294901760, %v308_v30  ;;  %v447_v38 = vand.u32 4294901760, %v446_v31  ;;  %v454_v40 = vand.u32 4294901760, %v453_v33  ;;  %13208 = vmatpush3.msra.mxu0 %v15256_v9  ;;  %v229_v61 = vld [vmem:[%s15247_s28 + $0x18] sm:$0x3] }
  0x40   : > { %v15282_v24 = vsub.f32 %v299_v11, %v15265_v15  ;;  %13227 = vmatprep.mubr.f32.mxu1 %v15265_v15  ;;  %v15291_v27 = vsub.f32 %v302_v17, %v15271_v19  ;;  %13209 = vmatprep.subr.mxu0 %v15258_v10  ;;  %v461_v49 = vand.u32 4294901760, %v460_v36  ;;  %v468_v52 = vand.u32 4294901760, %v467_v43  ;;  %v266_v62 = vld [vmem:[%s15247_s28] sm:$0xff]  ;;  %v267_v63 = vld [vmem:[%s15247_s28 + $0x10] sm:$0xff]  ;;  %v231_v2 = vld [vmem:[%s15247_s28 + $0x28] sm:$0x3]  ;;  %p15052_p12 = pnand %p15051_p10, %p15191_p5 }
  0x41   : > { %v15304_v34 = vsub.f32 %v305_v22, %v15286_v26  ;;  %v15323_v44 = vsub.f32 %v308_v30, %v15309_v37  ;;  %13217 = vmatprep.subr.mxu1 %v447_v38  ;;  %13210 = vmatpush3.msra.mxu0 %v15258_v10  ;;  %v474_v55 = vsub.f32 %v472_v47, %v15332_v51  ;;  %v268_v6 = vld [vmem:[%s15247_s28 + $0x20] sm:$0xff]  ;;  %v233_v11 = vld [vmem:[%s15247_s28 + $0x38] sm:$0x3]  ;;  %v269_v13 = vld [vmem:[%s15247_s28 + $0x30] sm:$0xff]  ;;  %s15054_s7 = sshll.u32 %s15125_s6, 4  ;;  %s15055_s7 = int_to_ptr.vmem [resolvable:$false] %s15054_s7 }
  0x42   : > { %v382_v32 = vand.u32 4294901760, %v15282_v24  ;;  %v392_v35 = vand.u32 4294901760, %v15291_v27  ;;  %13218 = vmatpush3.msra.mxu1 %v447_v38  ;;  %13233 = vmatprep.subr.mxu0 %v444_v14  ;;  %v240_v0 = vmul.f32 %v266_v62, %v15346_v59  ;;  %v241_v1 = vmul.f32 %v239_v60, %v227_v58  ;;  %v278_v12 = vld [vmem:[#allocation3 + $0x20] sm:$0xff]  ;;  %v276_v31 = vld [vmem:[#allocation3 + $0x10] sm:$0xff]  ;;  %p15053_p8 = pneg %p15052_p12  ;;  %s15056_s8 = scalar_lea.vmem %s15055_s7, 1024 }
  0x43   : > { %v402_v41 = vand.u32 4294901760, %v15304_v34  ;;  %v412_v50 = vand.u32 4294901760, %v15323_v44  ;;  %13219 = vmatprep.subr.mxu1 %v454_v40  ;;  %v475_v57 = vand.u32 4294901760, %v474_v55  ;;  %v242_v7 = vmul.f32 %v267_v63, %v15346_v59  ;;  %p15057_p11 = scmp.lt.s32.totalorder %s18774_s23, %s15055_s7  ;;  %p15058_p0 = scmp.lt.s32.totalorder %s15056_s8, %s15050_s5 }
  0x44   : > { %v383_v39 = vsub.f32 %v15282_v24, %v382_v32  ;;  %v393_v42 = vsub.f32 %v15291_v27, %v392_v35  ;;  %13220 = vmatpush3.msra.mxu1 %v454_v40  ;;  %v243_v8 = vmul.f32 %v239_v60, %v229_v61  ;;  %253 = vst.msk [vmem:[#allocation2] sm:$0xff] %vm252_vm0, %v240_v0  ;;  %v944_v36 = vsel %vm252_vm0, %v268_v6, 0 }
  0x45   : > { %v403_v46 = vsub.f32 %v15304_v34, %v402_v41  ;;  %v413_v53 = vsub.f32 %v15323_v44, %v412_v50  ;;  %13221 = vmatprep.subr.mxu1 %v461_v49  ;;  %255 = vst.msk [vmem:[#allocation2 + $0x8] sm:$0x3] %vm254_vm1, %v241_v1  ;;  %v245_v17 = vmul.f32 %v239_v60, %v231_v2  ;;  %v15412_v38 = vand.u32 4294901760, %v276_v31  ;;  %p15059_p1 = por %p15058_p0, %p15057_p11 }
  0x46   : > { %v384_v45 = vand.u32 4294901760, %v383_v39  ;;  %v394_v48 = vand.u32 4294901760, %v393_v42  ;;  %13222 = vmatpush3.msra.mxu1 %v461_v49  ;;  %256 = vst.msk [vmem:[#allocation2 + $0x10] sm:$0xff] %vm252_vm0, %v242_v7  ;;  %v246_v18 = vmul.f32 %v269_v13, %v15346_v59  ;;  %v247_v22 = vmul.f32 %v239_v60, %v233_v11  ;;  %v275_v39 = vld [vmem:[#allocation3 + $0x8] sm:$0xff] }
  0x47   : > { %v404_v54 = vand.u32 4294901760, %v403_v46  ;;  %v414_v56 = vand.u32 4294901760, %v413_v53  ;;  %13223 = vmatprep.subr.mxu1 %v468_v52  ;;  %257 = vst.msk [vmem:[#allocation2 + $0x18] sm:$0x3] %vm254_vm1, %v243_v8  ;;  %259 = vst.msk [vmem:[#allocation2 + $0x28] sm:$0x3] %vm254_vm1, %v245_v17  ;;  %p15060_p3 = pnand %p15059_p1, %p15053_p8 }
  0x48   : > { %13211 = vmatprep.mubr.f32.mxu0 %v384_v45  ;;  %13224 = vmatpush3.msra.mxu1 %v468_v52  ;;  %260 = vst.msk [vmem:[#allocation2 + $0x30] sm:$0xff] %vm252_vm0, %v246_v18  ;;  %v947_v42 = vsel %vm252_vm0, %v269_v13, 0  ;;  %v1579_v18 = vld [vmem:[#allocation6 + $0x38] sm:$0xff] }
  0x49   : > { %13212 = vmatmul.mubr.f32.vlgmr.msra.gmra.mxu0 %v394_v48  ;;  %13225 = vmatprep.subr.mxu1 %v475_v57  ;;  %261 = vst.msk [vmem:[#allocation2 + $0x38] sm:$0x3] %vm254_vm1, %v247_v22  ;;  %v15437_v45 = vand.u32 4294901760, %v947_v42  ;;  %v1578_v22 = vld [vmem:[#allocation6 + $0x30] sm:$0xff] }
  0x4a   : > { %13234 = vmatpush3.msra.mxu0 %v444_v14  ;;  %13214 = vmatprep.mubr.f32.mxu0 %v404_v54  ;;  %v244_v14 = vmul.f32 %v268_v6, %v15346_v59 }
  0x4b   : > { %13235 = vmatprep.subr.mxu0 %v451_v16  ;;  %13226 = vmatpush3.msra.mxu1 %v475_v57 }
  0x4c   : > { %13236 = vmatpush3.msra.mxu0 %v451_v16  ;;  %13228 = vmatmul.mubr.f32.vlgmr.msra.gmra.mxu1 %v15271_v19  ;;  %v938_v16 = vsel %vm252_vm0, %v266_v62, 0  ;;  %258 = vst.msk [vmem:[#allocation2 + $0x20] sm:$0xff] %vm252_vm0, %v244_v14 }
  0x4d   : > { %13237 = vmatprep.subr.mxu0 %v458_v20  ;;  %13215 = vmatmul.mubr.f32.gmra.mxu0 %v414_v56 }
  0x4e   : > { %13238 = vmatpush3.msra.mxu0 %v458_v20  ;;  %13249 = vmatprep.subr.mxu1 %v15249_v3  ;;  %v277_v20 = vld [vmem:[#allocation3 + $0x18] sm:$0xff] }
  0x4f   : > { %13239 = vmatprep.subr.mxu0 %v15275_v21  ;;  %13243 = vmatprep.mubr.f32.mxu0 %v15282_v24  ;;  %v15396_v30 = vand.u32 4294901760, %v277_v20  ;;  %v289_v8 = vld [vmem:[#allocation2 + $0x11] sm:$0xff] }
  0x50   : > { %13240 = vmatpush3.msra.mxu0 %v15275_v21  ;;  %13250 = vmatpush3.msra.mxu1 %v15249_v3  ;;  %v941_v21 = vsel %vm252_vm0, %v267_v63, 0  ;;  %v1586_v14 = vsel %vm252_vm0, %v289_v8, 0 }
  0x51   : > { %13241 = vmatprep.subr.mxu0 %v472_v47  ;;  %13251 = vmatprep.subr.mxu1 %v15251_v4  ;;  %v15398_v33 = vand.u32 4294901760, %v941_v21 }
  0x52   : > { %13242 = vmatpush3.msra.mxu0 %v472_v47  ;;  %13230 = vmatprep.mubr.f32.mxu1 %v15286_v26 }
  0x53   : > { %13244 = vmatmul.mubr.f32.vlgmr.msra.gmra.mxu0 %v15291_v27  ;;  %13265 = vmatprep.subr.mxu0 %v15279_v23  ;;  %v15421_v24 = vsub.f32 %v941_v21, %v15398_v33  ;;  %v15424_v27 = vsub.f32 %v277_v20, %v15396_v30  ;;  %v290_v20 = vld [vmem:[#allocation2 + $0x21] sm:$0xff]  ;;  %v15552_v21 = vand.u32 4294901760, %v1586_v14 }
  0x54   : > { %13252 = vmatpush3.msra.mxu1 %v15251_v4  ;;  %13266 = vmatpush3.msra.mxu0 %v15279_v23  ;;  %v15385_v23 = vand.u32 4294901760, %v278_v12  ;;  %v272_v8 = vld [vmem:[#allocation2 + $0x20] sm:$0xff] }
  0x55   : > { %13231 = vmatmul.mubr.f32.gmra.mxu1 %v15309_v37  ;;  %13253 = vmatprep.subr.mxu1 %v15253_v5  ;;  %v1031_v48 = vand.u32 4294901760, %v15421_v24  ;;  %v15452_v49 = vand.u32 4294901760, %v15424_v27 }
  0x56   : > { %13267 = vmatprep.subr.mxu0 %v15284_v25  ;;  %13246 = vmatprep.mubr.f32.mxu0 %v15304_v34  ;;  %v15465_v34 = vsub.f32 %v947_v42, %v15437_v45 }
  0x57   : > { %13254 = vmatpush3.msra.mxu1 %v15253_v5  ;;  %13268 = vmatpush3.msra.mxu0 %v15284_v25  ;;  %v15391_v25 = vand.u32 4294901760, %v938_v16  ;;  %v1032_v52 = vsub.f32 %v15421_v24, %v1031_v48 }
  0x58   : > { %13247 = vmatmul.mubr.f32.gmra.mxu0 %v15323_v44  ;;  %13255 = vmatprep.subr.mxu1 %v15256_v9  ;;  %v1051_v56 = vand.u32 4294901760, %v15465_v34 }
  0x59   : > { %13269 = vmatprep.subr.mxu0 %v15293_v28  ;;  %13256 = vmatpush3.msra.mxu1 %v15256_v9  ;;  %v15415_v40 = vsub.f32 %v938_v16, %v15391_v25 }
  0x5a   : > { %13270 = vmatpush3.msra.mxu0 %v15293_v28  ;;  %13257 = vmatprep.subr.mxu1 %v15258_v10  ;;  %v15407_v28 = vsub.f32 %v278_v12, %v15385_v23  ;;  %v1580_v12 = vld [vmem:[#allocation6 + $0x40] sm:$0xff] }
  0x5b   : > { %13271 = vmatprep.subr.mxu0 %v15296_v29  ;;  %13258 = vmatpush3.msra.mxu1 %v15258_v10  ;;  %v1021_v46 = vand.u32 4294901760, %v15415_v40  ;;  %v15548_v17 = vand.u32 4294901760, %v1580_v12 }
  0x5c   : > { %13259 = vmatprep.mubr.f32.mxu1 %v382_v32  ;;  %13272 = vmatpush3.msra.mxu0 %v15296_v29  ;;  %v15426_v29 = vand.u32 4294901760, %v944_v36  ;;  %v274_v32 = vld [vmem:[#allocation3] sm:$0xff]  ;;  %v15435_v43 = vand.u32 4294901760, %v15407_v28 }
  0x5d   : > { %13260 = vmatmul.mubr.f32.vlgmr.msra.gmra.mxu1 %v392_v35  ;;  %13273 = vmatprep.subr.mxu0 %v15332_v51  ;;  %v15432_v35 = vand.u32 4294901760, %v275_v39  ;;  %v15448_v47 = vand.u32 4294901760, %v274_v32  ;;  %v1022_v44 = vsub.f32 %v15415_v40, %v1021_v46  ;;  %v15572_v42 = vsub.f32 %v1580_v12, %v15548_v17 }
  0x5e   : > { %13281 = vmatprep.subr.mxu1 %v15249_v3  ;;  %13274 = vmatpush3.msra.mxu0 %v15332_v51  ;;  %v15455_v51 = vsub.f32 %v944_v36, %v15426_v29  ;;  %v291_v36 = vld [vmem:[#allocation2 + $0x31] sm:$0xff] }
  0x5f   : > { %13275 = vmatprep.mubr.f32.mxu0 %v15265_v15  ;;  %13282 = vmatpush3.msra.mxu1 %v15249_v3  ;;  %v15444_v3 = vsub.f32 %v276_v31, %v15412_v38  ;;  %v1111_v54 = vsub.f32 %v274_v32, %v15448_v47  ;;  %v1023_v58 = vand.u32 4294901760, %v1022_v44  ;;  %v15579_v32 = vsub.f32 %v1586_v14, %v15552_v21  ;;  %v281_v14 = vld [vmem:[#allocation6 + $0x10] sm:$0xff] }
  0x60   : > { %13276 = vmatmul.mubr.f32.vlgmr.msra.gmra.mxu0 %v15271_v19  ;;  %13283 = vmatprep.subr.mxu1 %v15251_v4  ;;  %v1041_v53 = vand.u32 4294901760, %v15455_v51 }
  0x61   : > { %13297 = vmatprep.subr.mxu0 %v15385_v23  ;;  %13262 = vmatprep.mubr.f32.mxu1 %v402_v41  ;;  %v1104_v41 = vsub.f32 %v275_v39, %v15432_v35  ;;  %v15501_v63 = vand.u32 4294901760, %v1111_v54 }
  0x62   : > { %13284 = vmatpush3.msra.mxu1 %v15251_v4  ;;  %13298 = vmatpush3.msra.mxu0 %v15385_v23  ;;  %v1085_v4 = vsub.f32 %v15407_v28, %v15435_v43  ;;  %v1042_v62 = vsub.f32 %v15455_v51, %v1041_v53 }
  0x63   : > { %13263 = vmatmul.mubr.f32.gmra.mxu1 %v412_v50  ;;  %13285 = vmatprep.subr.mxu1 %v15253_v5  ;;  %v15474_v50 = vand.u32 4294901760, %v15444_v3  ;;  %v15490_v57 = vand.u32 4294901760, %v1104_v41  ;;  %v1113_v2 = vsub.f32 %v1111_v54, %v15501_v63 }
  0x64   : > { %13299 = vmatprep.subr.mxu0 %v15396_v30  ;;  %13278 = vmatprep.mubr.f32.mxu0 %v15286_v26  ;;  %v1086_v55 = vand.u32 4294901760, %v1085_v4  ;;  %v1043_v1 = vand.u32 4294901760, %v1042_v62  ;;  %v15601_v4 = vand.u32 4294901760, %v15572_v42 }
  0x65   : > { %13286 = vmatpush3.msra.mxu1 %v15253_v5  ;;  %13300 = vmatpush3.msra.mxu0 %v15396_v30  ;;  %v1092_v5 = vsub.f32 %v15424_v27, %v15452_v49  ;;  %v1099_v60 = vsub.f32 %v15444_v3, %v15474_v50  ;;  %v1114_v7 = vand.u32 4294901760, %v1113_v2 }
  0x66   : > { %13279 = vmatmul.mubr.f32.gmra.mxu0 %v15309_v37  ;;  %13287 = vmatprep.subr.mxu1 %v15256_v9 }
  0x67   : > { %13301 = vmatprep.subr.mxu0 %v15412_v38  ;;  %13288 = vmatpush3.msra.mxu1 %v15256_v9  ;;  %v1033_v9 = vand.u32 4294901760, %v1032_v52  ;;  %v1093_v61 = vand.u32 4294901760, %v1092_v5  ;;  %v1100_v0 = vand.u32 4294901760, %v1099_v60  ;;  %v1737_v5 = vsub.f32 %v15572_v42, %v15601_v4 }
  0x68   : > { %13302 = vmatpush3.msra.mxu0 %v15412_v38  ;;  %13289 = vmatprep.subr.mxu1 %v15258_v10 }
  0x69   : > { %13303 = vmatprep.subr.mxu0 %v15432_v35  ;;  %13290 = vmatpush3.msra.mxu1 %v15258_v10  ;;  %v1052_v10 = vsub.f32 %v15465_v34, %v1051_v56  ;;  %v1738_v60 = vand.u32 4294901760, %v1737_v5 }
  0x6a   : > { %13291 = vmatprep.mubr.f32.mxu1 %v15265_v15  ;;  %13304 = vmatpush3.msra.mxu0 %v15432_v35  ;;  %v1106_v15 = vsub.f32 %v1104_v41, %v15490_v57 }
  0x6b   : > { %13292 = vmatmul.mubr.f32.vlgmr.msra.gmra.mxu1 %v15271_v19  ;;  %13305 = vmatprep.subr.mxu0 %v15448_v47  ;;  %v1053_v19 = vand.u32 4294901760, %v1052_v10 }
  0x6c   : > { %13313 = vmatprep.subr.mxu1 %v1086_v55  ;;  %13306 = vmatpush3.msra.mxu0 %v15448_v47  ;;  %v1107_v6 = vand.u32 4294901760, %v1106_v15 }
  0x6d   : > { %13307 = vmatprep.mubr.f32.mxu0 %v1023_v58  ;;  %13314 = vmatpush3.msra.mxu1 %v1086_v55 }
  0x6e   : > { %13308 = vmatmul.mubr.f32.vlgmr.msra.gmra.mxu0 %v1033_v9  ;;  %13315 = vmatprep.subr.mxu1 %v1093_v61 }
  0x6f   : > { %13329 = vmatprep.subr.mxu0 %v15407_v28  ;;  %13294 = vmatprep.mubr.f32.mxu1 %v15286_v26  ;;  %v288_v26 = vld [vmem:[#allocation2 + $0x1] sm:$0xff] }
  0x70   : > { %13316 = vmatpush3.msra.mxu1 %v1093_v61  ;;  %13330 = vmatpush3.msra.mxu0 %v15407_v28  ;;  %v1583_v11 = vsel %vm252_vm0, %v288_v26, 0  ;;  %v15563_v28 = vand.u32 4294901760, %v1579_v18 }
  0x71   : > { %13295 = vmatmul.mubr.f32.gmra.mxu1 %v15309_v37  ;;  %13317 = vmatprep.subr.mxu1 %v1100_v0  ;;  %v1581_v37 = vld [vmem:[#allocation6 + $0x48] sm:$0xff]  ;;  %v15544_v16 = vand.u32 4294901760, %v1583_v11 }
  0x72   : > { %13331 = vmatprep.subr.mxu0 %v15424_v27  ;;  %13310 = vmatprep.mubr.f32.mxu0 %v1043_v1  ;;  %v15539_v13 = vand.u32 4294901760, %v1581_v37 }
  0x73   : > { %13318 = vmatpush3.msra.mxu1 %v1100_v0  ;;  %13332 = vmatpush3.msra.mxu0 %v15424_v27  ;;  %v15566_v39 = vsub.f32 %v1583_v11, %v15544_v16  ;;  %v1577_v27 = vld [vmem:[#allocation6 + $0x28] sm:$0xff] }
  0x74   : > { %13311 = vmatmul.mubr.f32.gmra.mxu0 %v1053_v19  ;;  %13319 = vmatprep.subr.mxu1 %v1107_v6  ;;  %v15558_v31 = vsub.f32 %v1581_v37, %v15539_v13  ;;  %v283_v19 = vld [vmem:[#allocation6 + $0x20] sm:$0xff] }
  0x75   : > { %13333 = vmatprep.subr.mxu0 %v15444_v3  ;;  %13320 = vmatpush3.msra.mxu1 %v1107_v6  ;;  %v15698_v37 = vand.u32 4294901760, %v283_v19 }
  0x76   : > { %13334 = vmatpush3.msra.mxu0 %v15444_v3  ;;  %13321 = vmatprep.subr.mxu1 %v1114_v7 }
  0x77   : > { %13335 = vmatprep.subr.mxu0 %v1104_v41  ;;  %13322 = vmatpush3.msra.mxu1 %v1114_v7  ;;  %v282_v7 = vld [vmem:[#allocation6 + $0x18] sm:$0xff] }
  0x78   : > { %13323 = vmatprep.mubr.f32.mxu1 %v15391_v25  ;;  %13336 = vmatpush3.msra.mxu0 %v1104_v41  ;;  %v15706_v12 = vand.u32 4294901760, %v282_v7 }
  0x79   : > { %13324 = vmatmul.mubr.f32.vlgmr.msra.gmra.mxu1 %v15398_v33  ;;  %13337 = vmatprep.subr.mxu0 %v1111_v54 }
  0x7a   : > { %13345 = vmatprep.subr.mxu1 %v15385_v23  ;;  %13338 = vmatpush3.msra.mxu0 %v1111_v54 }
  0x7b   : > { %13339 = vmatprep.mubr.f32.mxu0 %v15415_v40  ;;  %13346 = vmatpush3.msra.mxu1 %v15385_v23  ;;  %v1589_v40 = vsel %vm252_vm0, %v290_v20, 0  ;;  %v273_v20 = vld [vmem:[#allocation2 + $0x30] sm:$0xff] }
  0x7c   : > { %13340 = vmatmul.mubr.f32.vlgmr.msra.gmra.mxu0 %v15421_v24  ;;  %13347 = vmatprep.subr.mxu1 %v15396_v30  ;;  %v15576_v24 = vand.u32 4294901760, %v1578_v22  ;;  %v15587_v3 = vand.u32 4294901760, %v1589_v40 }
  0x7d   : > { %13361 = vmatprep.subr.mxu0 %v15435_v43  ;;  %13326 = vmatprep.mubr.f32.mxu1 %v15426_v29 }
  0x7e   : > { %13348 = vmatpush3.msra.mxu1 %v15396_v30  ;;  %13362 = vmatpush3.msra.mxu0 %v15435_v43  ;;  %v1592_v43 = vsel %vm252_vm0, %v291_v36, 0  ;;  %v15610_v44 = vsub.f32 %v1578_v22, %v15576_v24  ;;  %v2228_v22 = vsel %vm252_vm0, %v272_v8, 0  ;;  %v15722_v36 = vand.u32 4294901760, %v281_v14 }
  0x7f   : > { %13327 = vmatmul.mubr.f32.gmra.mxu1 %v15437_v45  ;;  %13349 = vmatprep.subr.mxu1 %v15412_v38  ;;  %v15603_v41 = vand.u32 4294901760, %v1592_v43 }
  0x80   : > { %13363 = vmatprep.subr.mxu0 %v15452_v49  ;;  %13342 = vmatprep.mubr.f32.mxu0 %v15455_v51  ;;  %v1676_v51 = vand.u32 4294901760, %v15579_v32  ;;  %v15641_v55 = vand.u32 4294901760, %v15610_v44 }
  0x81   : > { %13350 = vmatpush3.msra.mxu1 %v15412_v38  ;;  %13364 = vmatpush3.msra.mxu0 %v15452_v49  ;;  %v15598_v49 = vand.u32 4294901760, %v1577_v27 }
  0x82   : > { %13343 = vmatmul.mubr.f32.gmra.mxu0 %v15465_v34  ;;  %13351 = vmatprep.subr.mxu1 %v15432_v35  ;;  %v1677_v54 = vsub.f32 %v15579_v32, %v1676_v51 }
  0x83   : > { %13365 = vmatprep.subr.mxu0 %v15474_v50  ;;  %13352 = vmatpush3.msra.mxu1 %v15432_v35 }
  0x84   : > { %13366 = vmatpush3.msra.mxu0 %v15474_v50  ;;  %13353 = vmatprep.subr.mxu1 %v15448_v47  ;;  %v15617_v50 = vsub.f32 %v1589_v40, %v15587_v3  ;;  %v1678_v62 = vand.u32 4294901760, %v1677_v54  ;;  %v280_v40 = vld [vmem:[#allocation6 + $0x8] sm:$0xff] }
  0x85   : > { %13367 = vmatprep.subr.mxu0 %v15490_v57  ;;  %13354 = vmatpush3.msra.mxu1 %v15448_v47 }
  0x86   : > { %13355 = vmatprep.mubr.f32.mxu1 %v1021_v46  ;;  %13368 = vmatpush3.msra.mxu0 %v15490_v57  ;;  %v15585_v46 = vand.u32 4294901760, %v15558_v31  ;;  %v1686_v57 = vand.u32 4294901760, %v15617_v50 }
  0x87   : > { %13356 = vmatmul.mubr.f32.vlgmr.msra.gmra.mxu1 %v1031_v48  ;;  %13369 = vmatprep.subr.mxu0 %v15501_v63  ;;  %v15594_v48 = vsub.f32 %v1579_v18, %v15563_v28 }
  0x88   : > { %13377 = vmatprep.subr.mxu1 %v15385_v23  ;;  %13370 = vmatpush3.msra.mxu0 %v15501_v63 }
  0x89   : > { %13371 = vmatprep.mubr.f32.mxu0 %v15391_v25  ;;  %13378 = vmatpush3.msra.mxu1 %v15385_v23  ;;  %v1666_v23 = vand.u32 4294901760, %v15566_v39  ;;  %v15625_v52 = vand.u32 4294901760, %v15594_v48 }
  0x8a   : > { %13372 = vmatmul.mubr.f32.vlgmr.msra.gmra.mxu0 %v15398_v33  ;;  %13379 = vmatprep.subr.mxu1 %v15396_v30 }
  0x8b   : > { %13393 = vmatprep.subr.mxu0 %v15539_v13  ;;  %13358 = vmatprep.mubr.f32.mxu1 %v1041_v53  ;;  %v1667_v34 = vsub.f32 %v15566_v39, %v1666_v23  ;;  %v15632_v53 = vsub.f32 %v1592_v43, %v15603_v41  ;;  %v15736_v43 = vand.u32 4294901760, %v2228_v22 }
  0x8c   : > { %13380 = vmatpush3.msra.mxu1 %v15396_v30  ;;  %13394 = vmatpush3.msra.mxu0 %v15539_v13  ;;  %v1730_v30 = vsub.f32 %v15558_v31, %v15585_v46 }
  0x8d   : > { %13359 = vmatmul.mubr.f32.gmra.mxu1 %v1051_v56  ;;  %13381 = vmatprep.subr.mxu1 %v15412_v38  ;;  %v1668_v58 = vand.u32 4294901760, %v1667_v34  ;;  %v1696_v9 = vand.u32 4294901760, %v15632_v53 }
  0x8e   : > { %13395 = vmatprep.subr.mxu0 %v15548_v17  ;;  %13374 = vmatprep.mubr.f32.mxu0 %v15426_v29  ;;  %v1731_v56 = vand.u32 4294901760, %v1730_v30 }
  0x8f   : > { %13382 = vmatpush3.msra.mxu1 %v15412_v38  ;;  %13396 = vmatpush3.msra.mxu0 %v15548_v17  ;;  %v1756_v38 = vsub.f32 %v1577_v27, %v15598_v49  ;;  %v2231_v27 = vsel %vm252_vm0, %v273_v20, 0 }
  0x90   : > { %13375 = vmatmul.mubr.f32.gmra.mxu0 %v15437_v45  ;;  %13383 = vmatprep.subr.mxu1 %v15432_v35 }
  0x91   : > { %13397 = vmatprep.subr.mxu0 %v15563_v28  ;;  %13384 = vmatpush3.msra.mxu1 %v15432_v35  ;;  %v1744_v35 = vsub.f32 %v15594_v48, %v15625_v52  ;;  %v15653_v61 = vand.u32 4294901760, %v1756_v38 }
  0x92   : > { %13398 = vmatpush3.msra.mxu0 %v15563_v28  ;;  %13385 = vmatprep.subr.mxu1 %v15448_v47 }
  0x93   : > { %13399 = vmatprep.subr.mxu0 %v15576_v24  ;;  %13386 = vmatpush3.msra.mxu1 %v15448_v47  ;;  %v1751_v47 = vsub.f32 %v15610_v44, %v15641_v55  ;;  %v1745_v63 = vand.u32 4294901760, %v1744_v35  ;;  %v1758_v10 = vsub.f32 %v1756_v38, %v15653_v61 }
  0x94   : > { %13387 = vmatprep.mubr.f32.mxu1 %v15391_v25  ;;  %13400 = vmatpush3.msra.mxu0 %v15576_v24  ;;  %v1687_v25 = vsub.f32 %v15617_v50, %v1686_v57 }
  0x95   : > { %13388 = vmatmul.mubr.f32.vlgmr.msra.gmra.mxu1 %v15398_v33  ;;  %13401 = vmatprep.subr.mxu0 %v15598_v49  ;;  %v1697_v33 = vsub.f32 %v15632_v53, %v1696_v9  ;;  %v1752_v15 = vand.u32 4294901760, %v1751_v47  ;;  %v1759_v2 = vand.u32 4294901760, %v1758_v10 }
  0x96   : > { %13409 = vmatprep.subr.mxu1 %v1731_v56  ;;  %13402 = vmatpush3.msra.mxu0 %v15598_v49  ;;  %v1688_v0 = vand.u32 4294901760, %v1687_v25 }
  0x97   : > { %13410 = vmatpush3.msra.mxu1 %v1731_v56  ;;  %13403 = vmatprep.mubr.f32.mxu0 %v1668_v58  ;;  %v1698_v1 = vand.u32 4294901760, %v1697_v33 }
  0x98   : > { %13411 = vmatprep.subr.mxu1 %v1738_v60  ;;  %13425 = vmatprep.subr.mxu0 %v15558_v31 }
  0x99   : > { %13390 = vmatprep.mubr.f32.mxu1 %v15426_v29  ;;  %13404 = vmatmul.mubr.f32.vlgmr.msra.gmra.mxu0 %v1678_v62  ;;  %v270_v29 = vld [vmem:[#allocation2] sm:$0xff] }
  0x9a   : > { %13412 = vmatpush3.msra.mxu1 %v1738_v60  ;;  %13426 = vmatpush3.msra.mxu0 %v15558_v31  ;;  %v2222_v6 = vsel %vm252_vm0, %v270_v29, 0  ;;  %v15717_v31 = vsub.f32 %v283_v19, %v15698_v37 }
  0x9b   : > { %13391 = vmatmul.mubr.f32.gmra.mxu1 %v15437_v45  ;;  %13413 = vmatprep.subr.mxu1 %v1745_v63  ;;  %v271_v45 = vld [vmem:[#allocation2 + $0x10] sm:$0xff]  ;;  %v15702_v11 = vand.u32 4294901760, %v2222_v6 }
  0x9c   : > { %13427 = vmatprep.subr.mxu0 %v15572_v42  ;;  %13414 = vmatpush3.msra.mxu1 %v1745_v63  ;;  %v2225_v26 = vsel %vm252_vm0, %v271_v45, 0 }
  0x9d   : > { %13428 = vmatpush3.msra.mxu0 %v15572_v42  ;;  %13415 = vmatprep.subr.mxu1 %v1752_v15  ;;  %v15708_v18 = vand.u32 4294901760, %v2225_v26  ;;  %v15725_v42 = vsub.f32 %v2222_v6, %v15702_v11 }
  0x9e   : > { %13429 = vmatprep.subr.mxu0 %v15594_v48  ;;  %13406 = vmatprep.mubr.f32.mxu0 %v1688_v0  ;;  %v2861_v0 = vld [vmem:[%s15247_s28 + $0x12] sm:$0xff] }
  0x9f   : > { %13416 = vmatpush3.msra.mxu1 %v1752_v15  ;;  %13430 = vmatpush3.msra.mxu0 %v15594_v48  ;;  %v15745_v48 = vand.u32 4294901760, %v15717_v31  ;;  %v2878_v45 = vsel %vm252_vm0, %v2861_v0, 0 }
  0xa0   : > { %13407 = vmatmul.mubr.f32.gmra.mxu0 %v1698_v1  ;;  %13417 = vmatprep.subr.mxu1 %v1759_v2  ;;  %v15865_v8 = vand.u32 4294901760, %v2878_v45 }
  0xa1   : > { %13431 = vmatprep.subr.mxu0 %v15610_v44  ;;  %13418 = vmatpush3.msra.mxu1 %v1759_v2  ;;  %v2872_v2 = vld [vmem:[#allocation3 + $0x68] sm:$0xff] }
  0xa2   : > { %13419 = vmatprep.mubr.f32.mxu1 %v15544_v16  ;;  %13432 = vmatpush3.msra.mxu0 %v15610_v44  ;;  %v15860_v6 = vand.u32 4294901760, %v2872_v2 }
  0xa3   : > { %13420 = vmatmul.mubr.f32.vlgmr.msra.gmra.mxu1 %v15552_v21  ;;  %13433 = vmatprep.subr.mxu0 %v1756_v38 }
  0xa4   : > { %13441 = vmatprep.subr.mxu1 %v15539_v13  ;;  %13434 = vmatpush3.msra.mxu0 %v1756_v38 }
  0xa5   : > { %13435 = vmatprep.mubr.f32.mxu0 %v15566_v39  ;;  %13442 = vmatpush3.msra.mxu1 %v15539_v13  ;;  %v15731_v39 = vsub.f32 %v2225_v26, %v15708_v18  ;;  %v2862_v26 = vld [vmem:[%s15247_s28 + $0x22] sm:$0xff] }
  0xa6   : > { %13436 = vmatmul.mubr.f32.vlgmr.msra.gmra.mxu0 %v15579_v32  ;;  %13443 = vmatprep.subr.mxu1 %v15548_v17  ;;  %v15734_v32 = vsub.f32 %v282_v7, %v15706_v12  ;;  %v2871_v7 = vld [vmem:[#allocation3 + $0x60] sm:$0xff] }
  0xa7   : > { %13457 = vmatprep.subr.mxu0 %v15585_v46  ;;  %13422 = vmatprep.mubr.f32.mxu1 %v15587_v3  ;;  %v2315_v30 = vand.u32 4294901760, %v15731_v39 }
  0xa8   : > { %13444 = vmatpush3.msra.mxu1 %v15548_v17  ;;  %13458 = vmatpush3.msra.mxu0 %v15585_v46  ;;  %v279_v46 = vld [vmem:[#allocation6] sm:$0xff]  ;;  %v15762_v34 = vand.u32 4294901760, %v15734_v32 }
  0xa9   : > { %13423 = vmatmul.mubr.f32.gmra.mxu1 %v15603_v41  ;;  %13445 = vmatprep.subr.mxu1 %v15563_v28  ;;  %v15758_v44 = vand.u32 4294901760, %v279_v46  ;;  %v2316_v54 = vsub.f32 %v15731_v39, %v2315_v30 }
  0xaa   : > { %13459 = vmatprep.subr.mxu0 %v15601_v4  ;;  %13438 = vmatprep.mubr.f32.mxu0 %v15617_v50 }
  0xab   : > { %13446 = vmatpush3.msra.mxu1 %v15563_v28  ;;  %13460 = vmatpush3.msra.mxu0 %v15601_v4  ;;  %v15747_v4 = vand.u32 4294901760, %v2231_v27  ;;  %v2395_v56 = vsub.f32 %v279_v46, %v15758_v44  ;;  %v2869_v46 = vld [vmem:[#allocation3 + $0x50] sm:$0xff] }
  0xac   : > { %13439 = vmatmul.mubr.f32.gmra.mxu0 %v15632_v53  ;;  %13447 = vmatprep.subr.mxu1 %v15576_v24 }
  0xad   : > { %13461 = vmatprep.subr.mxu0 %v15625_v52  ;;  %13448 = vmatpush3.msra.mxu1 %v15576_v24  ;;  %v15775_v50 = vsub.f32 %v2231_v27, %v15747_v4  ;;  %v15811_v47 = vand.u32 4294901760, %v2395_v56  ;;  %v15886_v27 = vsub.f32 %v2872_v2, %v15860_v6 }
  0xae   : > { %13462 = vmatpush3.msra.mxu0 %v15625_v52  ;;  %13449 = vmatprep.subr.mxu1 %v15598_v49  ;;  %v15765_v52 = vsub.f32 %v2228_v22, %v15736_v43  ;;  %v2863_v22 = vld [vmem:[%s15247_s28 + $0x32] sm:$0xff] }
  0xaf   : > { %13463 = vmatprep.subr.mxu0 %v15641_v55  ;;  %13450 = vmatpush3.msra.mxu1 %v15598_v49  ;;  %v2335_v58 = vand.u32 4294901760, %v15775_v50  ;;  %v2397_v33 = vsub.f32 %v2395_v56, %v15811_v47 }
  0xb0   : > { %13451 = vmatprep.mubr.f32.mxu1 %v1666_v23  ;;  %13464 = vmatpush3.msra.mxu0 %v15641_v55  ;;  %v15742_v23 = vand.u32 4294901760, %v280_v40  ;;  %v2325_v55 = vand.u32 4294901760, %v15765_v52 }
  0xb1   : > { %13452 = vmatmul.mubr.f32.vlgmr.msra.gmra.mxu1 %v1676_v51  ;;  %13465 = vmatprep.subr.mxu0 %v15653_v61  ;;  %v2305_v51 = vand.u32 4294901760, %v15725_v42  ;;  %v2398_v15 = vand.u32 4294901760, %v2397_v33 }
  0xb2   : > { %13473 = vmatprep.subr.mxu1 %v15539_v13  ;;  %13466 = vmatpush3.msra.mxu0 %v15653_v61  ;;  %v2388_v5 = vsub.f32 %v280_v40, %v15742_v23  ;;  %v2326_v62 = vsub.f32 %v15765_v52, %v2325_v55 }
  0xb3   : > { %13467 = vmatprep.mubr.f32.mxu0 %v15544_v16  ;;  %13474 = vmatpush3.msra.mxu1 %v15539_v13  ;;  %v15754_v13 = vsub.f32 %v281_v14, %v15722_v36  ;;  %v2306_v53 = vsub.f32 %v15725_v42, %v2305_v51  ;;  %v2870_v14 = vld [vmem:[#allocation3 + $0x58] sm:$0xff] }
  0xb4   : > { %13468 = vmatmul.mubr.f32.vlgmr.msra.gmra.mxu0 %v15552_v21  ;;  %13475 = vmatprep.subr.mxu1 %v15548_v17  ;;  %v15800_v35 = vand.u32 4294901760, %v2388_v5  ;;  %v2327_v63 = vand.u32 4294901760, %v2326_v62 }
  0xb5   : > { %13489 = vmatprep.subr.mxu0 %v15698_v37  ;;  %13454 = vmatprep.mubr.f32.mxu1 %v1686_v57  ;;  %v15784_v38 = vand.u32 4294901760, %v15754_v13  ;;  %v2307_v60 = vand.u32 4294901760, %v2306_v53 }
  0xb6   : > { %13476 = vmatpush3.msra.mxu1 %v15548_v17  ;;  %13490 = vmatpush3.msra.mxu0 %v15698_v37  ;;  %v2369_v17 = vsub.f32 %v15717_v31, %v15745_v48 }
  0xb7   : > { %13455 = vmatmul.mubr.f32.gmra.mxu1 %v1696_v9  ;;  %13477 = vmatprep.subr.mxu1 %v15563_v28  ;;  %v2383_v9 = vsub.f32 %v15754_v13, %v15784_v38 }
  0xb8   : > { %13491 = vmatprep.subr.mxu0 %v15706_v12  ;;  %13470 = vmatprep.mubr.f32.mxu0 %v15587_v3  ;;  %v2370_v57 = vand.u32 4294901760, %v2369_v17 }
  0xb9   : > { %13478 = vmatpush3.msra.mxu1 %v15563_v28  ;;  %13492 = vmatpush3.msra.mxu0 %v15706_v12  ;;  %v2376_v28 = vsub.f32 %v15734_v32, %v15762_v34  ;;  %v2384_v25 = vand.u32 4294901760, %v2383_v9 }
  0xba   : > { %13471 = vmatmul.mubr.f32.gmra.mxu0 %v15603_v41  ;;  %13479 = vmatprep.subr.mxu1 %v15576_v24 }
  0xbb   : > { %13493 = vmatprep.subr.mxu0 %v15722_v36  ;;  %13480 = vmatpush3.msra.mxu1 %v15576_v24  ;;  %v2317_v24 = vand.u32 4294901760, %v2316_v54  ;;  %v2377_v61 = vand.u32 4294901760, %v2376_v28 }
  0xbc   : > { %13494 = vmatpush3.msra.mxu0 %v15722_v36  ;;  %13481 = vmatprep.subr.mxu1 %v15598_v49 }
  0xbd   : > { %13495 = vmatprep.subr.mxu0 %v15742_v23  ;;  %13482 = vmatpush3.msra.mxu1 %v15598_v49  ;;  %v2390_v49 = vsub.f32 %v2388_v5, %v15800_v35 }
  0xbe   : > { %13483 = vmatprep.mubr.f32.mxu1 %v15544_v16  ;;  %13496 = vmatpush3.msra.mxu0 %v15742_v23  ;;  %v2336_v16 = vsub.f32 %v15775_v50, %v2335_v58 }
  0xbf   : > { %13484 = vmatmul.mubr.f32.vlgmr.msra.gmra.mxu1 %v15552_v21  ;;  %13497 = vmatprep.subr.mxu0 %v15758_v44  ;;  %v2391_v10 = vand.u32 4294901760, %v2390_v49 }
  0xc0   : > { %13505 = vmatprep.subr.mxu1 %v2370_v57  ;;  %13498 = vmatpush3.msra.mxu0 %v15758_v44  ;;  %v2337_v21 = vand.u32 4294901760, %v2336_v16 }
  0xc1   : > { %13499 = vmatprep.mubr.f32.mxu0 %v2307_v60  ;;  %13506 = vmatpush3.msra.mxu1 %v2370_v57 }
  0xc2   : > { %13500 = vmatmul.mubr.f32.vlgmr.msra.gmra.mxu0 %v2317_v24  ;;  %13507 = vmatprep.subr.mxu1 %v2377_v61 }
  0xc3   : > { %13521 = vmatprep.subr.mxu0 %v15717_v31  ;;  %13486 = vmatprep.mubr.f32.mxu1 %v15587_v3  ;;  %v2860_v3 = vld [vmem:[%s15247_s28 + $0x2] sm:$0xff] }
  0xc4   : > { %13508 = vmatpush3.msra.mxu1 %v2377_v61  ;;  %13522 = vmatpush3.msra.mxu0 %v15717_v31  ;;  %v2875_v1 = vsel %vm252_vm0, %v2860_v3, 0  ;;  %v15877_v31 = vand.u32 4294901760, %v2871_v7  ;;  %v3521_v3 = vld [vmem:[#allocation6 + $0x68] sm:$0xff] }
  0xc5   : > { %13487 = vmatmul.mubr.f32.gmra.mxu1 %v15603_v41  ;;  %13509 = vmatprep.subr.mxu1 %v2384_v25  ;;  %v2873_v41 = vld [vmem:[#allocation3 + $0x70] sm:$0xff]  ;;  %v15856_v19 = vand.u32 4294901760, %v2875_v1  ;;  %v16026_v2 = vand.u32 4294901760, %v3521_v3 }
  0xc6   : > { %13523 = vmatprep.subr.mxu0 %v15734_v32  ;;  %13502 = vmatprep.mubr.f32.mxu0 %v2327_v63  ;;  %v15851_v29 = vand.u32 4294901760, %v2873_v41  ;;  %v15913_v17 = vsub.f32 %v2871_v7, %v15877_v31  ;;  %v2866_v7 = vld [vmem:[#allocation2 + $0x22] sm:$0xff] }
  0xc7   : > { %13510 = vmatpush3.msra.mxu1 %v2384_v25  ;;  %13524 = vmatpush3.msra.mxu0 %v15734_v32  ;;  %v15880_v40 = vsub.f32 %v2875_v1, %v15856_v19  ;;  %v15889_v32 = vld [vmem:[%s15247_s28 + $0x40] sm:$0xff] }
  0xc8   : > { %13503 = vmatmul.mubr.f32.gmra.mxu0 %v2337_v21  ;;  %13511 = vmatprep.subr.mxu1 %v2391_v10  ;;  %v15871_v20 = vsub.f32 %v2873_v41, %v15851_v29  ;;  %v15945_v28 = vand.u32 4294901760, %v15913_v17 }
  0xc9   : > { %13525 = vmatprep.subr.mxu0 %v15754_v13  ;;  %13512 = vmatpush3.msra.mxu1 %v2391_v10  ;;  %v2865_v10 = vld [vmem:[#allocation2 + $0x12] sm:$0xff] }
  0xca   : > { %13526 = vmatpush3.msra.mxu0 %v15754_v13  ;;  %13513 = vmatprep.subr.mxu1 %v2398_v15  ;;  %v248_v13 = vmul.f32 %v15889_v32, %v15346_v59  ;;  %v15918_v59 = vand.u32 4294901760, %v2869_v46  ;;  %v3527_v0 = vsel %vm252_vm0, %v2865_v10, 0 }
  0xcb   : > { %13527 = vmatprep.subr.mxu0 %v2388_v5  ;;  %13514 = vmatpush3.msra.mxu1 %v2398_v15 }
  0xcc   : > { %13515 = vmatprep.mubr.f32.mxu1 %v15702_v11  ;;  %13528 = vmatpush3.msra.mxu0 %v2388_v5  ;;  %262 = vst.msk [vmem:[#allocation2 + $0x40] sm:$0xff] %vm252_vm0, %v248_v13  ;;  %v15921_v5 = vand.u32 4294901760, %v15886_v27  ;;  %v3518_v13 = vld [vmem:[#allocation6 + $0x50] sm:$0xff] }
  0xcd   : > { %13516 = vmatmul.mubr.f32.vlgmr.msra.gmra.mxu1 %v15708_v18  ;;  %13529 = vmatprep.subr.mxu0 %v2395_v56 }
  0xce   : > { %13537 = vmatprep.subr.mxu1 %v15698_v37  ;;  %13530 = vmatpush3.msra.mxu0 %v2395_v56 }
  0xcf   : > { %13531 = vmatprep.mubr.f32.mxu0 %v15725_v42  ;;  %13538 = vmatpush3.msra.mxu1 %v15698_v37  ;;  %v2881_v42 = vsel %vm252_vm0, %v2862_v26, 0  ;;  %v16030_v26 = vand.u32 4294901760, %v3527_v0 }
  0xd0   : > { %13532 = vmatmul.mubr.f32.vlgmr.msra.gmra.mxu0 %v15731_v39  ;;  %13539 = vmatprep.subr.mxu1 %v15706_v12  ;;  %v15893_v39 = vand.u32 4294901760, %v2870_v14 }
  0xd1   : > { %13553 = vmatprep.subr.mxu0 %v15745_v48  ;;  %13518 = vmatprep.mubr.f32.mxu1 %v15736_v43 }
  0xd2   : > { %13540 = vmatpush3.msra.mxu1 %v15706_v12  ;;  %13554 = vmatpush3.msra.mxu0 %v15745_v48  ;;  %v15896_v48 = vsub.f32 %v2878_v45, %v15865_v8  ;;  %v3520_v45 = vld [vmem:[#allocation6 + $0x60] sm:$0xff] }
  0xd3   : > { %13519 = vmatmul.mubr.f32.gmra.mxu1 %v15747_v4  ;;  %13541 = vmatprep.subr.mxu1 %v15722_v36 }
  0xd4   : > { %13555 = vmatprep.subr.mxu0 %v15762_v34  ;;  %13534 = vmatprep.mubr.f32.mxu0 %v15765_v52  ;;  %v2968_v52 = vand.u32 4294901760, %v15896_v48 }
  0xd5   : > { %13542 = vmatpush3.msra.mxu1 %v15722_v36  ;;  %13556 = vmatpush3.msra.mxu0 %v15762_v34  ;;  %v15906_v34 = vand.u32 4294901760, %v2881_v42 }
  0xd6   : > { %13535 = vmatmul.mubr.f32.gmra.mxu0 %v15775_v50  ;;  %13543 = vmatprep.subr.mxu1 %v15742_v23  ;;  %v2969_v57 = vsub.f32 %v15896_v48, %v2968_v52 }
  0xd7   : > { %13557 = vmatprep.subr.mxu0 %v15784_v38  ;;  %13544 = vmatpush3.msra.mxu1 %v15742_v23  ;;  %v15937_v54 = vsub.f32 %v2881_v42, %v15906_v34  ;;  %v16041_v42 = vand.u32 4294901760, %v3520_v45 }
  0xd8   : > { %13558 = vmatpush3.msra.mxu0 %v15784_v38  ;;  %13545 = vmatprep.subr.mxu1 %v15758_v44  ;;  %v15930_v38 = vsub.f32 %v2870_v14, %v15893_v39  ;;  %v3519_v14 = vld [vmem:[#allocation6 + $0x58] sm:$0xff] }
  0xd9   : > { %13559 = vmatprep.subr.mxu0 %v15800_v35  ;;  %13546 = vmatpush3.msra.mxu1 %v15758_v44  ;;  %v2978_v60 = vand.u32 4294901760, %v15937_v54 }
  0xda   : > { %13547 = vmatprep.mubr.f32.mxu1 %v2305_v51  ;;  %13560 = vmatpush3.msra.mxu0 %v15800_v35  ;;  %v2884_v51 = vsel %vm252_vm0, %v2863_v22, 0  ;;  %v2867_v22 = vld [vmem:[#allocation2 + $0x32] sm:$0xff] }
  0xdb   : > { %13548 = vmatmul.mubr.f32.vlgmr.msra.gmra.mxu1 %v2315_v30  ;;  %13561 = vmatprep.subr.mxu0 %v15811_v47  ;;  %v15904_v30 = vand.u32 4294901760, %v15871_v20  ;;  %v15923_v53 = vand.u32 4294901760, %v2884_v51 }
  0xdc   : > { %13569 = vmatprep.subr.mxu1 %v15698_v37  ;;  %13562 = vmatpush3.msra.mxu0 %v15811_v47  ;;  %v2970_v47 = vand.u32 4294901760, %v2969_v57 }
  0xdd   : > { %13563 = vmatprep.mubr.f32.mxu0 %v15702_v11  ;;  %13570 = vmatpush3.msra.mxu1 %v15698_v37  ;;  %v2958_v37 = vand.u32 4294901760, %v15880_v40  ;;  %v15952_v56 = vsub.f32 %v2884_v51, %v15923_v53 }
  0xde   : > { %13564 = vmatmul.mubr.f32.vlgmr.msra.gmra.mxu0 %v15708_v18  ;;  %13571 = vmatprep.subr.mxu1 %v15706_v12 }
  0xdf   : > { %13585 = vmatprep.subr.mxu0 %v15851_v29  ;;  %13550 = vmatprep.mubr.f32.mxu1 %v2325_v55  ;;  %v2959_v50 = vsub.f32 %v15880_v40, %v2958_v37  ;;  %v3029_v55 = vsub.f32 %v15886_v27, %v15921_v5  ;;  %v2988_v61 = vand.u32 4294901760, %v15952_v56 }
  0xe0   : > { %13572 = vmatpush3.msra.mxu1 %v15706_v12  ;;  %13586 = vmatpush3.msra.mxu0 %v15851_v29  ;;  %v3022_v12 = vsub.f32 %v15871_v20, %v15904_v30 }
  0xe1   : > { %13551 = vmatmul.mubr.f32.gmra.mxu1 %v2335_v58  ;;  %13573 = vmatprep.subr.mxu1 %v15722_v36  ;;  %v15961_v58 = vand.u32 4294901760, %v15930_v38  ;;  %v2960_v9 = vand.u32 4294901760, %v2959_v50  ;;  %v3030_v24 = vand.u32 4294901760, %v3029_v55 }
  0xe2   : > { %13587 = vmatprep.subr.mxu0 %v15860_v6  ;;  %13566 = vmatprep.mubr.f32.mxu0 %v15736_v43  ;;  %v3023_v35 = vand.u32 4294901760, %v3022_v12  ;;  %v16078_v12 = vand.u32 4294901760, %v3518_v13 }
  0xe3   : > { %13574 = vmatpush3.msra.mxu1 %v15722_v36  ;;  %13588 = vmatpush3.msra.mxu0 %v15860_v6  ;;  %v3048_v36 = vsub.f32 %v2869_v46, %v15918_v59  ;;  %v16050_v46 = vsub.f32 %v3521_v3, %v16026_v2 }
  0xe4   : > { %13567 = vmatmul.mubr.f32.gmra.mxu0 %v15747_v4  ;;  %13575 = vmatprep.subr.mxu1 %v15742_v23 }
  0xe5   : > { %13589 = vmatprep.subr.mxu0 %v15877_v31  ;;  %13576 = vmatpush3.msra.mxu1 %v15742_v23  ;;  %v3036_v23 = vsub.f32 %v15913_v17, %v15945_v28  ;;  %v15973_v62 = vand.u32 4294901760, %v3048_v36  ;;  %v16081_v50 = vand.u32 4294901760, %v16050_v46 }
  0xe6   : > { %13590 = vmatpush3.msra.mxu0 %v15877_v31  ;;  %13577 = vmatprep.subr.mxu1 %v15758_v44 }
  0xe7   : > { %13591 = vmatprep.subr.mxu0 %v15893_v39  ;;  %13578 = vmatpush3.msra.mxu1 %v15758_v44  ;;  %v3043_v44 = vsub.f32 %v15930_v38, %v15961_v58  ;;  %v3037_v16 = vand.u32 4294901760, %v3036_v23  ;;  %v3050_v49 = vsub.f32 %v3048_v36, %v15973_v62 }
  0xe8   : > { %13579 = vmatprep.mubr.f32.mxu1 %v15702_v11  ;;  %13592 = vmatpush3.msra.mxu0 %v15893_v39  ;;  %v2979_v11 = vsub.f32 %v15937_v54, %v2978_v60 }
  0xe9   : > { %13580 = vmatmul.mubr.f32.vlgmr.msra.gmra.mxu1 %v15708_v18  ;;  %13593 = vmatprep.subr.mxu0 %v15918_v59  ;;  %v2989_v18 = vsub.f32 %v15952_v56, %v2988_v61  ;;  %v3044_v25 = vand.u32 4294901760, %v3043_v44  ;;  %v3051_v21 = vand.u32 4294901760, %v3050_v49 }
  0xea   : > { %13601 = vmatprep.subr.mxu1 %v3023_v35  ;;  %13594 = vmatpush3.msra.mxu0 %v15918_v59  ;;  %v2980_v63 = vand.u32 4294901760, %v2979_v11 }
  0xeb   : > { %13602 = vmatpush3.msra.mxu1 %v3023_v35  ;;  %13595 = vmatprep.mubr.f32.mxu0 %v2960_v9  ;;  %v2990_v33 = vand.u32 4294901760, %v2989_v18  ;;  %v3678_v35 = vsub.f32 %v16050_v46, %v16081_v50 }
  0xec   : > { %13603 = vmatprep.subr.mxu1 %v3030_v24  ;;  %13617 = vmatprep.subr.mxu0 %v15871_v20 }
  0xed   : > { %13582 = vmatprep.mubr.f32.mxu1 %v15736_v43  ;;  %13596 = vmatmul.mubr.f32.vlgmr.msra.gmra.mxu0 %v2970_v47  ;;  %v2864_v43 = vld [vmem:[#allocation2 + $0x2] sm:$0xff]  ;;  %v3679_v18 = vand.u32 4294901760, %v3678_v35  ;;  %v4181_v35 = vld [vmem:[#allocation3 + $0x98] sm:$0xff] }
  0xee   : > { %13604 = vmatpush3.msra.mxu1 %v3030_v24  ;;  %13618 = vmatpush3.msra.mxu0 %v15871_v20  ;;  %v3524_v15 = vsel %vm252_vm0, %v2864_v43, 0 }
  0xef   : > { %13583 = vmatmul.mubr.f32.gmra.mxu1 %v15747_v4  ;;  %13605 = vmatprep.subr.mxu1 %v3037_v16  ;;  %v3522_v4 = vld [vmem:[#allocation6 + $0x70] sm:$0xff]  ;;  %v16022_v1 = vand.u32 4294901760, %v3524_v15 }
  0xf0   : > { %13619 = vmatprep.subr.mxu0 %v15886_v27  ;;  %13606 = vmatpush3.msra.mxu1 %v3037_v16  ;;  %v16017_v41 = vand.u32 4294901760, %v3522_v4 }
  0xf1   : > { %13620 = vmatpush3.msra.mxu0 %v15886_v27  ;;  %13607 = vmatprep.subr.mxu1 %v3044_v25  ;;  %v16044_v27 = vsub.f32 %v3524_v15, %v16022_v1 }
  0xf2   : > { %13621 = vmatprep.subr.mxu0 %v15913_v17  ;;  %13598 = vmatprep.mubr.f32.mxu0 %v2980_v63  ;;  %v16036_v20 = vsub.f32 %v3522_v4, %v16017_v41 }
  0xf3   : > { %13608 = vmatpush3.msra.mxu1 %v3044_v25  ;;  %13622 = vmatpush3.msra.mxu0 %v15913_v17 }
  0xf4   : > { %13599 = vmatmul.mubr.f32.gmra.mxu0 %v2990_v33  ;;  %13609 = vmatprep.subr.mxu1 %v3051_v21  ;;  %v16063_v17 = vand.u32 4294901760, %v16036_v20 }
  0xf5   : > { %13623 = vmatprep.subr.mxu0 %v15930_v38  ;;  %13610 = vmatpush3.msra.mxu1 %v3051_v21 }
  0xf6   : > { %13611 = vmatprep.mubr.f32.mxu1 %v15856_v19  ;;  %13624 = vmatpush3.msra.mxu0 %v15930_v38 }
  0xf7   : > { %13612 = vmatmul.mubr.f32.vlgmr.msra.gmra.mxu1 %v15865_v8  ;;  %13625 = vmatprep.subr.mxu0 %v3048_v36 }
  0xf8   : > { %13633 = vmatprep.subr.mxu1 %v15851_v29  ;;  %13626 = vmatpush3.msra.mxu0 %v3048_v36 }
  0xf9   : > { %13627 = vmatprep.mubr.f32.mxu0 %v15880_v40  ;;  %13634 = vmatpush3.msra.mxu1 %v15851_v29  ;;  %v3530_v40 = vsel %vm252_vm0, %v2866_v7, 0 }
  0xfa   : > { %13628 = vmatmul.mubr.f32.vlgmr.msra.gmra.mxu0 %v15896_v48  ;;  %13635 = vmatprep.subr.mxu1 %v15860_v6  ;;  %v16054_v48 = vand.u32 4294901760, %v3519_v14 }
  0xfb   : > { %13649 = vmatprep.subr.mxu0 %v15904_v30  ;;  %13614 = vmatprep.mubr.f32.mxu1 %v15906_v34 }
  0xfc   : > { %13636 = vmatpush3.msra.mxu1 %v15860_v6  ;;  %13650 = vmatpush3.msra.mxu0 %v15904_v30  ;;  %v16057_v30 = vsub.f32 %v3527_v0, %v16030_v26  ;;  %v16090_v55 = vsub.f32 %v3519_v14, %v16054_v48 }
  0xfd   : > { %13615 = vmatmul.mubr.f32.gmra.mxu1 %v15923_v53  ;;  %13637 = vmatprep.subr.mxu1 %v15877_v31 }
  0xfe   : > { %13651 = vmatprep.subr.mxu0 %v15921_v5  ;;  %13630 = vmatprep.mubr.f32.mxu0 %v15937_v54  ;;  %v3617_v54 = vand.u32 4294901760, %v16057_v30  ;;  %v16123_v23 = vand.u32 4294901760, %v16090_v55 }
  0xff   : > { %13638 = vmatpush3.msra.mxu1 %v15877_v31  ;;  %13652 = vmatpush3.msra.mxu0 %v15921_v5  ;;  %v16065_v5 = vand.u32 4294901760, %v3530_v40 }
 0x100   : > { %13631 = vmatmul.mubr.f32.gmra.mxu0 %v15952_v56  ;;  %13639 = vmatprep.subr.mxu1 %v15893_v39  ;;  %v3618_v9 = vsub.f32 %v16057_v30, %v3617_v54  ;;  %v3692_v33 = vsub.f32 %v16090_v55, %v16123_v23 }
 0x101   : > { %13653 = vmatprep.subr.mxu0 %v15945_v28  ;;  %13640 = vmatpush3.msra.mxu1 %v15893_v39  ;;  %v16097_v36 = vsub.f32 %v3530_v40, %v16065_v5 }
 0x102   : > { %13654 = vmatpush3.msra.mxu0 %v15945_v28  ;;  %13641 = vmatprep.subr.mxu1 %v15918_v59  ;;  %v3693_v0 = vand.u32 4294901760, %v3692_v33 }
 0x103   : > { %13655 = vmatprep.subr.mxu0 %v15961_v58  ;;  %13642 = vmatpush3.msra.mxu1 %v15918_v59  ;;  %v3627_v47 = vand.u32 4294901760, %v16097_v36 }
 0x104   : > { %13643 = vmatprep.mubr.f32.mxu1 %v2958_v37  ;;  %13656 = vmatpush3.msra.mxu0 %v15961_v58  ;;  %v3533_v37 = vsel %vm252_vm0, %v2867_v22, 0 }
 0x105   : > { %13644 = vmatmul.mubr.f32.vlgmr.msra.gmra.mxu1 %v2968_v52  ;;  %13657 = vmatprep.subr.mxu0 %v15973_v62  ;;  %v16072_v52 = vsub.f32 %v3520_v45, %v16041_v42  ;;  %v16083_v28 = vand.u32 4294901760, %v3533_v37 }
 0x106   : > { %13665 = vmatprep.subr.mxu1 %v15851_v29  ;;  %13658 = vmatpush3.msra.mxu0 %v15973_v62 }
 0x107   : > { %13659 = vmatprep.mubr.f32.mxu0 %v15856_v19  ;;  %13666 = vmatpush3.msra.mxu1 %v15851_v29  ;;  %v3607_v29 = vand.u32 4294901760, %v16044_v27  ;;  %v16105_v57 = vand.u32 4294901760, %v16072_v52 }
 0x108   : > { %13660 = vmatmul.mubr.f32.vlgmr.msra.gmra.mxu0 %v15865_v8  ;;  %13667 = vmatprep.subr.mxu1 %v15860_v6 }
 0x109   : > { %v13213_v51 = vpop.f32.mrf.mxu0  ;;  %13681 = vmatprep.subr.mxu0 %v16017_v41  ;;  %13646 = vmatprep.mubr.f32.mxu1 %v2978_v60  ;;  %v3608_v56 = vsub.f32 %v16044_v27, %v3607_v29  ;;  %v16112_v60 = vsub.f32 %v3533_v37, %v16083_v28  ;;  %v3685_v11 = vsub.f32 %v16072_v52, %v16105_v57 }
 0x10a   : > { %13668 = vmatpush3.msra.mxu1 %v15860_v6  ;;  %13682 = vmatpush3.msra.mxu0 %v16017_v41  ;;  %v3671_v6 = vsub.f32 %v16036_v20, %v16063_v17 }
 0x10b   : > { %v16074_v38 = vpop.f32.mrf.mxu0  ;;  %13647 = vmatmul.mubr.f32.gmra.mxu1 %v2988_v61  ;;  %13669 = vmatprep.subr.mxu1 %v15877_v31  ;;  %v3637_v49 = vand.u32 4294901760, %v16112_v60  ;;  %v3686_v4 = vand.u32 4294901760, %v3685_v11 }
 0x10c   : > { %13683 = vmatprep.subr.mxu0 %v16026_v2  ;;  %13662 = vmatprep.mubr.f32.mxu0 %v15906_v34  ;;  %v13229_v61 = vpop.f32.mrf.mxu1  ;;  %v3672_v62 = vand.u32 4294901760, %v3671_v6 }
 0x10d   : > { %13670 = vmatpush3.msra.mxu1 %v15877_v31  ;;  %13684 = vmatpush3.msra.mxu0 %v16026_v2  ;;  %v13216_v58 = vpop.f32.mrf.mxu0  ;;  %v16115_v31 = vsub.f32 %v3518_v13, %v16078_v12  ;;  %v519_v44 = vadd.f32 %v13229_v61, %v13213_v51  ;;  %v3638_v10 = vsub.f32 %v16112_v60, %v3637_v49 }
 0x10e   : > { %13663 = vmatmul.mubr.f32.gmra.mxu0 %v15923_v53  ;;  %13671 = vmatprep.subr.mxu1 %v15893_v39  ;;  %v16134_v16 = vpop.f32.mrf.mxu1 }
 0x10f   : > { %13685 = vmatprep.subr.mxu0 %v16041_v42  ;;  %13672 = vmatpush3.msra.mxu1 %v15893_v39  ;;  %v16125_v24 = vpop.f32.mrf.mxu0  ;;  %v3609_v39 = vand.u32 4294901760, %v3608_v56  ;;  %v16140_v25 = vand.u32 4294901760, %v16115_v31  ;;  %v3639_v22 = vand.u32 4294901760, %v3638_v10  ;;  %v12199_v56 = vld [vmem:[%s15247_s28 + $0x10] sm:$0xff] }
 0x110   : > { %13686 = vmatpush3.msra.mxu0 %v16041_v42  ;;  %13673 = vmatprep.subr.mxu1 %v15918_v59  ;;  %v4183_v61 = vsel %vm252_vm0, %v12199_v56, 0 }
 0x111   : > { %13687 = vmatprep.subr.mxu0 %v16054_v48  ;;  %13674 = vmatpush3.msra.mxu1 %v15918_v59  ;;  %v3619_v59 = vand.u32 4294901760, %v3618_v9  ;;  %v3699_v15 = vsub.f32 %v16115_v31, %v16140_v25  ;;  %v16206_v11 = vand.u32 4294901760, %v4183_v61 }
 0x112   : > { %13675 = vmatprep.mubr.f32.mxu1 %v15856_v19  ;;  %13688 = vmatpush3.msra.mxu0 %v16054_v48  ;;  %v3628_v19 = vsub.f32 %v16097_v36, %v3627_v47 }
 0x113   : > { %v13245_v63 = vpop.f32.mrf.mxu0  ;;  %13676 = vmatmul.mubr.f32.vlgmr.msra.gmra.mxu1 %v15865_v8  ;;  %13689 = vmatprep.subr.mxu0 %v16078_v12  ;;  %v3700_v40 = vand.u32 4294901760, %v3699_v15 }
 0x114   : > { %v620_v21 = vadd.f32 %v13245_v63, %v519_v44  ;;  %13697 = vmatprep.subr.mxu1 %v3672_v62  ;;  %13690 = vmatpush3.msra.mxu0 %v16078_v12  ;;  %v3629_v45 = vand.u32 4294901760, %v3628_v19  ;;  %v16201_v44 = vand.u32 4294901760, %v4181_v35  ;;  %v4179_v63 = vld [vmem:[#allocation3 + $0x88] sm:$0xff] }
 0x115   : > { %v16150_v43 = vpop.f32.mrf.mxu0  ;;  %13698 = vmatpush3.msra.mxu1 %v3672_v62  ;;  %13691 = vmatprep.mubr.f32.mxu0 %v3609_v39  ;;  %v13232_v8 = vpop.f32.mrf.mxu1  ;;  %v16230_v15 = vand.u32 4294901760, %v4179_v63 }
 0x116   : > { %13699 = vmatprep.subr.mxu1 %v3679_v18  ;;  %13713 = vmatprep.subr.mxu0 %v16036_v20  ;;  %v531_v3 = vadd.f32 %v13232_v8, %v13216_v58  ;;  %v16225_v8 = vsub.f32 %v4181_v35, %v16201_v44 }
 0x117   : > { %13678 = vmatprep.mubr.f32.mxu1 %v15906_v34  ;;  %13692 = vmatmul.mubr.f32.vlgmr.msra.gmra.mxu0 %v3619_v59  ;;  %v16163_v34 = vpop.f32.mrf.mxu1  ;;  %v12201_v59 = vld [vmem:[%s15247_s28 + $0x30] sm:$0xff] }
 0x118   : > { %13700 = vmatpush3.msra.mxu1 %v3679_v18  ;;  %13714 = vmatpush3.msra.mxu0 %v16036_v20  ;;  %v13248_v7 = vpop.f32.mrf.mxu0 }
 0x119   : > { %13679 = vmatmul.mubr.f32.gmra.mxu1 %v15923_v53  ;;  %13701 = vmatprep.subr.mxu1 %v3686_v4  ;;  %v634_v14 = vadd.f32 %v13248_v7, %v531_v3  ;;  %v16233_v3 = vsub.f32 %v4183_v61, %v16206_v11 }
 0x11a   : > { %13715 = vmatprep.subr.mxu0 %v16050_v46  ;;  %13702 = vmatpush3.msra.mxu1 %v3686_v4  ;;  %v16167_v53 = vpop.f32.mrf.mxu0 }
 0x11b   : > { %13716 = vmatpush3.msra.mxu0 %v16050_v46  ;;  %13703 = vmatprep.subr.mxu1 %v3693_v0 }
 0x11c   : > { %13717 = vmatprep.subr.mxu0 %v16072_v52  ;;  %13694 = vmatprep.mubr.f32.mxu0 %v3629_v45  ;;  %v4177_v45 = vld [vmem:[#allocation3 + $0x78] sm:$0xff] }
 0x11d   : > { %13704 = vmatpush3.msra.mxu1 %v3693_v0  ;;  %13718 = vmatpush3.msra.mxu0 %v16072_v52  ;;  %v13261_v20 = vpop.f32.mrf.mxu1 }
 0x11e   : > { %13695 = vmatmul.mubr.f32.gmra.mxu0 %v3639_v22  ;;  %13705 = vmatprep.subr.mxu1 %v3700_v40  ;;  %v720_v51 = vadd.f32 %v13261_v20, %v620_v21  ;;  %v14995_v22 = vld [vmem:[%s18824_s1 + $0x8] sm:$0x3] }
 0x11f   : > { %13719 = vmatprep.subr.mxu0 %v16090_v55  ;;  %13706 = vmatpush3.msra.mxu1 %v3700_v40  ;;  %v16170_v13 = vpop.f32.mrf.mxu1 }
 0x120   : > { %13707 = vmatprep.mubr.f32.mxu1 %v16022_v1  ;;  %13720 = vmatpush3.msra.mxu0 %v16090_v55  ;;  %v13277_v46 = vpop.f32.mrf.mxu0 }
 0x121   : > { %13708 = vmatmul.mubr.f32.vlgmr.msra.gmra.mxu1 %v16030_v26  ;;  %13721 = vmatprep.subr.mxu0 %v16115_v31  ;;  %v828_v37 = vadd.f32 %v13277_v46, %v720_v51  ;;  %v16268_v46 = vsub.f32 %v4179_v63, %v16230_v15 }
 0x122   : > { %13729 = vmatprep.subr.mxu1 %v16017_v41  ;;  %13722 = vmatpush3.msra.mxu0 %v16115_v31  ;;  %v16178_v52 = vpop.f32.mrf.mxu0  ;;  %v12200_v31 = vld [vmem:[%s15247_s28 + $0x20] sm:$0xff] }
 0x123   : > { %13723 = vmatprep.mubr.f32.mxu0 %v16044_v27  ;;  %13730 = vmatpush3.msra.mxu1 %v16017_v41  ;;  %v13264_v6 = vpop.f32.mrf.mxu1  ;;  %v4186_v39 = vsel %vm252_vm0, %v12200_v31, 0  ;;  %v4189_v27 = vsel %vm252_vm0, %v12201_v59, 0 }
 0x124   : > { %13724 = vmatmul.mubr.f32.vlgmr.msra.gmra.mxu0 %v16057_v30  ;;  %13731 = vmatprep.subr.mxu1 %v16026_v2  ;;  %v736_v55 = vadd.f32 %v13264_v6, %v634_v14  ;;  %v16217_v19 = vand.u32 4294901760, %v4186_v39  ;;  %v235_v30 = vld [vmem:[%s15247_s28 + $0x48] sm:$0x3]  ;;  %v4192_v14 = vsel %vm252_vm0, %v15889_v32, 0  ;;  %v16261_v20 = vand.u32 4294901760, %v4189_v27 }
 0x125   : > { %13745 = vmatprep.subr.mxu0 %v16063_v17  ;;  %13710 = vmatprep.mubr.f32.mxu1 %v16065_v5  ;;  %v16197_v62 = vpop.f32.mrf.mxu1  ;;  %v249_v40 = vmul.f32 %v14995_v22, %v235_v30  ;;  %v4266_v32 = vand.u32 4294901760, %v16233_v3 }
 0x126   : > { %13732 = vmatpush3.msra.mxu1 %v16026_v2  ;;  %13746 = vmatpush3.msra.mxu0 %v16063_v17  ;;  %v13280_v58 = vpop.f32.mrf.mxu0  ;;  %v4180_v17 = vld [vmem:[#allocation3 + $0x90] sm:$0xff]  ;;  %v16249_v7 = vsub.f32 %v4186_v39, %v16217_v19  ;;  %v16292_v35 = vsub.f32 %v4189_v27, %v16261_v20 }
 0x127   : > { %13711 = vmatmul.mubr.f32.gmra.mxu1 %v16083_v28  ;;  %13733 = vmatprep.subr.mxu1 %v16041_v42  ;;  %v840_v9 = vadd.f32 %v13280_v58, %v736_v55  ;;  %263 = vst.msk [vmem:[#allocation2 + $0x48] sm:$0x3] %vm254_vm1, %v249_v40  ;;  %v16278_v55 = vand.u32 4294901760, %v4192_v14 }
 0x128   : > { %13747 = vmatprep.subr.mxu0 %v16081_v50  ;;  %13726 = vmatprep.mubr.f32.mxu0 %v16097_v36  ;;  %v16213_v33 = vpop.f32.mrf.mxu0  ;;  %v4286_v59 = vand.u32 4294901760, %v16292_v35 }
 0x129   : > { %13734 = vmatpush3.msra.mxu1 %v16041_v42  ;;  %13748 = vmatpush3.msra.mxu0 %v16081_v50  ;;  %v16210_v50 = vand.u32 4294901760, %v4180_v17 }
 0x12a   : > { %13727 = vmatmul.mubr.f32.gmra.mxu0 %v16112_v60  ;;  %13735 = vmatprep.subr.mxu1 %v16054_v48  ;;  %v4267_v60 = vsub.f32 %v16233_v3, %v4266_v32 }
 0x12b   : > { %13749 = vmatprep.subr.mxu0 %v16105_v57  ;;  %13736 = vmatpush3.msra.mxu1 %v16054_v48  ;;  %v13293_v18 = vpop.f32.mrf.mxu1 }
 0x12c   : > { %13750 = vmatpush3.msra.mxu0 %v16105_v57  ;;  %13737 = vmatprep.subr.mxu1 %v16078_v12  ;;  %v922_v21 = vadd.f32 %v13293_v18, %v828_v37  ;;  %v4178_v57 = vld [vmem:[#allocation3 + $0x80] sm:$0xff]  ;;  %v16273_v37 = vand.u32 4294901760, %v4177_v45 }
 0x12d   : > { %13751 = vmatprep.subr.mxu0 %v16123_v23  ;;  %13738 = vmatpush3.msra.mxu1 %v16078_v12  ;;  %v16219_v4 = vpop.f32.mrf.mxu1 }
 0x12e   : > { %13739 = vmatprep.mubr.f32.mxu1 %v3607_v29  ;;  %13752 = vmatpush3.msra.mxu0 %v16123_v23  ;;  %v13309_v10 = vpop.f32.mrf.mxu0  ;;  %v16239_v23 = vsub.f32 %v4180_v17, %v16210_v50  ;;  %v16312_v61 = vsub.f32 %v4177_v45, %v16273_v37 }
 0x12f   : > { %13740 = vmatmul.mubr.f32.vlgmr.msra.gmra.mxu1 %v3617_v54  ;;  %13753 = vmatprep.subr.mxu0 %v16140_v25  ;;  %v1036_v29 = vadd.f32 %v13309_v10, %v922_v21  ;;  %v16246_v54 = vand.u32 4294901760, %v4178_v57 }
 0x130   : > { %13761 = vmatprep.subr.mxu1 %v16017_v41  ;;  %13754 = vmatpush3.msra.mxu0 %v16140_v25  ;;  %v16241_v0 = vpop.f32.mrf.mxu0  ;;  %v16276_v6 = vand.u32 4294901760, %v16239_v23 }
 0x131   : > { %13755 = vmatprep.mubr.f32.mxu0 %v16022_v1  ;;  %13762 = vmatpush3.msra.mxu1 %v16017_v41  ;;  %v13296_v25 = vpop.f32.mrf.mxu1  ;;  %v16259_v41 = vand.u32 4294901760, %v16225_v8  ;;  %v16285_v56 = vsub.f32 %v4178_v57, %v16246_v54 }
 0x132   : > { %13756 = vmatmul.mubr.f32.vlgmr.msra.gmra.mxu0 %v16030_v26  ;;  %13763 = vmatprep.subr.mxu1 %v16026_v2  ;;  %v934_v51 = vadd.f32 %v13296_v25, %v840_v9  ;;  %v4337_v9 = vsub.f32 %v16239_v23, %v16276_v6 }
 0x133   : > { %13777 = vmatprep.subr.mxu0 %v16201_v44  ;;  %13742 = vmatprep.mubr.f32.mxu1 %v3627_v47  ;;  %v4276_v47 = vand.u32 4294901760, %v16249_v7  ;;  %v4330_v58 = vsub.f32 %v16225_v8, %v16259_v41  ;;  %v16302_v31 = vpop.f32.mrf.mxu1  ;;  %v16320_v39 = vand.u32 4294901760, %v16285_v56 }
 0x134   : > { %13764 = vmatpush3.msra.mxu1 %v16026_v2  ;;  %13778 = vmatpush3.msra.mxu0 %v16201_v44  ;;  %v13312_v36 = vpop.f32.mrf.mxu0  ;;  %v4338_v30 = vand.u32 4294901760, %v4337_v9 }
 0x135   : > { %13743 = vmatmul.mubr.f32.gmra.mxu1 %v3637_v49  ;;  %13765 = vmatprep.subr.mxu1 %v16041_v42  ;;  %v1056_v2 = vadd.f32 %v13312_v36, %v934_v51  ;;  %v16300_v49 = vand.u32 4294901760, %v16268_v46  ;;  %v4277_v17 = vsub.f32 %v16249_v7, %v4276_v47  ;;  %v4331_v63 = vand.u32 4294901760, %v4330_v58 }
 0x136   : > { %13779 = vmatprep.subr.mxu0 %v16210_v50  ;;  %13758 = vmatprep.mubr.f32.mxu0 %v16065_v5  ;;  %v16325_v21 = vpop.f32.mrf.mxu0  ;;  %v4351_v25 = vsub.f32 %v16285_v56, %v16320_v39 }
 0x137   : > { %13766 = vmatpush3.msra.mxu1 %v16041_v42  ;;  %13780 = vmatpush3.msra.mxu0 %v16210_v50  ;;  %v16309_v42 = vsub.f32 %v4192_v14, %v16278_v55  ;;  %18847 = vst [vmem:[#allocation12_spill] sm:$0xff] %v16325_v21  ;;  %v4344_v10 = vsub.f32 %v16268_v46, %v16300_v49  ;;  %v16337_v14 = vand.u32 4294901760, %v16312_v61 }
 0x138   : > { %13759 = vmatmul.mubr.f32.gmra.mxu0 %v16083_v28  ;;  %13767 = vmatprep.subr.mxu1 %v16054_v48  ;;  %v4352_v9 = vand.u32 4294901760, %v4351_v25  ;;  %v4830_v25 = vld [vmem:[#allocation6 + $0x98] sm:$0xff] }
 0x139   : > { %13781 = vmatprep.subr.mxu0 %v16230_v15  ;;  %13768 = vmatpush3.msra.mxu1 %v16054_v48  ;;  %v13325_v18 = vpop.f32.mrf.mxu1  ;;  %v4268_v48 = vand.u32 4294901760, %v4267_v60  ;;  %v4296_v45 = vand.u32 4294901760, %v16309_v42  ;;  %v4345_v51 = vand.u32 4294901760, %v4344_v10  ;;  %v4358_v58 = vsub.f32 %v16312_v61, %v16337_v14 }
 0x13a   : > { %13782 = vmatpush3.msra.mxu0 %v16230_v15  ;;  %13769 = vmatprep.subr.mxu1 %v16078_v12  ;;  %v1158_v57 = vadd.f32 %v13325_v18, %v1036_v29 }
 0x13b   : > { %13783 = vmatprep.subr.mxu0 %v16246_v54  ;;  %13770 = vmatpush3.msra.mxu1 %v16078_v12  ;;  %v16331_v27 = vpop.f32.mrf.mxu1  ;;  %v4278_v12 = vand.u32 4294901760, %v4277_v17  ;;  %v4297_v36 = vsub.f32 %v16309_v42, %v4296_v45 }
 0x13c   : > { %18848 = vst [vmem:[#allocation13_spill] sm:$0xff] %v16331_v27  ;;  %13771 = vmatprep.mubr.f32.mxu1 %v16022_v1  ;;  %13784 = vmatpush3.msra.mxu0 %v16246_v54  ;;  %v13341_v29 = vpop.f32.mrf.mxu0  ;;  %v4287_v1 = vsub.f32 %v16292_v35, %v4286_v59 }
 0x13d   : > { %13772 = vmatmul.mubr.f32.vlgmr.msra.gmra.mxu1 %v16030_v26  ;;  %13785 = vmatprep.subr.mxu0 %v16273_v37  ;;  %v1259_v22 = vadd.f32 %v13341_v29, %v1158_v57  ;;  %v4298_v57 = vand.u32 4294901760, %v4297_v36  ;;  %v16396_v36 = vand.u32 4294901760, %v4830_v25 }
 0x13e   : > { %13793 = vmatprep.subr.mxu1 %v4331_v63  ;;  %13786 = vmatpush3.msra.mxu0 %v16273_v37  ;;  %v16347_v40 = vpop.f32.mrf.mxu0  ;;  %v4288_v17 = vand.u32 4294901760, %v4287_v1 }
 0x13f   : > { %18849 = vst [vmem:[#allocation14_spill] sm:$0xff] %v16347_v40  ;;  %13794 = vmatpush3.msra.mxu1 %v4331_v63  ;;  %13787 = vmatprep.mubr.f32.mxu0 %v4268_v48  ;;  %v13328_v26 = vpop.f32.mrf.mxu1  ;;  %v4359_v48 = vand.u32 4294901760, %v4358_v58 }
 0x140   : > { %13795 = vmatprep.subr.mxu1 %v4338_v30  ;;  %13809 = vmatprep.subr.mxu0 %v16225_v8  ;;  %v1170_v60 = vadd.f32 %v13328_v26, %v1056_v2  ;;  %v4829_v26 = vld [vmem:[#allocation6 + $0x90] sm:$0xff] }
 0x141   : > { %13774 = vmatprep.mubr.f32.mxu1 %v16065_v5  ;;  %13788 = vmatmul.mubr.f32.vlgmr.msra.gmra.mxu0 %v4278_v12  ;;  %v16360_v5 = vpop.f32.mrf.mxu1  ;;  %v4172_v12 = vld [vmem:[#allocation2 + $0x10] sm:$0xff] }
 0x142   : > { %13796 = vmatpush3.msra.mxu1 %v4338_v30  ;;  %13810 = vmatpush3.msra.mxu0 %v16225_v8  ;;  %v13344_v18 = vpop.f32.mrf.mxu0  ;;  %18850 = vst [vmem:[#allocation15_spill] sm:$0xff] %v16360_v5 }
 0x143   : > { %13775 = vmatmul.mubr.f32.gmra.mxu1 %v16083_v28  ;;  %13797 = vmatprep.subr.mxu1 %v4345_v51  ;;  %v1273_v63 = vadd.f32 %v13344_v18, %v1170_v60  ;;  %v4174_v18 = vld [vmem:[#allocation2 + $0x30] sm:$0xff] }
 0x144   : > { %13811 = vmatprep.subr.mxu0 %v16239_v23  ;;  %13798 = vmatpush3.msra.mxu1 %v4345_v51  ;;  %v16364_v28 = vpop.f32.mrf.mxu0  ;;  %v4832_v51 = vsel %vm252_vm0, %v4172_v12, 0 }
 0x145   : > { %13812 = vmatpush3.msra.mxu0 %v16239_v23  ;;  %13799 = vmatprep.subr.mxu1 %v4352_v9  ;;  %18851 = vst [vmem:[#allocation16_spill] sm:$0xff] %v16364_v28  ;;  %v16401_v60 = vand.u32 4294901760, %v4832_v51 }
 0x146   : > { %13813 = vmatprep.subr.mxu0 %v16268_v46  ;;  %13790 = vmatprep.mubr.f32.mxu0 %v4288_v17  ;;  %v4828_v17 = vld [vmem:[#allocation6 + $0x88] sm:$0xff] }
 0x147   : > { %13800 = vmatpush3.msra.mxu1 %v4352_v9  ;;  %13814 = vmatpush3.msra.mxu0 %v16268_v46  ;;  %v13357_v8 = vpop.f32.mrf.mxu1 }
 0x148   : > { %13791 = vmatmul.mubr.f32.gmra.mxu0 %v4298_v57  ;;  %13801 = vmatprep.subr.mxu1 %v4359_v48  ;;  %v1359_v2 = vadd.f32 %v13357_v8, %v1259_v22  ;;  %v4173_v22 = vld [vmem:[#allocation2 + $0x20] sm:$0xff] }
 0x149   : > { %13815 = vmatprep.subr.mxu0 %v16285_v56  ;;  %13802 = vmatpush3.msra.mxu1 %v4359_v48  ;;  %v16367_v10 = vpop.f32.mrf.mxu1  ;;  %v4835_v58 = vsel %vm252_vm0, %v4173_v22, 0 }
 0x14a   : > { %18852 = vst [vmem:[#allocation17_spill] sm:$0xff] %v16367_v10  ;;  %13803 = vmatprep.mubr.f32.mxu1 %v16206_v11  ;;  %13816 = vmatpush3.msra.mxu0 %v16285_v56  ;;  %v13373_v23 = vpop.f32.mrf.mxu0  ;;  %v16411_v57 = vand.u32 4294901760, %v4835_v58 }
 0x14b   : > { %13804 = vmatmul.mubr.f32.vlgmr.msra.gmra.mxu1 %v16217_v19  ;;  %13817 = vmatprep.subr.mxu0 %v16312_v61  ;;  %v1467_v46 = vadd.f32 %v13373_v23, %v1359_v2  ;;  %v16421_v2 = vsub.f32 %v4830_v25, %v16396_v36  ;;  %v4175_v23 = vld [vmem:[#allocation2 + $0x40] sm:$0xff] }
 0x14c   : > { %13825 = vmatprep.subr.mxu1 %v16201_v44  ;;  %13818 = vmatpush3.msra.mxu0 %v16312_v61  ;;  %v16375_v30 = vpop.f32.mrf.mxu0  ;;  %v4841_v12 = vsel %vm252_vm0, %v4175_v23, 0 }
 0x14d   : > { %18853 = vst [vmem:[#allocation18_spill] sm:$0xff] %v16375_v30  ;;  %13819 = vmatprep.mubr.f32.mxu0 %v16233_v3  ;;  %13826 = vmatpush3.msra.mxu1 %v16201_v44  ;;  %v13360_v29 = vpop.f32.mrf.mxu1  ;;  %v4838_v3 = vsel %vm252_vm0, %v4174_v18, 0 }
 0x14e   : > { %13820 = vmatmul.mubr.f32.vlgmr.msra.gmra.mxu0 %v16249_v7  ;;  %13827 = vmatprep.subr.mxu1 %v16210_v50  ;;  %v1375_v56 = vadd.f32 %v13360_v29, %v1273_v63  ;;  %v16429_v29 = vsub.f32 %v4832_v51, %v16401_v60  ;;  %v16450_v25 = vand.u32 4294901760, %v4838_v3 }
 0x14f   : > { %13841 = vmatprep.subr.mxu0 %v16259_v41  ;;  %13806 = vmatprep.mubr.f32.mxu1 %v16261_v20 }
 0x150   : > { %13828 = vmatpush3.msra.mxu1 %v16210_v50  ;;  %13842 = vmatpush3.msra.mxu0 %v16259_v41  ;;  %v13376_v61 = vpop.f32.mrf.mxu0  ;;  %v16392_v41 = vpop.f32.mrf.mxu1  ;;  %v18829_v51 = vand.u32 4294901760, %v16429_v29 }
 0x151   : > { %13807 = vmatmul.mubr.f32.gmra.mxu1 %v16278_v55  ;;  %13829 = vmatprep.subr.mxu1 %v16230_v15  ;;  %v1479_v1 = vadd.f32 %v13376_v61, %v1375_v56  ;;  %18854 = vst [vmem:[#allocation19_spill] sm:$0xff] %v16392_v41  ;;  %v16442_v56 = vsub.f32 %v4835_v58, %v16411_v57 }
 0x152   : > { %13843 = vmatprep.subr.mxu0 %v16276_v6  ;;  %13822 = vmatprep.mubr.f32.mxu0 %v16292_v35  ;;  %v16413_v48 = vpop.f32.mrf.mxu0 }
 0x153   : > { %13830 = vmatpush3.msra.mxu1 %v16230_v15  ;;  %13844 = vmatpush3.msra.mxu0 %v16276_v6  ;;  %v16405_v6 = vand.u32 4294901760, %v4829_v26  ;;  %18855 = vst [vmem:[#allocation20_spill] sm:$0xff] %v16413_v48  ;;  %v18830_v35 = vand.u32 4294901760, %v16442_v56 }
 0x154   : > { %13823 = vmatmul.mubr.f32.gmra.mxu0 %v16309_v42  ;;  %13831 = vmatprep.subr.mxu1 %v16246_v54  ;;  %v4916_v42 = vsub.f32 %v16429_v29, %v18829_v51 }
 0x155   : > { %13845 = vmatprep.subr.mxu0 %v16300_v49  ;;  %13832 = vmatpush3.msra.mxu1 %v16246_v54  ;;  %v13389_v9 = vpop.f32.mrf.mxu1  ;;  %v4926_v51 = vsub.f32 %v16442_v56, %v18830_v35 }
 0x156   : > { %13846 = vmatpush3.msra.mxu0 %v16300_v49  ;;  %13833 = vmatprep.subr.mxu1 %v16273_v37  ;;  %v16407_v63 = vadd.f32 %v13389_v9, %v1467_v46  ;;  %v4827_v49 = vld [vmem:[#allocation6 + $0x80] sm:$0xff]  ;;  %v16426_v46 = vand.u32 4294901760, %v4828_v17  ;;  %v16470_v9 = vand.u32 4294901760, %v4841_v12 }
 0x157   : > { %13847 = vmatprep.subr.mxu0 %v16320_v39  ;;  %13834 = vmatpush3.msra.mxu1 %v16273_v37  ;;  %v16415_v8 = vpop.f32.mrf.mxu1  ;;  %v16439_v7 = vand.u32 4294901760, %v4827_v49 }
 0x158   : > { %18856 = vst [vmem:[#allocation21_spill] sm:$0xff] %v16415_v8  ;;  %13835 = vmatprep.mubr.f32.mxu1 %v4266_v32  ;;  %13848 = vmatpush3.msra.mxu0 %v16320_v39  ;;  %v16435_v39 = vsub.f32 %v4829_v26, %v16405_v6  ;;  %v16461_v26 = vsub.f32 %v4828_v17, %v16426_v46 }
 0x159   : > { %13836 = vmatmul.mubr.f32.vlgmr.msra.gmra.mxu1 %v4276_v47  ;;  %13849 = vmatprep.subr.mxu0 %v16337_v14  ;;  %v13405_v32 = vpop.f32.mrf.mxu0  ;;  %v4826_v47 = vld [vmem:[#allocation6 + $0x78] sm:$0xff]  ;;  %v16484_v17 = vsub.f32 %v4838_v3, %v16450_v25 }
 0x15a   : > { %13857 = vmatprep.subr.mxu1 %v16201_v44  ;;  %13850 = vmatpush3.msra.mxu0 %v16337_v14  ;;  %v16448_v14 = vand.u32 4294901760, %v16421_v2  ;;  %v16465_v58 = vand.u32 4294901760, %v4826_v47 }
 0x15b   : > { %13851 = vmatprep.mubr.f32.mxu0 %v16206_v11  ;;  %13858 = vmatpush3.msra.mxu1 %v16201_v44  ;;  %v13392_v61 = vpop.f32.mrf.mxu1  ;;  %v16454_v44 = vpop.f32.mrf.mxu0 }
 0x15c   : > { %13852 = vmatmul.mubr.f32.vlgmr.msra.gmra.mxu0 %v16217_v19  ;;  %13859 = vmatprep.subr.mxu1 %v16210_v50  ;;  %v16452_v22 = vadd.f32 %v13392_v61, %v1479_v1  ;;  %18857 = vst [vmem:[#allocation22_spill] sm:$0xff] %v16454_v44  ;;  %v16468_v1 = vand.u32 4294901760, %v16435_v39  ;;  %v16504_v3 = vsub.f32 %v4826_v47, %v16465_v58 }
 0x15d   : > { %13873 = vmatprep.subr.mxu0 %v16396_v36  ;;  %13838 = vmatprep.mubr.f32.mxu1 %v4286_v59  ;;  %v16477_v59 = vsub.f32 %v4827_v49, %v16439_v7  ;;  %v16494_v49 = vpop.f32.mrf.mxu1 }
 0x15e   : > { %13860 = vmatpush3.msra.mxu1 %v16210_v50  ;;  %13874 = vmatpush3.msra.mxu0 %v16396_v36  ;;  %v4979_v50 = vsub.f32 %v16421_v2, %v16448_v14  ;;  %18858 = vst [vmem:[#allocation23_spill] sm:$0xff] %v16494_v49  ;;  %v4986_v23 = vsub.f32 %v16435_v39, %v16468_v1 }
 0x15f   : > { %13839 = vmatmul.mubr.f32.gmra.mxu1 %v4296_v45  ;;  %13861 = vmatprep.subr.mxu1 %v16230_v15  ;;  %v16492_v45 = vand.u32 4294901760, %v16461_v26  ;;  %v16514_v44 = vand.u32 4294901760, %v16477_v59 }
 0x160   : > { %13875 = vmatprep.subr.mxu0 %v16405_v6  ;;  %13854 = vmatprep.mubr.f32.mxu0 %v16261_v20  ;;  %v13408_v18 = vpop.f32.mrf.mxu0  ;;  %v4980_v47 = vand.u32 4294901760, %v4979_v50  ;;  %v4987_v8 = vand.u32 4294901760, %v4986_v23 }
 0x161   : > { %13862 = vmatpush3.msra.mxu1 %v16230_v15  ;;  %13876 = vmatpush3.msra.mxu0 %v16405_v6  ;;  %v16501_v15 = vsub.f32 %v4841_v12, %v16470_v9  ;;  %v4993_v35 = vsub.f32 %v16461_v26, %v16492_v45  ;;  %v16529_v12 = vand.u32 4294901760, %v16504_v3 }
 0x162   : > { %13855 = vmatmul.mubr.f32.gmra.mxu0 %v16278_v55  ;;  %13863 = vmatprep.subr.mxu1 %v16246_v54  ;;  %v16506_v61 = vpop.f32.mrf.mxu0 }
 0x163   : > { %18859 = vst [vmem:[#allocation24_spill] sm:$0xff] %v16506_v61  ;;  %13877 = vmatprep.subr.mxu0 %v16426_v46  ;;  %13864 = vmatpush3.msra.mxu1 %v16246_v54  ;;  %v13421_v49 = vpop.f32.mrf.mxu1  ;;  %v4917_v54 = vand.u32 4294901760, %v4916_v42  ;;  %v5000_v42 = vsub.f32 %v16477_v59, %v16514_v44 }
 0x164   : > { %13878 = vmatpush3.msra.mxu0 %v16426_v46  ;;  %13865 = vmatprep.subr.mxu1 %v16273_v37  ;;  %v1803_v61 = vadd.f32 %v13421_v49, %v13405_v32 }
 0x165   : > { %13879 = vmatprep.subr.mxu0 %v16439_v7  ;;  %13866 = vmatpush3.msra.mxu1 %v16273_v37  ;;  %v16523_v48 = vpop.f32.mrf.mxu1  ;;  %v4927_v37 = vand.u32 4294901760, %v4926_v51  ;;  %v18863_v51 = vand.u32 4294901760, %v16501_v15 }
 0x166   : > { %18860 = vst [vmem:[#allocation25_spill] sm:$0xff] %v16523_v48  ;;  %13867 = vmatprep.mubr.f32.mxu1 %v16206_v11  ;;  %13880 = vmatpush3.msra.mxu0 %v16439_v7  ;;  %v13437_v32 = vpop.f32.mrf.mxu0  ;;  %v18861_v11 = vand.u32 4294901760, %v16484_v17  ;;  %v4994_v48 = vand.u32 4294901760, %v4993_v35 }
 0x167   : > { %13868 = vmatmul.mubr.f32.vlgmr.msra.gmra.mxu1 %v16217_v19  ;;  %13881 = vmatprep.subr.mxu0 %v16465_v58  ;;  %v1904_v49 = vadd.f32 %v13437_v32, %v1803_v61  ;;  %v4946_v61 = vsub.f32 %v16501_v15, %v18863_v51  ;;  %v5007_v32 = vsub.f32 %v16504_v3, %v16529_v12 }
 0x168   : > { %13889 = vmatprep.subr.mxu1 %v4980_v47  ;;  %13882 = vmatpush3.msra.mxu0 %v16465_v58  ;;  %v4936_v23 = vsub.f32 %v16484_v17, %v18861_v11  ;;  %v16539_v50 = vpop.f32.mrf.mxu0  ;;  %v5001_v11 = vand.u32 4294901760, %v5000_v42  ;;  %v12204_v42 = vld [vmem:[%s15247_s28 + $0x21] sm:$0xff] }
 0x169   : > { %18862 = vst [vmem:[#allocation26_spill] sm:$0xff] %v16539_v50  ;;  %13890 = vmatpush3.msra.mxu1 %v4980_v47  ;;  %13883 = vmatprep.mubr.f32.mxu0 %v4917_v54  ;;  %v13424_v19 = vpop.f32.mrf.mxu1  ;;  %v4947_v51 = vand.u32 4294901760, %v4946_v61  ;;  %v5008_v50 = vand.u32 4294901760, %v5007_v32  ;;  %v5492_v32 = vsel %vm252_vm0, %v12204_v42, 0 }
 0x16a   : > { %13891 = vmatprep.subr.mxu1 %v4987_v8  ;;  %13905 = vmatprep.subr.mxu0 %v16421_v2  ;;  %v1815_v41 = vadd.f32 %v13424_v19, %v13408_v18  ;;  %v4937_v35 = vand.u32 4294901760, %v4936_v23 }
 0x16b   : > { %13870 = vmatprep.mubr.f32.mxu1 %v16261_v20  ;;  %13884 = vmatmul.mubr.f32.vlgmr.msra.gmra.mxu0 %v4927_v37  ;;  %v16552_v20 = vpop.f32.mrf.mxu1  ;;  %v5487_v37 = vld [vmem:[#allocation3 + $0xc0] sm:$0xff] }
 0x16c   : > { %13892 = vmatpush3.msra.mxu1 %v4987_v8  ;;  %13906 = vmatpush3.msra.mxu0 %v16421_v2  ;;  %v13440_v47 = vpop.f32.mrf.mxu0  ;;  %18864 = vst [vmem:[#allocation27_spill] sm:$0xff] %v16552_v20  ;;  %v16590_v61 = vand.u32 4294901760, %v5487_v37 }
 0x16d   : > { %13871 = vmatmul.mubr.f32.gmra.mxu1 %v16278_v55  ;;  %13893 = vmatprep.subr.mxu1 %v4994_v48  ;;  %v1918_v54 = vadd.f32 %v13440_v47, %v1815_v41  ;;  %v5485_v47 = vld [vmem:[#allocation3 + $0xb0] sm:$0xff] }
 0x16e   : > { %13907 = vmatprep.subr.mxu0 %v16435_v39  ;;  %13894 = vmatpush3.msra.mxu1 %v4994_v48  ;;  %v16556_v55 = vpop.f32.mrf.mxu0  ;;  %v16620_v42 = vand.u32 4294901760, %v5485_v47 }
 0x16f   : > { %13908 = vmatpush3.msra.mxu0 %v16435_v39  ;;  %13895 = vmatprep.subr.mxu1 %v5001_v11  ;;  %18865 = vst [vmem:[#allocation28_spill] sm:$0xff] %v16556_v55 }
 0x170   : > { %13909 = vmatprep.subr.mxu0 %v16461_v26  ;;  %13886 = vmatprep.mubr.f32.mxu0 %v4937_v35 }
 0x171   : > { %13896 = vmatpush3.msra.mxu1 %v5001_v11  ;;  %13910 = vmatpush3.msra.mxu0 %v16461_v26  ;;  %v13453_v8 = vpop.f32.mrf.mxu1 }
 0x172   : > { %13887 = vmatmul.mubr.f32.gmra.mxu0 %v4947_v51  ;;  %13897 = vmatprep.subr.mxu1 %v5008_v50  ;;  %v2004_v41 = vadd.f32 %v13453_v8, %v1904_v49 }
 0x173   : > { %13911 = vmatprep.subr.mxu0 %v16477_v59  ;;  %13898 = vmatpush3.msra.mxu1 %v5008_v50  ;;  %v16559_v48 = vpop.f32.mrf.mxu1  ;;  %v12203_v50 = vld [vmem:[%s15247_s28 + $0x11] sm:$0xff] }
 0x174   : > { %18866 = vst [vmem:[#allocation29_spill] sm:$0xff] %v16559_v48  ;;  %13899 = vmatprep.mubr.f32.mxu1 %v16401_v60  ;;  %13912 = vmatpush3.msra.mxu0 %v16477_v59  ;;  %v13469_v2 = vpop.f32.mrf.mxu0  ;;  %v5489_v23 = vsel %vm252_vm0, %v12203_v50, 0  ;;  %v12206_v50 = vld [vmem:[%s15247_s28 + $0x41] sm:$0xff] }
 0x175   : > { %13900 = vmatmul.mubr.f32.vlgmr.msra.gmra.mxu1 %v16411_v57  ;;  %13913 = vmatprep.subr.mxu0 %v16504_v3  ;;  %v2112_v39 = vadd.f32 %v13469_v2, %v2004_v41  ;;  %v16595_v11 = vand.u32 4294901760, %v5489_v23  ;;  %v16606_v41 = vand.u32 4294901760, %v5492_v32 }
 0x176   : > { %13921 = vmatprep.subr.mxu1 %v16396_v36  ;;  %13914 = vmatpush3.msra.mxu0 %v16504_v3  ;;  %v16567_v26 = vpop.f32.mrf.mxu0 }
 0x177   : > { %18867 = vst [vmem:[#allocation30_spill] sm:$0xff] %v16567_v26  ;;  %13915 = vmatprep.mubr.f32.mxu0 %v16429_v29  ;;  %13922 = vmatpush3.msra.mxu1 %v16396_v36  ;;  %v13456_v18 = vpop.f32.mrf.mxu1 }
 0x178   : > { %13916 = vmatmul.mubr.f32.vlgmr.msra.gmra.mxu0 %v16442_v56  ;;  %13923 = vmatprep.subr.mxu1 %v16405_v6  ;;  %v2020_v59 = vadd.f32 %v13456_v18, %v1918_v54  ;;  %v12205_v54 = vld [vmem:[%s15247_s28 + $0x31] sm:$0xff]  ;;  %v18871_v18 = vand.u32 4294901760, %v16429_v29 }
 0x179   : > { %13937 = vmatprep.subr.mxu0 %v16448_v14  ;;  %13902 = vmatprep.mubr.f32.mxu1 %v16450_v25  ;;  %v16586_v19 = vpop.f32.mrf.mxu1  ;;  %v5495_v29 = vsel %vm252_vm0, %v12205_v54, 0  ;;  %v5498_v54 = vsel %vm252_vm0, %v12206_v50, 0  ;;  %v16653_v50 = vsub.f32 %v5485_v47, %v16620_v42 }
 0x17a   : > { %13924 = vmatpush3.msra.mxu1 %v16405_v6  ;;  %13938 = vmatpush3.msra.mxu0 %v16448_v14  ;;  %v13472_v3 = vpop.f32.mrf.mxu0  ;;  %v5486_v14 = vld [vmem:[#allocation3 + $0xb8] sm:$0xff]  ;;  %18868 = vst [vmem:[#allocation31_spill] sm:$0xff] %v16586_v19 }
 0x17b   : > { %13903 = vmatmul.mubr.f32.gmra.mxu1 %v16470_v9  ;;  %13925 = vmatprep.subr.mxu1 %v16426_v46  ;;  %v2124_v49 = vadd.f32 %v13472_v3, %v2020_v59  ;;  %v16614_v59 = vsub.f32 %v5487_v37, %v16590_v61 }
 0x17c   : > { %13939 = vmatprep.subr.mxu0 %v16468_v1  ;;  %13918 = vmatprep.mubr.f32.mxu0 %v16484_v17  ;;  %v16602_v51 = vpop.f32.mrf.mxu0 }
 0x17d   : > { %13926 = vmatpush3.msra.mxu1 %v16426_v46  ;;  %13940 = vmatpush3.msra.mxu0 %v16468_v1  ;;  %v16599_v1 = vand.u32 4294901760, %v5486_v14  ;;  %18869 = vst [vmem:[#allocation32_spill] sm:$0xff] %v16602_v51 }
 0x17e   : > { %13919 = vmatmul.mubr.f32.gmra.mxu0 %v16501_v15  ;;  %13927 = vmatprep.subr.mxu1 %v16439_v7 }
 0x17f   : > { %13941 = vmatprep.subr.mxu0 %v16492_v45  ;;  %13928 = vmatpush3.msra.mxu1 %v16439_v7  ;;  %v13485_v35 = vpop.f32.mrf.mxu1 }
 0x180   : > { %13942 = vmatpush3.msra.mxu0 %v16492_v45  ;;  %13929 = vmatprep.subr.mxu1 %v16465_v58  ;;  %v2206_v8 = vadd.f32 %v13485_v35, %v2112_v39  ;;  %v5484_v45 = vld [vmem:[#allocation3 + $0xa8] sm:$0xff]  ;;  %v18872_v39 = vand.u32 4294901760, %v16442_v56  ;;  %v16623_v35 = vsub.f32 %v5489_v23, %v16595_v11  ;;  %v5483_v23 = vld [vmem:[#allocation3 + $0xa0] sm:$0xff] }
 0x181   : > { %13943 = vmatprep.subr.mxu0 %v16514_v44  ;;  %13930 = vmatpush3.msra.mxu1 %v16465_v58  ;;  %v16608_v2 = vpop.f32.mrf.mxu1  ;;  %v16635_v56 = vand.u32 4294901760, %v5484_v45 }
 0x182   : > { %18870 = vst [vmem:[#allocation33_spill] sm:$0xff] %v16608_v2  ;;  %13931 = vmatprep.mubr.f32.mxu1 %v18871_v18  ;;  %13944 = vmatpush3.msra.mxu0 %v16514_v44  ;;  %v13501_v3 = vpop.f32.mrf.mxu0  ;;  %v16629_v44 = vsub.f32 %v5486_v14, %v16599_v1  ;;  %v16646_v14 = vand.u32 4294901760, %v5495_v29 }
 0x183   : > { %13932 = vmatmul.mubr.f32.vlgmr.msra.gmra.mxu1 %v18872_v39  ;;  %13945 = vmatprep.subr.mxu0 %v16529_v12  ;;  %v2320_v18 = vadd.f32 %v13501_v3, %v2206_v8  ;;  %v16638_v39 = vsub.f32 %v5492_v32, %v16606_v41 }
 0x184   : > { %13953 = vmatprep.subr.mxu1 %v16396_v36  ;;  %13946 = vmatpush3.msra.mxu0 %v16529_v12  ;;  %v16631_v37 = vpop.f32.mrf.mxu0  ;;  %v16644_v12 = vand.u32 4294901760, %v16614_v59  ;;  %v16660_v51 = vand.u32 4294901760, %v16629_v44  ;;  %v16676_v2 = vsub.f32 %v5495_v29, %v16646_v14 }
 0x185   : > { %18873 = vst [vmem:[#allocation34_spill] sm:$0xff] %v16631_v37  ;;  %13947 = vmatprep.mubr.f32.mxu0 %v16401_v60  ;;  %13954 = vmatpush3.msra.mxu1 %v16396_v36  ;;  %v13488_v8 = vpop.f32.mrf.mxu1  ;;  %v18874_v36 = vand.u32 4294901760, %v16484_v17  ;;  %v16657_v37 = vand.u32 4294901760, %v5483_v23  ;;  %v18875_v17 = vand.u32 4294901760, %v16501_v15  ;;  %v18831_v47 = vand.u32 4294901760, %v16638_v39 }
 0x186   : > { %13948 = vmatmul.mubr.f32.vlgmr.msra.gmra.mxu0 %v16411_v57  ;;  %13955 = vmatprep.subr.mxu1 %v16405_v6  ;;  %v2218_v3 = vadd.f32 %v13488_v8, %v2124_v49  ;;  %v16662_v49 = vand.u32 4294901760, %v5498_v54  ;;  %v5636_v32 = vsub.f32 %v16614_v59, %v16644_v12  ;;  %v18876_v15 = vand.u32 4294901760, %v16623_v35 }
 0x187   : > { %13969 = vmatprep.subr.mxu0 %v16590_v61  ;;  %13934 = vmatprep.mubr.f32.mxu1 %v18874_v36  ;;  %v16669_v36 = vsub.f32 %v5484_v45, %v16635_v56  ;;  %v5643_v29 = vsub.f32 %v16629_v44, %v16660_v51 }
 0x188   : > { %13956 = vmatpush3.msra.mxu1 %v16405_v6  ;;  %13970 = vmatpush3.msra.mxu0 %v16590_v61  ;;  %v13504_v8 = vpop.f32.mrf.mxu0  ;;  %v5573_v45 = vsub.f32 %v16623_v35, %v18876_v15  ;;  %v5583_v15 = vsub.f32 %v16638_v39, %v18831_v47 }
 0x189   : > { %13935 = vmatmul.mubr.f32.gmra.mxu1 %v18875_v17  ;;  %13957 = vmatprep.subr.mxu1 %v16426_v46  ;;  %v2340_v6 = vadd.f32 %v13504_v8, %v2218_v3  ;;  %v16684_v3 = vand.u32 4294901760, %v16653_v50  ;;  %v16686_v8 = vpop.f32.mrf.mxu1  ;;  %v16696_v17 = vsub.f32 %v5483_v23, %v16657_v37 }
 0x18a   : > { %13971 = vmatprep.subr.mxu0 %v16599_v1  ;;  %13950 = vmatprep.mubr.f32.mxu0 %v16450_v25  ;;  %18877 = vst [vmem:[#allocation35_spill] sm:$0xff] %v16686_v8  ;;  %v16704_v8 = vand.u32 4294901760, %v16669_v36  ;;  %v16709_v26 = vpop.f32.mrf.mxu0 }
 0x18b   : > { %13958 = vmatpush3.msra.mxu1 %v16426_v46  ;;  %13972 = vmatpush3.msra.mxu0 %v16599_v1  ;;  %v16693_v46 = vsub.f32 %v5498_v54, %v16662_v49  ;;  %v5637_v54 = vand.u32 4294901760, %v5636_v32  ;;  %18878 = vst [vmem:[#allocation36_spill] sm:$0xff] %v16709_v26  ;;  %v5650_v47 = vsub.f32 %v16653_v50, %v16684_v3  ;;  %v5644_v32 = vand.u32 4294901760, %v5643_v29 }
 0x18c   : > { %13951 = vmatmul.mubr.f32.gmra.mxu0 %v16470_v9  ;;  %13959 = vmatprep.subr.mxu1 %v16439_v7  ;;  %v16721_v26 = vand.u32 4294901760, %v16696_v17 }
 0x18d   : > { %13973 = vmatprep.subr.mxu0 %v16620_v42  ;;  %13960 = vmatpush3.msra.mxu1 %v16439_v7  ;;  %v13517_v19 = vpop.f32.mrf.mxu1  ;;  %v5574_v7 = vand.u32 4294901760, %v5573_v45 }
 0x18e   : > { %13974 = vmatpush3.msra.mxu0 %v16620_v42  ;;  %13961 = vmatprep.subr.mxu1 %v16465_v58  ;;  %v2442_v55 = vadd.f32 %v13517_v19, %v2320_v18  ;;  %v5657_v18 = vsub.f32 %v16669_v36, %v16704_v8 }
 0x18f   : > { %13975 = vmatprep.subr.mxu0 %v16635_v56  ;;  %13962 = vmatpush3.msra.mxu1 %v16465_v58  ;;  %v16715_v48 = vpop.f32.mrf.mxu1  ;;  %v5584_v58 = vand.u32 4294901760, %v5583_v15  ;;  %v18882_v15 = vand.u32 4294901760, %v16693_v46 }
 0x190   : > { %18879 = vst [vmem:[#allocation37_spill] sm:$0xff] %v16715_v48  ;;  %13963 = vmatprep.mubr.f32.mxu1 %v16401_v60  ;;  %13976 = vmatpush3.msra.mxu0 %v16635_v56  ;;  %v13533_v19 = vpop.f32.mrf.mxu0  ;;  %v18880_v60 = vand.u32 4294901760, %v16676_v2  ;;  %v5651_v48 = vand.u32 4294901760, %v5650_v47 }
 0x191   : > { %13964 = vmatmul.mubr.f32.vlgmr.msra.gmra.mxu1 %v16411_v57  ;;  %13977 = vmatprep.subr.mxu0 %v16657_v37  ;;  %v2543_v45 = vadd.f32 %v13533_v19, %v2442_v55  ;;  %v5603_v55 = vsub.f32 %v16693_v46, %v18882_v15  ;;  %v5664_v19 = vsub.f32 %v16696_v17, %v16721_v26 }
 0x192   : > { %13985 = vmatprep.subr.mxu1 %v5637_v54  ;;  %13978 = vmatpush3.msra.mxu0 %v16657_v37  ;;  %v5593_v29 = vsub.f32 %v16676_v2, %v18880_v60  ;;  %v16731_v23 = vpop.f32.mrf.mxu0  ;;  %v5658_v60 = vand.u32 4294901760, %v5657_v18  ;;  %v5479_v18 = vld [vmem:[#allocation2 + $0x21] sm:$0xff] }
 0x193   : > { %18881 = vst [vmem:[#allocation38_spill] sm:$0xff] %v16731_v23  ;;  %13986 = vmatpush3.msra.mxu1 %v5637_v54  ;;  %13979 = vmatprep.mubr.f32.mxu0 %v5574_v7  ;;  %v13520_v57 = vpop.f32.mrf.mxu1  ;;  %v5604_v15 = vand.u32 4294901760, %v5603_v55  ;;  %v5665_v23 = vand.u32 4294901760, %v5664_v19  ;;  %v6141_v19 = vsel %vm252_vm0, %v5479_v18, 0 }
 0x194   : > { %13987 = vmatprep.subr.mxu1 %v5644_v32  ;;  %14001 = vmatprep.subr.mxu0 %v16614_v59  ;;  %v2454_v20 = vadd.f32 %v13520_v57, %v2340_v6  ;;  %v5594_v47 = vand.u32 4294901760, %v5593_v29  ;;  %v6135_v57 = vld [vmem:[#allocation6 + $0xb8] sm:$0xff] }
 0x195   : > { %13966 = vmatprep.mubr.f32.mxu1 %v16450_v25  ;;  %13980 = vmatmul.mubr.f32.vlgmr.msra.gmra.mxu0 %v5584_v58  ;;  %v16744_v25 = vpop.f32.mrf.mxu1  ;;  %v6136_v58 = vld [vmem:[#allocation6 + $0xc0] sm:$0xff] }
 0x196   : > { %13988 = vmatpush3.msra.mxu1 %v5644_v32  ;;  %14002 = vmatpush3.msra.mxu0 %v16614_v59  ;;  %v13536_v54 = vpop.f32.mrf.mxu0  ;;  %18883 = vst [vmem:[#allocation39_spill] sm:$0xff] %v16744_v25  ;;  %v5478_v32 = vld [vmem:[#allocation2 + $0x11] sm:$0xff]  ;;  %v16780_v55 = vand.u32 4294901760, %v6136_v58 }
 0x197   : > { %13967 = vmatmul.mubr.f32.gmra.mxu1 %v16470_v9  ;;  %13989 = vmatprep.subr.mxu1 %v5651_v48  ;;  %v2557_v7 = vadd.f32 %v13536_v54, %v2454_v20  ;;  %v6138_v29 = vsel %vm252_vm0, %v5478_v32, 0  ;;  %v6134_v54 = vld [vmem:[#allocation6 + $0xb0] sm:$0xff]  ;;  %v18891_v32 = vand.u32 4294901760, %v16638_v39 }
 0x198   : > { %14003 = vmatprep.subr.mxu0 %v16629_v44  ;;  %13990 = vmatpush3.msra.mxu1 %v5651_v48  ;;  %v16748_v9 = vpop.f32.mrf.mxu0 }
 0x199   : > { %14004 = vmatpush3.msra.mxu0 %v16629_v44  ;;  %13991 = vmatprep.subr.mxu1 %v5658_v60  ;;  %18884 = vst [vmem:[#allocation40_spill] sm:$0xff] %v16748_v9 }
 0x19a   : > { %14005 = vmatprep.subr.mxu0 %v16653_v50  ;;  %13982 = vmatprep.mubr.f32.mxu0 %v5594_v47 }
 0x19b   : > { %13992 = vmatpush3.msra.mxu1 %v5658_v60  ;;  %14006 = vmatpush3.msra.mxu0 %v16653_v50  ;;  %v13549_v59 = vpop.f32.mrf.mxu1  ;;  %v16785_v60 = vand.u32 4294901760, %v6138_v29 }
 0x19c   : > { %13983 = vmatmul.mubr.f32.gmra.mxu0 %v5604_v15  ;;  %13993 = vmatprep.subr.mxu1 %v5665_v23  ;;  %v2643_v20 = vadd.f32 %v13549_v59, %v2543_v45  ;;  %v16795_v59 = vand.u32 4294901760, %v6141_v19 }
 0x19d   : > { %14007 = vmatprep.subr.mxu0 %v16669_v36  ;;  %13994 = vmatpush3.msra.mxu1 %v5665_v23  ;;  %v16751_v48 = vpop.f32.mrf.mxu1  ;;  %v16813_v18 = vsub.f32 %v6138_v29, %v16785_v60 }
 0x19e   : > { %18885 = vst [vmem:[#allocation41_spill] sm:$0xff] %v16751_v48  ;;  %13995 = vmatprep.mubr.f32.mxu1 %v16595_v11  ;;  %14008 = vmatpush3.msra.mxu0 %v16669_v36  ;;  %v13565_v44 = vpop.f32.mrf.mxu0  ;;  %v16826_v29 = vsub.f32 %v6141_v19, %v16795_v59  ;;  %v18892_v19 = vand.u32 4294901760, %v16676_v2 }
 0x19f   : > { %13996 = vmatmul.mubr.f32.vlgmr.msra.gmra.mxu1 %v16606_v41  ;;  %14009 = vmatprep.subr.mxu0 %v16696_v17  ;;  %v2751_v50 = vadd.f32 %v13565_v44, %v2643_v20 }
 0x1a0   : > { %14017 = vmatprep.subr.mxu1 %v16590_v61  ;;  %14010 = vmatpush3.msra.mxu0 %v16696_v17  ;;  %v16759_v6 = vpop.f32.mrf.mxu0 }
 0x1a1   : > { %18886 = vst [vmem:[#allocation42_spill] sm:$0xff] %v16759_v6  ;;  %14011 = vmatprep.mubr.f32.mxu0 %v16623_v35  ;;  %14018 = vmatpush3.msra.mxu1 %v16590_v61  ;;  %v13552_v23 = vpop.f32.mrf.mxu1 }
 0x1a2   : > { %14012 = vmatmul.mubr.f32.vlgmr.msra.gmra.mxu0 %v16638_v39  ;;  %14019 = vmatprep.subr.mxu1 %v16599_v1  ;;  %v2659_v36 = vadd.f32 %v13552_v23, %v2557_v7  ;;  %v5480_v7 = vld [vmem:[#allocation2 + $0x31] sm:$0xff] }
 0x1a3   : > { %14033 = vmatprep.subr.mxu0 %v16644_v12  ;;  %13998 = vmatprep.mubr.f32.mxu1 %v16646_v14  ;;  %v6133_v23 = vld [vmem:[#allocation6 + $0xa8] sm:$0xff] }
 0x1a4   : > { %14020 = vmatpush3.msra.mxu1 %v16599_v1  ;;  %14034 = vmatpush3.msra.mxu0 %v16644_v12  ;;  %v13568_v17 = vpop.f32.mrf.mxu0  ;;  %v16776_v12 = vpop.f32.mrf.mxu1  ;;  %v16823_v39 = vand.u32 4294901760, %v6133_v23 }
 0x1a5   : > { %13999 = vmatmul.mubr.f32.gmra.mxu1 %v16662_v49  ;;  %14021 = vmatprep.subr.mxu1 %v16620_v42  ;;  %v2763_v45 = vadd.f32 %v13568_v17, %v2659_v36  ;;  %18887 = vst [vmem:[#allocation43_spill] sm:$0xff] %v16776_v12  ;;  %v16805_v36 = vsub.f32 %v6136_v58, %v16780_v55  ;;  %v16810_v17 = vand.u32 4294901760, %v6134_v54  ;;  %v6132_v58 = vld [vmem:[#allocation6 + $0xa0] sm:$0xff]  ;;  %v18893_v12 = vand.u32 4294901760, %v16693_v46 }
 0x1a6   : > { %14035 = vmatprep.subr.mxu0 %v16660_v51  ;;  %14014 = vmatprep.mubr.f32.mxu0 %v16676_v2  ;;  %v16797_v20 = vpop.f32.mrf.mxu0 }
 0x1a7   : > { %14022 = vmatpush3.msra.mxu1 %v16620_v42  ;;  %14036 = vmatpush3.msra.mxu0 %v16660_v51  ;;  %v16789_v51 = vand.u32 4294901760, %v6135_v57  ;;  %18888 = vst [vmem:[#allocation44_spill] sm:$0xff] %v16797_v20  ;;  %v16845_v20 = vsub.f32 %v6134_v54, %v16810_v17  ;;  %v16861_v54 = vsub.f32 %v6133_v23, %v16823_v39 }
 0x1a8   : > { %14015 = vmatmul.mubr.f32.gmra.mxu0 %v16693_v46  ;;  %14023 = vmatprep.subr.mxu1 %v16635_v56  ;;  %v18894_v46 = vand.u32 4294901760, %v16813_v18 }
 0x1a9   : > { %14037 = vmatprep.subr.mxu0 %v16684_v3  ;;  %14024 = vmatpush3.msra.mxu1 %v16635_v56  ;;  %v13581_v47 = vpop.f32.mrf.mxu1  ;;  %v16876_v23 = vand.u32 4294901760, %v16845_v20  ;;  %v16898_v48 = vand.u32 4294901760, %v16861_v54 }
 0x1aa   : > { %14038 = vmatpush3.msra.mxu0 %v16684_v3  ;;  %14025 = vmatprep.subr.mxu1 %v16657_v37  ;;  %v16791_v15 = vadd.f32 %v13581_v47, %v2751_v50  ;;  %v18890_v3 = vand.u32 4294901760, %v16623_v35  ;;  %v5481_v50 = vld [vmem:[#allocation2 + $0x41] sm:$0xff]  ;;  %v6144_v35 = vsel %vm252_vm0, %v5480_v7, 0 }
 0x1ab   : > { %14039 = vmatprep.subr.mxu0 %v16704_v8  ;;  %14026 = vmatpush3.msra.mxu1 %v16657_v37  ;;  %v16799_v44 = vpop.f32.mrf.mxu1  ;;  %v6147_v7 = vsel %vm252_vm0, %v5481_v50, 0 }
 0x1ac   : > { %18889 = vst [vmem:[#allocation45_spill] sm:$0xff] %v16799_v44  ;;  %14027 = vmatprep.mubr.f32.mxu1 %v18890_v3  ;;  %14040 = vmatpush3.msra.mxu0 %v16704_v8  ;;  %v16819_v8 = vsub.f32 %v6135_v57, %v16789_v51  ;;  %v16834_v57 = vand.u32 4294901760, %v6144_v35  ;;  %v16849_v44 = vand.u32 4294901760, %v6132_v58 }
 0x1ad   : > { %14028 = vmatmul.mubr.f32.vlgmr.msra.gmra.mxu1 %v18891_v32  ;;  %14041 = vmatprep.subr.mxu0 %v16721_v26  ;;  %v13597_v47 = vpop.f32.mrf.mxu0 }
 0x1ae   : > { %14049 = vmatprep.subr.mxu1 %v16590_v61  ;;  %14042 = vmatpush3.msra.mxu0 %v16721_v26  ;;  %v16832_v26 = vand.u32 4294901760, %v16805_v36  ;;  %v16888_v6 = vsub.f32 %v6132_v58, %v16849_v44 }
 0x1af   : > { %14043 = vmatprep.mubr.f32.mxu0 %v16595_v11  ;;  %14050 = vmatpush3.msra.mxu1 %v16590_v61  ;;  %v13584_v3 = vpop.f32.mrf.mxu1  ;;  %v16838_v61 = vpop.f32.mrf.mxu0 }
 0x1b0   : > { %14044 = vmatmul.mubr.f32.vlgmr.msra.gmra.mxu0 %v16606_v41  ;;  %14051 = vmatprep.subr.mxu1 %v16599_v1  ;;  %v16836_v32 = vadd.f32 %v13584_v3, %v2763_v45  ;;  %v16852_v45 = vand.u32 4294901760, %v16819_v8  ;;  %v16854_v3 = vand.u32 4294901760, %v6147_v7 }
 0x1b1   : > { %14065 = vmatprep.subr.mxu0 %v16780_v55  ;;  %14030 = vmatprep.mubr.f32.mxu1 %v18892_v19  ;;  %v16868_v19 = vsub.f32 %v6144_v35, %v16834_v57  ;;  %v16878_v2 = vpop.f32.mrf.mxu1 }
 0x1b2   : > { %14052 = vmatpush3.msra.mxu1 %v16599_v1  ;;  %14066 = vmatpush3.msra.mxu0 %v16780_v55  ;;  %v6285_v1 = vsub.f32 %v16805_v36, %v16832_v26  ;;  %18895 = vst [vmem:[#allocation46_spill] sm:$0xff] %v16878_v2  ;;  %v6292_v35 = vsub.f32 %v16819_v8, %v16852_v45 }
 0x1b3   : > { %14031 = vmatmul.mubr.f32.gmra.mxu1 %v18893_v12  ;;  %14053 = vmatprep.subr.mxu1 %v16620_v42  ;;  %v6222_v12 = vsub.f32 %v16813_v18, %v18894_v46  ;;  %v18897_v46 = vand.u32 4294901760, %v16826_v29 }
 0x1b4   : > { %14067 = vmatprep.subr.mxu0 %v16789_v51  ;;  %14046 = vmatprep.mubr.f32.mxu0 %v16646_v14  ;;  %v13600_v50 = vpop.f32.mrf.mxu0  ;;  %v6286_v58 = vand.u32 4294901760, %v6285_v1  ;;  %v6293_v10 = vand.u32 4294901760, %v6292_v35 }
 0x1b5   : > { %14054 = vmatpush3.msra.mxu1 %v16620_v42  ;;  %14068 = vmatpush3.msra.mxu0 %v16789_v51  ;;  %v16885_v42 = vsub.f32 %v6147_v7, %v16854_v3  ;;  %v6232_v2 = vsub.f32 %v16826_v29, %v18897_v46  ;;  %v6299_v46 = vsub.f32 %v16845_v20, %v16876_v23  ;;  %v16913_v7 = vand.u32 4294901760, %v16888_v6 }
 0x1b6   : > { %14047 = vmatmul.mubr.f32.gmra.mxu0 %v16662_v49  ;;  %14055 = vmatprep.subr.mxu1 %v16635_v56  ;;  %v16890_v9 = vpop.f32.mrf.mxu0 }
 0x1b7   : > { %18896 = vst [vmem:[#allocation47_spill] sm:$0xff] %v16890_v9  ;;  %14069 = vmatprep.subr.mxu0 %v16810_v17  ;;  %14056 = vmatpush3.msra.mxu1 %v16635_v56  ;;  %v13613_v25 = vpop.f32.mrf.mxu1  ;;  %v6223_v56 = vand.u32 4294901760, %v6222_v12  ;;  %v6300_v9 = vand.u32 4294901760, %v6299_v46 }
 0x1b8   : > { %14070 = vmatpush3.msra.mxu0 %v16810_v17  ;;  %14057 = vmatprep.subr.mxu1 %v16657_v37  ;;  %v3095_v30 = vadd.f32 %v13613_v25, %v13597_v47  ;;  %v6306_v47 = vsub.f32 %v16861_v54, %v16898_v48 }
 0x1b9   : > { %14071 = vmatprep.subr.mxu0 %v16823_v39  ;;  %14058 = vmatpush3.msra.mxu1 %v16657_v37  ;;  %v16907_v28 = vpop.f32.mrf.mxu1  ;;  %v6233_v37 = vand.u32 4294901760, %v6232_v2  ;;  %v18901_v2 = vand.u32 4294901760, %v16885_v42 }
 0x1ba   : > { %18898 = vst [vmem:[#allocation48_spill] sm:$0xff] %v16907_v28  ;;  %14059 = vmatprep.mubr.f32.mxu1 %v16595_v11  ;;  %14072 = vmatpush3.msra.mxu0 %v16823_v39  ;;  %v13629_v25 = vpop.f32.mrf.mxu0  ;;  %v18899_v11 = vand.u32 4294901760, %v16868_v19 }
 0x1bb   : > { %14060 = vmatmul.mubr.f32.vlgmr.msra.gmra.mxu1 %v16606_v41  ;;  %14073 = vmatprep.subr.mxu0 %v16849_v44  ;;  %v3196_v12 = vadd.f32 %v13629_v25, %v3095_v30  ;;  %v6252_v30 = vsub.f32 %v16885_v42, %v18901_v2  ;;  %v6313_v25 = vsub.f32 %v16888_v6, %v16913_v7 }
 0x1bc   : > { %14081 = vmatprep.subr.mxu1 %v6286_v58  ;;  %14074 = vmatpush3.msra.mxu0 %v16849_v44  ;;  %v6242_v35 = vsub.f32 %v16868_v19, %v18899_v11  ;;  %v16923_v1 = vpop.f32.mrf.mxu0  ;;  %v6307_v11 = vand.u32 4294901760, %v6306_v47  ;;  %v12208_v47 = vld [vmem:[%s15247_s28 + $0x22] sm:$0xff] }
 0x1bd   : > { %18900 = vst [vmem:[#allocation49_spill] sm:$0xff] %v16923_v1  ;;  %14082 = vmatpush3.msra.mxu1 %v6286_v58  ;;  %14075 = vmatprep.mubr.f32.mxu0 %v6223_v56  ;;  %v13616_v41 = vpop.f32.mrf.mxu1  ;;  %v6253_v2 = vand.u32 4294901760, %v6252_v30  ;;  %v6314_v40 = vand.u32 4294901760, %v6313_v25  ;;  %v6798_v25 = vsel %vm252_vm0, %v12208_v47, 0 }
 0x1be   : > { %14083 = vmatprep.subr.mxu1 %v6293_v10  ;;  %14097 = vmatprep.subr.mxu0 %v16805_v36  ;;  %v3107_v5 = vadd.f32 %v13616_v41, %v13600_v50  ;;  %v6243_v58 = vand.u32 4294901760, %v6242_v35 }
 0x1bf   : > { %14062 = vmatprep.mubr.f32.mxu1 %v16646_v14  ;;  %14076 = vmatmul.mubr.f32.vlgmr.msra.gmra.mxu0 %v6233_v37  ;;  %v16936_v14 = vpop.f32.mrf.mxu1  ;;  %v6793_v37 = vld [vmem:[#allocation3 + $0xe8] sm:$0xff] }
 0x1c0   : > { %14084 = vmatpush3.msra.mxu1 %v6293_v10  ;;  %14098 = vmatpush3.msra.mxu0 %v16805_v36  ;;  %v13632_v56 = vpop.f32.mrf.mxu0  ;;  %18902 = vst [vmem:[#allocation50_spill] sm:$0xff] %v16936_v14  ;;  %v16974_v30 = vand.u32 4294901760, %v6793_v37 }
 0x1c1   : > { %14063 = vmatmul.mubr.f32.gmra.mxu1 %v16662_v49  ;;  %14085 = vmatprep.subr.mxu1 %v6300_v9  ;;  %v3210_v46 = vadd.f32 %v13632_v56, %v3107_v5  ;;  %v6791_v56 = vld [vmem:[#allocation3 + $0xd8] sm:$0xff] }
 0x1c2   : > { %14099 = vmatprep.subr.mxu0 %v16819_v8  ;;  %14086 = vmatpush3.msra.mxu1 %v6300_v9  ;;  %v16940_v5 = vpop.f32.mrf.mxu0  ;;  %v17007_v47 = vand.u32 4294901760, %v6791_v56 }
 0x1c3   : > { %14100 = vmatpush3.msra.mxu0 %v16819_v8  ;;  %14087 = vmatprep.subr.mxu1 %v6307_v11  ;;  %18903 = vst [vmem:[#allocation51_spill] sm:$0xff] %v16940_v5 }
 0x1c4   : > { %14101 = vmatprep.subr.mxu0 %v16845_v20  ;;  %14078 = vmatprep.mubr.f32.mxu0 %v6243_v58 }
 0x1c5   : > { %14088 = vmatpush3.msra.mxu1 %v6307_v11  ;;  %14102 = vmatpush3.msra.mxu0 %v16845_v20  ;;  %v13645_v10 = vpop.f32.mrf.mxu1 }
 0x1c6   : > { %14079 = vmatmul.mubr.f32.gmra.mxu0 %v6253_v2  ;;  %14089 = vmatprep.subr.mxu1 %v6314_v40  ;;  %v3296_v49 = vadd.f32 %v13645_v10, %v3196_v12  ;;  %v16988_v10 = vand.u32 4294901760, %v6798_v25 }
 0x1c7   : > { %14103 = vmatprep.subr.mxu0 %v16861_v54  ;;  %14090 = vmatpush3.msra.mxu1 %v6314_v40  ;;  %v16943_v9 = vpop.f32.mrf.mxu1 }
 0x1c8   : > { %18904 = vst [vmem:[#allocation52_spill] sm:$0xff] %v16943_v9  ;;  %14091 = vmatprep.mubr.f32.mxu1 %v16785_v60  ;;  %14104 = vmatpush3.msra.mxu0 %v16861_v54  ;;  %v13661_v36 = vpop.f32.mrf.mxu0  ;;  %v12207_v54 = vld [vmem:[%s15247_s28 + $0x12] sm:$0xff] }
 0x1c9   : > { %14092 = vmatmul.mubr.f32.vlgmr.msra.gmra.mxu1 %v16795_v59  ;;  %14105 = vmatprep.subr.mxu0 %v16888_v6  ;;  %v3404_v20 = vadd.f32 %v13661_v36, %v3296_v49  ;;  %v6795_v35 = vsel %vm252_vm0, %v12207_v54, 0 }
 0x1ca   : > { %14113 = vmatprep.subr.mxu1 %v16780_v55  ;;  %14106 = vmatpush3.msra.mxu0 %v16888_v6  ;;  %v16951_v8 = vpop.f32.mrf.mxu0  ;;  %v16979_v11 = vand.u32 4294901760, %v6795_v35 }
 0x1cb   : > { %18905 = vst [vmem:[#allocation53_spill] sm:$0xff] %v16951_v8  ;;  %14107 = vmatprep.mubr.f32.mxu0 %v16813_v18  ;;  %14114 = vmatpush3.msra.mxu1 %v16780_v55  ;;  %v13648_v40 = vpop.f32.mrf.mxu1 }
 0x1cc   : > { %14108 = vmatmul.mubr.f32.vlgmr.msra.gmra.mxu0 %v16826_v29  ;;  %14115 = vmatprep.subr.mxu1 %v16789_v51  ;;  %v3312_v50 = vadd.f32 %v13648_v40, %v3210_v46  ;;  %v12209_v46 = vld [vmem:[%s15247_s28 + $0x32] sm:$0xff]  ;;  %v18909_v40 = vand.u32 4294901760, %v16813_v18  ;;  %v17010_v18 = vsub.f32 %v6795_v35, %v16979_v11  ;;  %v6789_v35 = vld [vmem:[#allocation3 + $0xc8] sm:$0xff] }
 0x1cd   : > { %14129 = vmatprep.subr.mxu0 %v16832_v26  ;;  %14094 = vmatprep.mubr.f32.mxu1 %v16834_v57  ;;  %v16970_v41 = vpop.f32.mrf.mxu1 }
 0x1ce   : > { %14116 = vmatpush3.msra.mxu1 %v16789_v51  ;;  %14130 = vmatpush3.msra.mxu0 %v16832_v26  ;;  %v13664_v6 = vpop.f32.mrf.mxu0  ;;  %v6792_v26 = vld [vmem:[#allocation3 + $0xe0] sm:$0xff]  ;;  %18906 = vst [vmem:[#allocation54_spill] sm:$0xff] %v16970_v41  ;;  %v17052_v41 = vand.u32 4294901760, %v6789_v35 }
 0x1cf   : > { %14095 = vmatmul.mubr.f32.gmra.mxu1 %v16854_v3  ;;  %14117 = vmatprep.subr.mxu1 %v16810_v17  ;;  %v3416_v12 = vadd.f32 %v13664_v6, %v3312_v50  ;;  %v16998_v50 = vsub.f32 %v6793_v37, %v16974_v30  ;;  %v18910_v6 = vand.u32 4294901760, %v16826_v29  ;;  %v17019_v37 = vld [vmem:[%s15247_s28 + $0x50] sm:$0xff] }
 0x1d0   : > { %14131 = vmatprep.subr.mxu0 %v16852_v45  ;;  %14110 = vmatprep.mubr.f32.mxu0 %v16868_v19  ;;  %v16990_v49 = vpop.f32.mrf.mxu0 }
 0x1d1   : > { %14118 = vmatpush3.msra.mxu1 %v16810_v17  ;;  %14132 = vmatpush3.msra.mxu0 %v16852_v45  ;;  %v16983_v45 = vand.u32 4294901760, %v6792_v26  ;;  %18907 = vst [vmem:[#allocation55_spill] sm:$0xff] %v16990_v49 }
 0x1d2   : > { %14111 = vmatmul.mubr.f32.gmra.mxu0 %v16885_v42  ;;  %14119 = vmatprep.subr.mxu1 %v16823_v39 }
 0x1d3   : > { %14133 = vmatprep.subr.mxu0 %v16876_v23  ;;  %14120 = vmatpush3.msra.mxu1 %v16823_v39  ;;  %v13677_v58 = vpop.f32.mrf.mxu1 }
 0x1d4   : > { %14134 = vmatpush3.msra.mxu0 %v16876_v23  ;;  %14121 = vmatprep.subr.mxu1 %v16849_v44  ;;  %v3498_v2 = vadd.f32 %v13677_v58, %v3404_v20  ;;  %v6790_v23 = vld [vmem:[#allocation3 + $0xd0] sm:$0xff]  ;;  %v12210_v20 = vld [vmem:[%s15247_s28 + $0x42] sm:$0xff] }
 0x1d5   : > { %14135 = vmatprep.subr.mxu0 %v16898_v48  ;;  %14122 = vmatpush3.msra.mxu1 %v16849_v44  ;;  %v16992_v36 = vpop.f32.mrf.mxu1  ;;  %v17023_v29 = vand.u32 4294901760, %v6790_v23 }
 0x1d6   : > { %18908 = vst [vmem:[#allocation56_spill] sm:$0xff] %v16992_v36  ;;  %14123 = vmatprep.mubr.f32.mxu1 %v18909_v40  ;;  %14136 = vmatpush3.msra.mxu0 %v16898_v48  ;;  %v17002_v54 = vadd.f32 %v3498_v2, %v16407_v63  ;;  %v6801_v48 = vsel %vm252_vm0, %v12209_v46, 0  ;;  %v17016_v63 = vsub.f32 %v6792_v26, %v16983_v45  ;;  %v6804_v46 = vsel %vm252_vm0, %v12210_v20, 0 }
 0x1d7   : > { %14124 = vmatmul.mubr.f32.vlgmr.msra.gmra.mxu1 %v18910_v6  ;;  %14137 = vmatprep.subr.mxu0 %v16913_v7  ;;  %v13693_v58 = vpop.f32.mrf.mxu0  ;;  %v17026_v2 = vsub.f32 %v6798_v25, %v16988_v10  ;;  %v17038_v6 = vand.u32 4294901760, %v6801_v48  ;;  %v18912_v20 = vand.u32 4294901760, %v16868_v19  ;;  %v18832_v36 = vand.u32 4294901760, %v17010_v18 }
 0x1d8   : > { %14145 = vmatprep.subr.mxu1 %v16780_v55  ;;  %14138 = vmatpush3.msra.mxu0 %v16913_v7  ;;  %v14996_v7 = vld [vmem:[%s18824_s1] sm:$0xff] }
 0x1d9   : > { %14139 = vmatprep.mubr.f32.mxu0 %v16785_v60  ;;  %14146 = vmatpush3.msra.mxu1 %v16780_v55  ;;  %v13680_v40 = vpop.f32.mrf.mxu1  ;;  %v250_v26 = vmul.f32 %v14996_v7, %v17019_v37  ;;  %v17036_v55 = vand.u32 4294901760, %v16998_v50  ;;  %v17040_v49 = vpop.f32.mrf.mxu0  ;;  %v17047_v7 = vsub.f32 %v6791_v56, %v17007_v47  ;;  %v17094_v56 = vsub.f32 %v6789_v35, %v17052_v41 }
 0x1da   : > { %14140 = vmatmul.mubr.f32.vlgmr.msra.gmra.mxu0 %v16795_v59  ;;  %14147 = vmatprep.subr.mxu1 %v16789_v51  ;;  %v3510_v25 = vadd.f32 %v13680_v40, %v3416_v12  ;;  %18911 = vst [vmem:[#allocation57_spill] sm:$0xff] %v17040_v49  ;;  %v17055_v12 = vand.u32 4294901760, %v17016_v63  ;;  %v17057_v40 = vand.u32 4294901760, %v6804_v46 }
 0x1db   : > { %14161 = vmatprep.subr.mxu0 %v16974_v30  ;;  %14126 = vmatprep.mubr.f32.mxu1 %v18912_v20  ;;  %264 = vst.msk [vmem:[#allocation2 + $0x50] sm:$0xff] %vm252_vm0, %v250_v26  ;;  %v18913_v20 = vand.u32 4294901760, %v16885_v42  ;;  %v6942_v26 = vsub.f32 %v16998_v50, %v17036_v55  ;;  %v6879_v42 = vsub.f32 %v17010_v18, %v18832_v36  ;;  %v18916_v36 = vand.u32 4294901760, %v17026_v2 }
 0x1dc   : > { %14148 = vmatpush3.msra.mxu1 %v16789_v51  ;;  %14162 = vmatpush3.msra.mxu0 %v16974_v30  ;;  %v17060_v19 = vadd.f32 %v3510_v25, %v16452_v22  ;;  %v17067_v51 = vsub.f32 %v6790_v23, %v17023_v29  ;;  %v17074_v22 = vsub.f32 %v6801_v48, %v17038_v6  ;;  %v17082_v23 = vand.u32 4294901760, %v17047_v7 }
 0x1dd   : > { %14127 = vmatmul.mubr.f32.gmra.mxu1 %v18913_v20  ;;  %14149 = vmatprep.subr.mxu1 %v16810_v17  ;;  %v17084_v20 = vpop.f32.mrf.mxu1  ;;  %v6949_v48 = vsub.f32 %v17016_v63, %v17055_v12  ;;  %v6943_v35 = vand.u32 4294901760, %v6942_v26 }
 0x1de   : > { %14163 = vmatprep.subr.mxu0 %v16983_v45  ;;  %14142 = vmatprep.mubr.f32.mxu0 %v16834_v57  ;;  %v13696_v25 = vpop.f32.mrf.mxu0  ;;  %18914 = vst [vmem:[#allocation58_spill] sm:$0xff] %v17084_v20  ;;  %v6889_v20 = vsub.f32 %v17026_v2, %v18916_v36  ;;  %v17104_v8 = vand.u32 4294901760, %v17067_v51  ;;  %v6956_v36 = vsub.f32 %v17047_v7, %v17082_v23 }
 0x1df   : > { %14150 = vmatpush3.msra.mxu1 %v16810_v17  ;;  %14164 = vmatpush3.msra.mxu0 %v16983_v45  ;;  %v17091_v17 = vsub.f32 %v6804_v46, %v17057_v40  ;;  %v6950_v14 = vand.u32 4294901760, %v6949_v48  ;;  %v17119_v46 = vand.u32 4294901760, %v17094_v56 }
 0x1e0   : > { %14143 = vmatmul.mubr.f32.gmra.mxu0 %v16854_v3  ;;  %14151 = vmatprep.subr.mxu1 %v16823_v39  ;;  %v17096_v49 = vpop.f32.mrf.mxu0 }
 0x1e1   : > { %18915 = vst [vmem:[#allocation59_spill] sm:$0xff] %v17096_v49  ;;  %14165 = vmatprep.subr.mxu0 %v17007_v47  ;;  %14152 = vmatpush3.msra.mxu1 %v16823_v39  ;;  %v13709_v5 = vpop.f32.mrf.mxu1  ;;  %v6880_v39 = vand.u32 4294901760, %v6879_v42 }
 0x1e2   : > { %14166 = vmatpush3.msra.mxu0 %v17007_v47  ;;  %14153 = vmatprep.subr.mxu1 %v16849_v44  ;;  %v3744_v49 = vadd.f32 %v13709_v5, %v13693_v58  ;;  %v6963_v58 = vsub.f32 %v17067_v51, %v17104_v8 }
 0x1e3   : > { %14167 = vmatprep.subr.mxu0 %v17023_v29  ;;  %14154 = vmatpush3.msra.mxu1 %v16849_v44  ;;  %v17113_v9 = vpop.f32.mrf.mxu1  ;;  %v6890_v44 = vand.u32 4294901760, %v6889_v20  ;;  %v18920_v20 = vand.u32 4294901760, %v17091_v17 }
 0x1e4   : > { %18917 = vst [vmem:[#allocation60_spill] sm:$0xff] %v17113_v9  ;;  %14155 = vmatprep.mubr.f32.mxu1 %v16785_v60  ;;  %14168 = vmatpush3.msra.mxu0 %v17023_v29  ;;  %v13725_v5 = vpop.f32.mrf.mxu0  ;;  %v18918_v60 = vand.u32 4294901760, %v17074_v22  ;;  %v6957_v9 = vand.u32 4294901760, %v6956_v36 }
 0x1e5   : > { %14156 = vmatmul.mubr.f32.vlgmr.msra.gmra.mxu1 %v16795_v59  ;;  %14169 = vmatprep.subr.mxu0 %v17052_v41  ;;  %v3845_v42 = vadd.f32 %v13725_v5, %v3744_v49  ;;  %v6909_v49 = vsub.f32 %v17091_v17, %v18920_v20  ;;  %v6970_v5 = vsub.f32 %v17094_v56, %v17119_v46 }
 0x1e6   : > { %14177 = vmatprep.subr.mxu1 %v6943_v35  ;;  %14170 = vmatpush3.msra.mxu0 %v17052_v41  ;;  %v6899_v48 = vsub.f32 %v17074_v22, %v18918_v60  ;;  %v17129_v26 = vpop.f32.mrf.mxu0  ;;  %v6964_v60 = vand.u32 4294901760, %v6963_v58  ;;  %v6785_v58 = vld [vmem:[#allocation2 + $0x22] sm:$0xff] }
 0x1e7   : > { %18919 = vst [vmem:[#allocation61_spill] sm:$0xff] %v17129_v26  ;;  %14178 = vmatpush3.msra.mxu1 %v6943_v35  ;;  %14171 = vmatprep.mubr.f32.mxu0 %v6880_v39  ;;  %v13712_v59 = vpop.f32.mrf.mxu1  ;;  %v6910_v20 = vand.u32 4294901760, %v6909_v49  ;;  %v6971_v26 = vand.u32 4294901760, %v6970_v5  ;;  %v7447_v5 = vsel %vm252_vm0, %v6785_v58, 0 }
 0x1e8   : > { %14179 = vmatprep.subr.mxu1 %v6950_v14  ;;  %14193 = vmatprep.subr.mxu0 %v16998_v50  ;;  %v3756_v1 = vadd.f32 %v13712_v59, %v13696_v25  ;;  %v6900_v35 = vand.u32 4294901760, %v6899_v48  ;;  %v7441_v59 = vld [vmem:[#allocation6 + $0xe0] sm:$0xff] }
 0x1e9   : > { %14158 = vmatprep.mubr.f32.mxu1 %v16834_v57  ;;  %14172 = vmatmul.mubr.f32.vlgmr.msra.gmra.mxu0 %v6890_v44  ;;  %v17142_v57 = vpop.f32.mrf.mxu1  ;;  %v7442_v44 = vld [vmem:[#allocation6 + $0xe8] sm:$0xff] }
 0x1ea   : > { %14180 = vmatpush3.msra.mxu1 %v6950_v14  ;;  %14194 = vmatpush3.msra.mxu0 %v16998_v50  ;;  %v13728_v39 = vpop.f32.mrf.mxu0  ;;  %18921 = vst [vmem:[#allocation62_spill] sm:$0xff] %v17142_v57  ;;  %v17178_v49 = vand.u32 4294901760, %v7442_v44 }
 0x1eb   : > { %14159 = vmatmul.mubr.f32.gmra.mxu1 %v16854_v3  ;;  %14181 = vmatprep.subr.mxu1 %v6957_v9  ;;  %v3859_v36 = vadd.f32 %v13728_v39, %v3756_v1  ;;  %v7440_v39 = vld [vmem:[#allocation6 + $0xd8] sm:$0xff] }
 0x1ec   : > { %14195 = vmatprep.subr.mxu0 %v17016_v63  ;;  %14182 = vmatpush3.msra.mxu1 %v6957_v9  ;;  %v17146_v3 = vpop.f32.mrf.mxu0  ;;  %v17209_v58 = vand.u32 4294901760, %v7440_v39 }
 0x1ed   : > { %14196 = vmatpush3.msra.mxu0 %v17016_v63  ;;  %14183 = vmatprep.subr.mxu1 %v6964_v60  ;;  %18922 = vst [vmem:[#allocation63_spill] sm:$0xff] %v17146_v3 }
 0x1ee   : > { %14197 = vmatprep.subr.mxu0 %v17047_v7  ;;  %14174 = vmatprep.mubr.f32.mxu0 %v6900_v35 }
 0x1ef   : > { %14184 = vmatpush3.msra.mxu1 %v6964_v60  ;;  %14198 = vmatpush3.msra.mxu0 %v17047_v7  ;;  %v13741_v14 = vpop.f32.mrf.mxu1 }
 0x1f0   : > { %14175 = vmatmul.mubr.f32.gmra.mxu0 %v6910_v20  ;;  %14185 = vmatprep.subr.mxu1 %v6971_v26  ;;  %v3945_v1 = vadd.f32 %v13741_v14, %v3845_v42  ;;  %v17191_v14 = vand.u32 4294901760, %v7447_v5 }
 0x1f1   : > { %14199 = vmatprep.subr.mxu0 %v17067_v51  ;;  %14186 = vmatpush3.msra.mxu1 %v6971_v26  ;;  %v17149_v9 = vpop.f32.mrf.mxu1  ;;  %v6784_v26 = vld [vmem:[#allocation2 + $0x12] sm:$0xff] }
 0x1f2   : > { %18923 = vst [vmem:[#allocation64_spill] sm:$0xff] %v17149_v9  ;;  %14187 = vmatprep.mubr.f32.mxu1 %v16979_v11  ;;  %14200 = vmatpush3.msra.mxu0 %v17067_v51  ;;  %v13757_v50 = vpop.f32.mrf.mxu0  ;;  %v7444_v48 = vsel %vm252_vm0, %v6784_v26, 0 }
 0x1f3   : > { %14188 = vmatmul.mubr.f32.vlgmr.msra.gmra.mxu1 %v16988_v10  ;;  %14201 = vmatprep.subr.mxu0 %v17094_v56  ;;  %v4053_v63 = vadd.f32 %v13757_v50, %v3945_v1  ;;  %v17183_v60 = vand.u32 4294901760, %v7444_v48 }
 0x1f4   : > { %14209 = vmatprep.subr.mxu1 %v16974_v30  ;;  %14202 = vmatpush3.msra.mxu0 %v17094_v56  ;;  %v17157_v7 = vpop.f32.mrf.mxu0 }
 0x1f5   : > { %18924 = vst [vmem:[#allocation65_spill] sm:$0xff] %v17157_v7  ;;  %14203 = vmatprep.mubr.f32.mxu0 %v17010_v18  ;;  %14210 = vmatpush3.msra.mxu1 %v16974_v30  ;;  %v13744_v25 = vpop.f32.mrf.mxu1 }
 0x1f6   : > { %14204 = vmatmul.mubr.f32.vlgmr.msra.gmra.mxu0 %v17026_v2  ;;  %14211 = vmatprep.subr.mxu1 %v16983_v45  ;;  %v3961_v51 = vadd.f32 %v13744_v25, %v3859_v36  ;;  %v6786_v36 = vld [vmem:[#allocation2 + $0x32] sm:$0xff]  ;;  %v18928_v25 = vand.u32 4294901760, %v17010_v18  ;;  %v17212_v18 = vsub.f32 %v7444_v48, %v17183_v60  ;;  %v17225_v48 = vsub.f32 %v7447_v5, %v17191_v14 }
 0x1f7   : > { %14225 = vmatprep.subr.mxu0 %v17036_v55  ;;  %14190 = vmatprep.mubr.f32.mxu1 %v17038_v6  ;;  %v18931_v5 = vand.u32 4294901760, %v17074_v22 }
 0x1f8   : > { %14212 = vmatpush3.msra.mxu1 %v16983_v45  ;;  %14226 = vmatpush3.msra.mxu0 %v17036_v55  ;;  %v13760_v56 = vpop.f32.mrf.mxu0  ;;  %v17174_v55 = vpop.f32.mrf.mxu1 }
 0x1f9   : > { %14191 = vmatmul.mubr.f32.gmra.mxu1 %v17057_v40  ;;  %14213 = vmatprep.subr.mxu1 %v17007_v47  ;;  %v4065_v42 = vadd.f32 %v13760_v56, %v3961_v51  ;;  %18925 = vst [vmem:[#allocation66_spill] sm:$0xff] %v17174_v55  ;;  %v17201_v51 = vsub.f32 %v7442_v44, %v17178_v49  ;;  %v18929_v56 = vand.u32 4294901760, %v17026_v2  ;;  %v7438_v44 = vld [vmem:[#allocation6 + $0xc8] sm:$0xff] }
 0x1fa   : > { %14227 = vmatprep.subr.mxu0 %v17055_v12  ;;  %14206 = vmatprep.mubr.f32.mxu0 %v17074_v22  ;;  %v17193_v1 = vpop.f32.mrf.mxu0  ;;  %v18932_v22 = vand.u32 4294901760, %v17091_v17 }
 0x1fb   : > { %14214 = vmatpush3.msra.mxu1 %v17007_v47  ;;  %14228 = vmatpush3.msra.mxu0 %v17055_v12  ;;  %v17187_v12 = vand.u32 4294901760, %v7441_v59  ;;  %18926 = vst [vmem:[#allocation67_spill] sm:$0xff] %v17193_v1  ;;  %v17246_v1 = vand.u32 4294901760, %v7438_v44 }
 0x1fc   : > { %14207 = vmatmul.mubr.f32.gmra.mxu0 %v17091_v17  ;;  %14215 = vmatprep.subr.mxu1 %v17023_v29 }
 0x1fd   : > { %14229 = vmatprep.subr.mxu0 %v17082_v23  ;;  %14216 = vmatpush3.msra.mxu1 %v17023_v29  ;;  %v13773_v35 = vpop.f32.mrf.mxu1 }
 0x1fe   : > { %14230 = vmatpush3.msra.mxu0 %v17082_v23  ;;  %14217 = vmatprep.subr.mxu1 %v17052_v41  ;;  %v4147_v20 = vadd.f32 %v13773_v35, %v4053_v63  ;;  %v7439_v23 = vld [vmem:[#allocation6 + $0xd0] sm:$0xff]  ;;  %v6787_v63 = vld [vmem:[#allocation2 + $0x42] sm:$0xff] }
 0x1ff   : > { %14231 = vmatprep.subr.mxu0 %v17104_v8  ;;  %14218 = vmatpush3.msra.mxu1 %v17052_v41  ;;  %v17195_v50 = vpop.f32.mrf.mxu1  ;;  %v17222_v2 = vand.u32 4294901760, %v7439_v23 }
 0x200   : > { %18927 = vst [vmem:[#allocation68_spill] sm:$0xff] %v17195_v50  ;;  %14219 = vmatprep.mubr.f32.mxu1 %v18928_v25  ;;  %14232 = vmatpush3.msra.mxu0 %v17104_v8  ;;  %v17204_v26 = vadd.f32 %v4147_v20, %v16791_v15  ;;  %v7450_v8 = vsel %vm252_vm0, %v6786_v36, 0  ;;  %v17218_v15 = vsub.f32 %v7441_v59, %v17187_v12  ;;  %v7453_v36 = vsel %vm252_vm0, %v6787_v63, 0 }
 0x201   : > { %14220 = vmatmul.mubr.f32.vlgmr.msra.gmra.mxu1 %v18929_v56  ;;  %14233 = vmatprep.subr.mxu0 %v17119_v46  ;;  %v13789_v35 = vpop.f32.mrf.mxu0  ;;  %v17233_v59 = vand.u32 4294901760, %v7450_v8  ;;  %v18833_v63 = vand.u32 4294901760, %v17212_v18  ;;  %v17242_v56 = vsub.f32 %v7440_v39, %v17209_v58  ;;  %v17288_v39 = vsub.f32 %v7438_v44, %v17246_v1 }
 0x202   : > { %14241 = vmatprep.subr.mxu1 %v16974_v30  ;;  %14234 = vmatpush3.msra.mxu0 %v17119_v46  ;;  %v17231_v46 = vand.u32 4294901760, %v17201_v51 }
 0x203   : > { %14235 = vmatprep.mubr.f32.mxu0 %v16979_v11  ;;  %14242 = vmatpush3.msra.mxu1 %v16974_v30  ;;  %v13776_v20 = vpop.f32.mrf.mxu1  ;;  %v17235_v30 = vpop.f32.mrf.mxu0  ;;  %v7528_v17 = vsub.f32 %v17212_v18, %v18833_v63  ;;  %v18935_v63 = vand.u32 4294901760, %v17225_v48 }
 0x204   : > { %14236 = vmatmul.mubr.f32.vlgmr.msra.gmra.mxu0 %v16988_v10  ;;  %14243 = vmatprep.subr.mxu1 %v16983_v45  ;;  %v4159_v25 = vadd.f32 %v13776_v20, %v4065_v42  ;;  %18930 = vst [vmem:[#allocation69_spill] sm:$0xff] %v17235_v30  ;;  %v17249_v42 = vand.u32 4294901760, %v17218_v15  ;;  %v17251_v20 = vand.u32 4294901760, %v7453_v36 }
 0x205   : > { %14257 = vmatprep.subr.mxu0 %v17178_v49  ;;  %14222 = vmatprep.mubr.f32.mxu1 %v18931_v5  ;;  %v7591_v5 = vsub.f32 %v17201_v51, %v17231_v46 }
 0x206   : > { %14244 = vmatpush3.msra.mxu1 %v16983_v45  ;;  %14258 = vmatpush3.msra.mxu0 %v17178_v49  ;;  %v17254_v50 = vadd.f32 %v4159_v25, %v16836_v32  ;;  %v17261_v45 = vsub.f32 %v7439_v23, %v17222_v2  ;;  %v17268_v32 = vsub.f32 %v7450_v8, %v17233_v59  ;;  %v17276_v23 = vand.u32 4294901760, %v17242_v56 }
 0x207   : > { %14223 = vmatmul.mubr.f32.gmra.mxu1 %v18932_v22  ;;  %14245 = vmatprep.subr.mxu1 %v17007_v47  ;;  %v17278_v22 = vpop.f32.mrf.mxu1  ;;  %v7598_v8 = vsub.f32 %v17218_v15, %v17249_v42  ;;  %v7592_v44 = vand.u32 4294901760, %v7591_v5 }
 0x208   : > { %14259 = vmatprep.subr.mxu0 %v17187_v12  ;;  %14238 = vmatprep.mubr.f32.mxu0 %v17038_v6  ;;  %v13792_v25 = vpop.f32.mrf.mxu0  ;;  %18933 = vst [vmem:[#allocation70_spill] sm:$0xff] %v17278_v22  ;;  %v7538_v22 = vsub.f32 %v17225_v48, %v18935_v63  ;;  %v17298_v7 = vand.u32 4294901760, %v17261_v45  ;;  %v7605_v63 = vsub.f32 %v17242_v56, %v17276_v23 }
 0x209   : > { %14246 = vmatpush3.msra.mxu1 %v17007_v47  ;;  %14260 = vmatpush3.msra.mxu0 %v17187_v12  ;;  %v17285_v47 = vsub.f32 %v7453_v36, %v17251_v20  ;;  %v17313_v36 = vand.u32 4294901760, %v17288_v39 }
 0x20a   : > { %14239 = vmatmul.mubr.f32.gmra.mxu0 %v17057_v40  ;;  %14247 = vmatprep.subr.mxu1 %v17023_v29  ;;  %v17290_v55 = vpop.f32.mrf.mxu0  ;;  %v7606_v21 = vand.u32 4294901760, %v7605_v63 }
 0x20b   : > { %18934 = vst [vmem:[#allocation71_spill] sm:$0xff] %v17290_v55  ;;  %14261 = vmatprep.subr.mxu0 %v17209_v58  ;;  %14248 = vmatpush3.msra.mxu1 %v17023_v29  ;;  %v13805_v3 = vpop.f32.mrf.mxu1  ;;  %v7529_v29 = vand.u32 4294901760, %v7528_v17  ;;  %v7599_v55 = vand.u32 4294901760, %v7598_v8 }
 0x20c   : > { %14262 = vmatpush3.msra.mxu0 %v17209_v58  ;;  %14249 = vmatprep.subr.mxu1 %v17052_v41  ;;  %v4403_v9 = vadd.f32 %v13805_v3, %v13789_v35  ;;  %v7612_v35 = vsub.f32 %v17261_v45, %v17298_v7 }
 0x20d   : > { %14263 = vmatprep.subr.mxu0 %v17222_v2  ;;  %14250 = vmatpush3.msra.mxu1 %v17052_v41  ;;  %v17307_v57 = vpop.f32.mrf.mxu1  ;;  %v7539_v41 = vand.u32 4294901760, %v7538_v22  ;;  %v18939_v22 = vand.u32 4294901760, %v17285_v47 }
 0x20e   : > { %18936 = vst [vmem:[#allocation72_spill] sm:$0xff] %v17307_v57  ;;  %14251 = vmatprep.mubr.f32.mxu1 %v16979_v11  ;;  %14264 = vmatpush3.msra.mxu0 %v17222_v2  ;;  %v13821_v3 = vpop.f32.mrf.mxu0  ;;  %v18937_v11 = vand.u32 4294901760, %v17268_v32 }
 0x20f   : > { %14252 = vmatmul.mubr.f32.vlgmr.msra.gmra.mxu1 %v16988_v10  ;;  %14265 = vmatprep.subr.mxu0 %v17246_v1  ;;  %v4504_v17 = vadd.f32 %v13821_v3, %v4403_v9  ;;  %v7558_v9 = vsub.f32 %v17285_v47, %v18939_v22  ;;  %v7619_v3 = vsub.f32 %v17288_v39, %v17313_v36 }
 0x210   : > { %14273 = vmatprep.subr.mxu1 %v7592_v44  ;;  %14266 = vmatpush3.msra.mxu0 %v17246_v1  ;;  %v7548_v8 = vsub.f32 %v17268_v32, %v18937_v11  ;;  %v17323_v5 = vpop.f32.mrf.mxu0  ;;  %v7613_v11 = vand.u32 4294901760, %v7612_v35  ;;  %v12212_v35 = vld [vmem:[%s15247_s28 + $0x30] sm:$0xff] }
 0x211   : > { %18938 = vst [vmem:[#allocation73_spill] sm:$0xff] %v17323_v5  ;;  %14274 = vmatpush3.msra.mxu1 %v7592_v44  ;;  %14267 = vmatprep.mubr.f32.mxu0 %v7529_v29  ;;  %v13808_v10 = vpop.f32.mrf.mxu1  ;;  %v7559_v22 = vand.u32 4294901760, %v7558_v9  ;;  %v7620_v5 = vand.u32 4294901760, %v7619_v3  ;;  %v8106_v3 = vsel %vm252_vm0, %v12212_v35, 0 }
 0x212   : > { %14275 = vmatprep.subr.mxu1 %v7599_v55  ;;  %14289 = vmatprep.subr.mxu0 %v17201_v51  ;;  %v4415_v57 = vadd.f32 %v13808_v10, %v13792_v25  ;;  %v7549_v44 = vand.u32 4294901760, %v7548_v8 }
 0x213   : > { %14254 = vmatprep.mubr.f32.mxu1 %v17038_v6  ;;  %14268 = vmatmul.mubr.f32.vlgmr.msra.gmra.mxu0 %v7539_v41  ;;  %v17336_v6 = vpop.f32.mrf.mxu1  ;;  %v8101_v41 = vld [vmem:[#allocation3 + $0x110] sm:$0xff] }
 0x214   : > { %14276 = vmatpush3.msra.mxu1 %v7599_v55  ;;  %14290 = vmatpush3.msra.mxu0 %v17201_v51  ;;  %v13824_v29 = vpop.f32.mrf.mxu0  ;;  %18940 = vst [vmem:[#allocation74_spill] sm:$0xff] %v17336_v6  ;;  %v17374_v9 = vand.u32 4294901760, %v8101_v41 }
 0x215   : > { %14255 = vmatmul.mubr.f32.gmra.mxu1 %v17057_v40  ;;  %14277 = vmatprep.subr.mxu1 %v7606_v21  ;;  %v4518_v63 = vadd.f32 %v13824_v29, %v4415_v57  ;;  %v8099_v29 = vld [vmem:[#allocation3 + $0x100] sm:$0xff] }
 0x216   : > { %14291 = vmatprep.subr.mxu0 %v17218_v15  ;;  %14278 = vmatpush3.msra.mxu1 %v7606_v21  ;;  %v17340_v40 = vpop.f32.mrf.mxu0 }
 0x217   : > { %14292 = vmatpush3.msra.mxu0 %v17218_v15  ;;  %14279 = vmatprep.subr.mxu1 %v7613_v11  ;;  %18941 = vst [vmem:[#allocation75_spill] sm:$0xff] %v17340_v40 }
 0x218   : > { %14293 = vmatprep.subr.mxu0 %v17242_v56  ;;  %14270 = vmatprep.mubr.f32.mxu0 %v7549_v44 }
 0x219   : > { %14280 = vmatpush3.msra.mxu1 %v7613_v11  ;;  %14294 = vmatpush3.msra.mxu0 %v17242_v56  ;;  %v13837_v55 = vpop.f32.mrf.mxu1 }
 0x21a   : > { %14271 = vmatmul.mubr.f32.gmra.mxu0 %v7559_v22  ;;  %14281 = vmatprep.subr.mxu1 %v7620_v5  ;;  %v4604_v57 = vadd.f32 %v13837_v55, %v4504_v17  ;;  %v17388_v55 = vand.u32 4294901760, %v8106_v3 }
 0x21b   : > { %14295 = vmatprep.subr.mxu0 %v17261_v45  ;;  %14282 = vmatpush3.msra.mxu1 %v7620_v5  ;;  %v17343_v21 = vpop.f32.mrf.mxu1  ;;  %v12211_v5 = vld [vmem:[%s15247_s28 + $0x20] sm:$0xff] }
 0x21c   : > { %18942 = vst [vmem:[#allocation76_spill] sm:$0xff] %v17343_v21  ;;  %14283 = vmatprep.mubr.f32.mxu1 %v17183_v60  ;;  %14296 = vmatpush3.msra.mxu0 %v17261_v45  ;;  %v13853_v51 = vpop.f32.mrf.mxu0  ;;  %v8103_v8 = vsel %vm252_vm0, %v12211_v5, 0  ;;  %v18948_v5 = vand.u32 4294901760, %v17225_v48 }
 0x21d   : > { %14284 = vmatmul.mubr.f32.vlgmr.msra.gmra.mxu1 %v17191_v14  ;;  %14297 = vmatprep.subr.mxu0 %v17288_v39  ;;  %v4712_v15 = vadd.f32 %v13853_v51, %v4604_v57  ;;  %v17379_v11 = vand.u32 4294901760, %v8103_v8 }
 0x21e   : > { %14305 = vmatprep.subr.mxu1 %v17178_v49  ;;  %14298 = vmatpush3.msra.mxu0 %v17288_v39  ;;  %v17351_v56 = vpop.f32.mrf.mxu0 }
 0x21f   : > { %18943 = vst [vmem:[#allocation77_spill] sm:$0xff] %v17351_v56  ;;  %14299 = vmatprep.mubr.f32.mxu0 %v17212_v18  ;;  %14306 = vmatpush3.msra.mxu1 %v17178_v49  ;;  %v13840_v25 = vpop.f32.mrf.mxu1  ;;  %v17409_v35 = vsub.f32 %v8103_v8, %v17379_v11  ;;  %v17423_v8 = vsub.f32 %v8106_v3, %v17388_v55 }
 0x220   : > { %14300 = vmatmul.mubr.f32.vlgmr.msra.gmra.mxu0 %v17225_v48  ;;  %14307 = vmatprep.subr.mxu1 %v17187_v12  ;;  %v4620_v45 = vadd.f32 %v13840_v25, %v4518_v63  ;;  %v12213_v63 = vld [vmem:[%s15247_s28 + $0x40] sm:$0xff]  ;;  %v8098_v25 = vld [vmem:[#allocation3 + $0xf8] sm:$0xff] }
 0x221   : > { %14321 = vmatprep.subr.mxu0 %v17231_v46  ;;  %14286 = vmatprep.mubr.f32.mxu1 %v17233_v59  ;;  %v17370_v10 = vpop.f32.mrf.mxu1  ;;  %v17420_v48 = vand.u32 4294901760, %v8098_v25 }
 0x222   : > { %14308 = vmatpush3.msra.mxu1 %v17187_v12  ;;  %14322 = vmatpush3.msra.mxu0 %v17231_v46  ;;  %v13856_v39 = vpop.f32.mrf.mxu0  ;;  %v8100_v46 = vld [vmem:[#allocation3 + $0x108] sm:$0xff]  ;;  %18944 = vst [vmem:[#allocation78_spill] sm:$0xff] %v17370_v10 }
 0x223   : > { %14287 = vmatmul.mubr.f32.gmra.mxu1 %v17251_v20  ;;  %14309 = vmatprep.subr.mxu1 %v17209_v58  ;;  %v4724_v17 = vadd.f32 %v13856_v39, %v4620_v45  ;;  %v17398_v45 = vsub.f32 %v8101_v41, %v17374_v9  ;;  %v17406_v39 = vand.u32 4294901760, %v8099_v29  ;;  %v237_v41 = vld [vmem:[%s15247_s28 + $0x58] sm:$0x3] }
 0x224   : > { %14323 = vmatprep.subr.mxu0 %v17249_v42  ;;  %14302 = vmatprep.mubr.f32.mxu0 %v17268_v32  ;;  %v17390_v57 = vpop.f32.mrf.mxu0 }
 0x225   : > { %14310 = vmatpush3.msra.mxu1 %v17209_v58  ;;  %14324 = vmatpush3.msra.mxu0 %v17249_v42  ;;  %v17383_v42 = vand.u32 4294901760, %v8100_v46  ;;  %18945 = vst [vmem:[#allocation79_spill] sm:$0xff] %v17390_v57  ;;  %v18834_v57 = vand.u32 4294901760, %v17409_v35 }
 0x226   : > { %14303 = vmatmul.mubr.f32.gmra.mxu0 %v17285_v47  ;;  %14311 = vmatprep.subr.mxu1 %v17222_v2 }
 0x227   : > { %14325 = vmatprep.subr.mxu0 %v17276_v23  ;;  %14312 = vmatpush3.msra.mxu1 %v17222_v2  ;;  %v13869_v44 = vpop.f32.mrf.mxu1 }
 0x228   : > { %14326 = vmatpush3.msra.mxu0 %v17276_v23  ;;  %14313 = vmatprep.subr.mxu1 %v17246_v1  ;;  %v4806_v22 = vadd.f32 %v13869_v44, %v4712_v15  ;;  %v18947_v23 = vand.u32 4294901760, %v17212_v18  ;;  %v8109_v18 = vsel %vm252_vm0, %v12213_v63, 0  ;;  %v8097_v44 = vld [vmem:[#allocation3 + $0xf0] sm:$0xff]  ;;  %v8112_v63 = vsel %vm252_vm0, %v17019_v37, 0 }
 0x229   : > { %14327 = vmatprep.subr.mxu0 %v17298_v7  ;;  %14314 = vmatpush3.msra.mxu1 %v17246_v1  ;;  %v17392_v51 = vpop.f32.mrf.mxu1  ;;  %v18950_v37 = vand.u32 4294901760, %v17268_v32 }
 0x22a   : > { %18946 = vst [vmem:[#allocation80_spill] sm:$0xff] %v17392_v51  ;;  %14315 = vmatprep.mubr.f32.mxu1 %v18947_v23  ;;  %14328 = vmatpush3.msra.mxu0 %v17298_v7  ;;  %v17401_v15 = vadd.f32 %v4806_v22, %v17002_v54  ;;  %v17415_v54 = vsub.f32 %v8100_v46, %v17383_v42  ;;  %v17435_v23 = vand.u32 4294901760, %v8109_v18 }
 0x22b   : > { %14316 = vmatmul.mubr.f32.vlgmr.msra.gmra.mxu1 %v18948_v5  ;;  %14329 = vmatprep.subr.mxu0 %v17313_v36  ;;  %v13885_v7 = vpop.f32.mrf.mxu0 }
 0x22c   : > { %14337 = vmatprep.subr.mxu1 %v17178_v49  ;;  %14330 = vmatpush3.msra.mxu0 %v17313_v36  ;;  %v14997_v36 = vld [vmem:[%s18824_s1 + $0x8] sm:$0x3] }
 0x22d   : > { %14331 = vmatprep.mubr.f32.mxu0 %v17183_v60  ;;  %14338 = vmatpush3.msra.mxu1 %v17178_v49  ;;  %v13872_v22 = vpop.f32.mrf.mxu1  ;;  %v251_v46 = vmul.f32 %v14997_v36, %v237_v41  ;;  %v17433_v49 = vand.u32 4294901760, %v17398_v45  ;;  %v17437_v5 = vpop.f32.mrf.mxu0  ;;  %v17444_v41 = vsub.f32 %v8099_v29, %v17406_v39  ;;  %v17449_v36 = vand.u32 4294901760, %v8097_v44 }
 0x22e   : > { %14332 = vmatmul.mubr.f32.vlgmr.msra.gmra.mxu0 %v17191_v14  ;;  %14339 = vmatprep.subr.mxu1 %v17187_v12  ;;  %v4818_v3 = vadd.f32 %v13872_v22, %v4724_v17  ;;  %18949 = vst [vmem:[#allocation81_spill] sm:$0xff] %v17437_v5  ;;  %v17452_v17 = vand.u32 4294901760, %v17415_v54  ;;  %v17454_v22 = vand.u32 4294901760, %v8112_v63 }
 0x22f   : > { %14353 = vmatprep.subr.mxu0 %v17374_v9  ;;  %14318 = vmatprep.mubr.f32.mxu1 %v18950_v37  ;;  %265 = vst.msk [vmem:[#allocation2 + $0x58] sm:$0x3] %vm254_vm1, %v251_v46  ;;  %v18951_v37 = vand.u32 4294901760, %v17285_v47  ;;  %v8250_v46 = vsub.f32 %v17398_v45, %v17433_v49  ;;  %v8187_v47 = vsub.f32 %v17409_v35, %v18834_v57  ;;  %v18954_v57 = vand.u32 4294901760, %v17423_v8 }
 0x230   : > { %14340 = vmatpush3.msra.mxu1 %v17187_v12  ;;  %14354 = vmatpush3.msra.mxu0 %v17374_v9  ;;  %v17457_v32 = vadd.f32 %v4818_v3, %v17060_v19  ;;  %v17464_v12 = vsub.f32 %v8098_v25, %v17420_v48  ;;  %v17471_v19 = vsub.f32 %v8109_v18, %v17435_v23  ;;  %v17479_v25 = vand.u32 4294901760, %v17444_v41 }
 0x231   : > { %14319 = vmatmul.mubr.f32.gmra.mxu1 %v18951_v37  ;;  %14341 = vmatprep.subr.mxu1 %v17209_v58  ;;  %v17481_v37 = vpop.f32.mrf.mxu1  ;;  %v8257_v18 = vsub.f32 %v17415_v54, %v17452_v17  ;;  %v17491_v29 = vsub.f32 %v8097_v44, %v17449_v36  ;;  %v8251_v44 = vand.u32 4294901760, %v8250_v46 }
 0x232   : > { %14355 = vmatprep.subr.mxu0 %v17383_v42  ;;  %14334 = vmatprep.mubr.f32.mxu0 %v17233_v59  ;;  %v13888_v3 = vpop.f32.mrf.mxu0  ;;  %18952 = vst [vmem:[#allocation82_spill] sm:$0xff] %v17481_v37  ;;  %v8197_v37 = vsub.f32 %v17423_v8, %v18954_v57  ;;  %v17501_v51 = vand.u32 4294901760, %v17464_v12  ;;  %v8264_v57 = vsub.f32 %v17444_v41, %v17479_v25 }
 0x233   : > { %14342 = vmatpush3.msra.mxu1 %v17209_v58  ;;  %14356 = vmatpush3.msra.mxu0 %v17383_v42  ;;  %v17488_v58 = vsub.f32 %v8112_v63, %v17454_v22  ;;  %v8258_v40 = vand.u32 4294901760, %v8257_v18  ;;  %v17516_v63 = vand.u32 4294901760, %v17491_v29 }
 0x234   : > { %14335 = vmatmul.mubr.f32.gmra.mxu0 %v17251_v20  ;;  %14343 = vmatprep.subr.mxu1 %v17222_v2  ;;  %v17493_v5 = vpop.f32.mrf.mxu0 }
 0x235   : > { %18953 = vst [vmem:[#allocation83_spill] sm:$0xff] %v17493_v5  ;;  %14357 = vmatprep.subr.mxu0 %v17406_v39  ;;  %14344 = vmatpush3.msra.mxu1 %v17222_v2  ;;  %v13901_v10 = vpop.f32.mrf.mxu1  ;;  %v8188_v2 = vand.u32 4294901760, %v8187_v47 }
 0x236   : > { %14358 = vmatpush3.msra.mxu0 %v17406_v39  ;;  %14345 = vmatprep.subr.mxu1 %v17246_v1  ;;  %v5052_v5 = vadd.f32 %v13901_v10, %v13885_v7  ;;  %v8271_v7 = vsub.f32 %v17464_v12, %v17501_v51 }
 0x237   : > { %14359 = vmatprep.subr.mxu0 %v17420_v48  ;;  %14346 = vmatpush3.msra.mxu1 %v17246_v1  ;;  %v17510_v56 = vpop.f32.mrf.mxu1  ;;  %v8198_v1 = vand.u32 4294901760, %v8197_v37  ;;  %v18958_v37 = vand.u32 4294901760, %v17488_v58 }
 0x238   : > { %18955 = vst [vmem:[#allocation84_spill] sm:$0xff] %v17510_v56  ;;  %14347 = vmatprep.mubr.f32.mxu1 %v17183_v60  ;;  %14360 = vmatpush3.msra.mxu0 %v17420_v48  ;;  %v13917_v10 = vpop.f32.mrf.mxu0  ;;  %v18956_v60 = vand.u32 4294901760, %v17471_v19  ;;  %v8265_v56 = vand.u32 4294901760, %v8264_v57 }
 0x239   : > { %14348 = vmatmul.mubr.f32.vlgmr.msra.gmra.mxu1 %v17191_v14  ;;  %14361 = vmatprep.subr.mxu0 %v17449_v36  ;;  %v5153_v47 = vadd.f32 %v13917_v10, %v5052_v5  ;;  %v8217_v5 = vsub.f32 %v17488_v58, %v18958_v37  ;;  %v8278_v10 = vsub.f32 %v17491_v29, %v17516_v63 }
 0x23a   : > { %14369 = vmatprep.subr.mxu1 %v8251_v44  ;;  %14362 = vmatpush3.msra.mxu0 %v17449_v36  ;;  %v8207_v18 = vsub.f32 %v17471_v19, %v18956_v60  ;;  %v17526_v46 = vpop.f32.mrf.mxu0  ;;  %v8272_v60 = vand.u32 4294901760, %v8271_v7  ;;  %v8093_v7 = vld [vmem:[#allocation2 + $0x30] sm:$0xff] }
 0x23b   : > { %18957 = vst [vmem:[#allocation85_spill] sm:$0xff] %v17526_v46  ;;  %14370 = vmatpush3.msra.mxu1 %v8251_v44  ;;  %14363 = vmatprep.mubr.f32.mxu0 %v8188_v2  ;;  %v13904_v14 = vpop.f32.mrf.mxu1  ;;  %v8218_v37 = vand.u32 4294901760, %v8217_v5  ;;  %v8279_v46 = vand.u32 4294901760, %v8278_v10  ;;  %v8755_v10 = vsel %vm252_vm0, %v8093_v7, 0 }
 0x23c   : > { %14371 = vmatprep.subr.mxu1 %v8258_v40  ;;  %14385 = vmatprep.subr.mxu0 %v17398_v45  ;;  %v5064_v21 = vadd.f32 %v13904_v14, %v13888_v3  ;;  %v8208_v44 = vand.u32 4294901760, %v8207_v18  ;;  %v8749_v14 = vld [vmem:[#allocation6 + $0x108] sm:$0xff] }
 0x23d   : > { %14350 = vmatprep.mubr.f32.mxu1 %v17233_v59  ;;  %14364 = vmatmul.mubr.f32.vlgmr.msra.gmra.mxu0 %v8198_v1  ;;  %v17539_v59 = vpop.f32.mrf.mxu1  ;;  %v8750_v1 = vld [vmem:[#allocation6 + $0x110] sm:$0xff] }
 0x23e   : > { %14372 = vmatpush3.msra.mxu1 %v8258_v40  ;;  %14386 = vmatpush3.msra.mxu0 %v17398_v45  ;;  %v13920_v2 = vpop.f32.mrf.mxu0  ;;  %18959 = vst [vmem:[#allocation86_spill] sm:$0xff] %v17539_v59  ;;  %v17575_v5 = vand.u32 4294901760, %v8750_v1 }
 0x23f   : > { %14351 = vmatmul.mubr.f32.gmra.mxu1 %v17251_v20  ;;  %14373 = vmatprep.subr.mxu1 %v8265_v56  ;;  %v5167_v57 = vadd.f32 %v13920_v2, %v5064_v21  ;;  %v8748_v2 = vld [vmem:[#allocation6 + $0x100] sm:$0xff] }
 0x240   : > { %14387 = vmatprep.subr.mxu0 %v17415_v54  ;;  %14374 = vmatpush3.msra.mxu1 %v8265_v56  ;;  %v17543_v20 = vpop.f32.mrf.mxu0  ;;  %v17606_v7 = vand.u32 4294901760, %v8748_v2 }
 0x241   : > { %14388 = vmatpush3.msra.mxu0 %v17415_v54  ;;  %14375 = vmatprep.subr.mxu1 %v8272_v60  ;;  %18960 = vst [vmem:[#allocation87_spill] sm:$0xff] %v17543_v20 }
 0x242   : > { %14389 = vmatprep.subr.mxu0 %v17444_v41  ;;  %14366 = vmatprep.mubr.f32.mxu0 %v8208_v44 }
 0x243   : > { %14376 = vmatpush3.msra.mxu1 %v8272_v60  ;;  %14390 = vmatpush3.msra.mxu0 %v17444_v41  ;;  %v13933_v40 = vpop.f32.mrf.mxu1 }
 0x244   : > { %14367 = vmatmul.mubr.f32.gmra.mxu0 %v8218_v37  ;;  %14377 = vmatprep.subr.mxu1 %v8279_v46  ;;  %v5253_v21 = vadd.f32 %v13933_v40, %v5153_v47  ;;  %v17588_v40 = vand.u32 4294901760, %v8755_v10 }
 0x245   : > { %14391 = vmatprep.subr.mxu0 %v17464_v12  ;;  %14378 = vmatpush3.msra.mxu1 %v8279_v46  ;;  %v17546_v56 = vpop.f32.mrf.mxu1  ;;  %v8092_v46 = vld [vmem:[#allocation2 + $0x20] sm:$0xff] }
 0x246   : > { %18961 = vst [vmem:[#allocation88_spill] sm:$0xff] %v17546_v56  ;;  %14379 = vmatprep.mubr.f32.mxu1 %v17379_v11  ;;  %14392 = vmatpush3.msra.mxu0 %v17464_v12  ;;  %v13949_v45 = vpop.f32.mrf.mxu0  ;;  %v8752_v18 = vsel %vm252_vm0, %v8092_v46, 0 }
 0x247   : > { %14380 = vmatmul.mubr.f32.vlgmr.msra.gmra.mxu1 %v17388_v55  ;;  %14393 = vmatprep.subr.mxu0 %v17491_v29  ;;  %v5361_v54 = vadd.f32 %v13949_v45, %v5253_v21  ;;  %v17580_v60 = vand.u32 4294901760, %v8752_v18 }
 0x248   : > { %14401 = vmatprep.subr.mxu1 %v17374_v9  ;;  %14394 = vmatpush3.msra.mxu0 %v17491_v29  ;;  %v17554_v41 = vpop.f32.mrf.mxu0 }
 0x249   : > { %18962 = vst [vmem:[#allocation89_spill] sm:$0xff] %v17554_v41  ;;  %14395 = vmatprep.mubr.f32.mxu0 %v17409_v35  ;;  %14402 = vmatpush3.msra.mxu1 %v17374_v9  ;;  %v13936_v3 = vpop.f32.mrf.mxu1 }
 0x24a   : > { %14396 = vmatmul.mubr.f32.vlgmr.msra.gmra.mxu0 %v17423_v8  ;;  %14403 = vmatprep.subr.mxu1 %v17383_v42  ;;  %v5269_v12 = vadd.f32 %v13936_v3, %v5167_v57  ;;  %v8094_v57 = vld [vmem:[#allocation2 + $0x40] sm:$0xff]  ;;  %v18966_v3 = vand.u32 4294901760, %v17409_v35  ;;  %v17609_v35 = vsub.f32 %v8752_v18, %v17580_v60  ;;  %v17622_v18 = vsub.f32 %v8755_v10, %v17588_v40 }
 0x24b   : > { %14417 = vmatprep.subr.mxu0 %v17433_v49  ;;  %14382 = vmatprep.mubr.f32.mxu1 %v17435_v23  ;;  %v18968_v10 = vand.u32 4294901760, %v17471_v19 }
 0x24c   : > { %14404 = vmatpush3.msra.mxu1 %v17383_v42  ;;  %14418 = vmatpush3.msra.mxu0 %v17433_v49  ;;  %v13952_v29 = vpop.f32.mrf.mxu0  ;;  %v17571_v49 = vpop.f32.mrf.mxu1 }
 0x24d   : > { %14383 = vmatmul.mubr.f32.gmra.mxu1 %v17454_v22  ;;  %14405 = vmatprep.subr.mxu1 %v17406_v39  ;;  %v5373_v47 = vadd.f32 %v13952_v29, %v5269_v12  ;;  %18963 = vst [vmem:[#allocation90_spill] sm:$0xff] %v17571_v49  ;;  %v17598_v12 = vsub.f32 %v8750_v1, %v17575_v5  ;;  %v18967_v29 = vand.u32 4294901760, %v17423_v8  ;;  %v8746_v1 = vld [vmem:[#allocation6 + $0xf0] sm:$0xff] }
 0x24e   : > { %14419 = vmatprep.subr.mxu0 %v17452_v17  ;;  %14398 = vmatprep.mubr.f32.mxu0 %v17471_v19  ;;  %v17590_v21 = vpop.f32.mrf.mxu0  ;;  %v18969_v19 = vand.u32 4294901760, %v17488_v58 }
 0x24f   : > { %14406 = vmatpush3.msra.mxu1 %v17406_v39  ;;  %14420 = vmatpush3.msra.mxu0 %v17452_v17  ;;  %v17584_v17 = vand.u32 4294901760, %v8749_v14  ;;  %18964 = vst [vmem:[#allocation91_spill] sm:$0xff] %v17590_v21  ;;  %v17643_v21 = vand.u32 4294901760, %v8746_v1 }
 0x250   : > { %14399 = vmatmul.mubr.f32.gmra.mxu0 %v17488_v58  ;;  %14407 = vmatprep.subr.mxu1 %v17420_v48 }
 0x251   : > { %14421 = vmatprep.subr.mxu0 %v17479_v25  ;;  %14408 = vmatpush3.msra.mxu1 %v17420_v48  ;;  %v13965_v44 = vpop.f32.mrf.mxu1 }
 0x252   : > { %14422 = vmatpush3.msra.mxu0 %v17479_v25  ;;  %14409 = vmatprep.subr.mxu1 %v17449_v36  ;;  %v5455_v37 = vadd.f32 %v13965_v44, %v5361_v54  ;;  %v8747_v25 = vld [vmem:[#allocation6 + $0xf8] sm:$0xff]  ;;  %v8095_v54 = vld [vmem:[#allocation2 + $0x50] sm:$0xff] }
 0x253   : > { %14423 = vmatprep.subr.mxu0 %v17501_v51  ;;  %14410 = vmatpush3.msra.mxu1 %v17449_v36  ;;  %v17592_v45 = vpop.f32.mrf.mxu1  ;;  %v17619_v8 = vand.u32 4294901760, %v8747_v25 }
 0x254   : > { %18965 = vst [vmem:[#allocation92_spill] sm:$0xff] %v17592_v45  ;;  %14411 = vmatprep.mubr.f32.mxu1 %v18966_v3  ;;  %14424 = vmatpush3.msra.mxu0 %v17501_v51  ;;  %v17601_v46 = vadd.f32 %v5455_v37, %v17204_v26  ;;  %v8758_v51 = vsel %vm252_vm0, %v8094_v57, 0  ;;  %v17615_v26 = vsub.f32 %v8749_v14, %v17584_v17  ;;  %v8761_v57 = vsel %vm252_vm0, %v8095_v54, 0 }
 0x255   : > { %14412 = vmatmul.mubr.f32.vlgmr.msra.gmra.mxu1 %v18967_v29  ;;  %14425 = vmatprep.subr.mxu0 %v17516_v63  ;;  %v13981_v44 = vpop.f32.mrf.mxu0  ;;  %v17630_v14 = vand.u32 4294901760, %v8758_v51  ;;  %v18835_v54 = vand.u32 4294901760, %v17609_v35  ;;  %v17639_v29 = vsub.f32 %v8748_v2, %v17606_v7  ;;  %v17685_v2 = vsub.f32 %v8746_v1, %v17643_v21 }
 0x256   : > { %14433 = vmatprep.subr.mxu1 %v17374_v9  ;;  %14426 = vmatpush3.msra.mxu0 %v17516_v63  ;;  %v17628_v63 = vand.u32 4294901760, %v17598_v12 }
 0x257   : > { %14427 = vmatprep.mubr.f32.mxu0 %v17379_v11  ;;  %14434 = vmatpush3.msra.mxu1 %v17374_v9  ;;  %v13968_v37 = vpop.f32.mrf.mxu1  ;;  %v17632_v9 = vpop.f32.mrf.mxu0  ;;  %v8836_v58 = vsub.f32 %v17609_v35, %v18835_v54  ;;  %v18971_v54 = vand.u32 4294901760, %v17622_v18 }
 0x258   : > { %14428 = vmatmul.mubr.f32.vlgmr.msra.gmra.mxu0 %v17388_v55  ;;  %14435 = vmatprep.subr.mxu1 %v17383_v42  ;;  %v5467_v3 = vadd.f32 %v13968_v37, %v5373_v47  ;;  %v17646_v47 = vand.u32 4294901760, %v17615_v26  ;;  %v17648_v37 = vand.u32 4294901760, %v8761_v57 }
 0x259   : > { %14449 = vmatprep.subr.mxu0 %v17575_v5  ;;  %14414 = vmatprep.mubr.f32.mxu1 %v18968_v10  ;;  %v8899_v10 = vsub.f32 %v17598_v12, %v17628_v63 }
 0x25a   : > { %14436 = vmatpush3.msra.mxu1 %v17383_v42  ;;  %14450 = vmatpush3.msra.mxu0 %v17575_v5  ;;  %v17651_v45 = vadd.f32 %v5467_v3, %v17254_v50  ;;  %v17658_v42 = vsub.f32 %v8747_v25, %v17619_v8  ;;  %v17665_v50 = vsub.f32 %v8758_v51, %v17630_v14  ;;  %v17673_v25 = vand.u32 4294901760, %v17639_v29 }
 0x25b   : > { %14415 = vmatmul.mubr.f32.gmra.mxu1 %v18969_v19  ;;  %14437 = vmatprep.subr.mxu1 %v17406_v39  ;;  %v17675_v19 = vpop.f32.mrf.mxu1  ;;  %v8906_v51 = vsub.f32 %v17615_v26, %v17646_v47  ;;  %v8900_v1 = vand.u32 4294901760, %v8899_v10  ;;  %v17708_v10 = vand.u32 4294901760, %v17685_v2 }
 0x25c   : > { %14451 = vmatprep.subr.mxu0 %v17584_v17  ;;  %14430 = vmatprep.mubr.f32.mxu0 %v17435_v23  ;;  %v13984_v3 = vpop.f32.mrf.mxu0  ;;  %18970 = vst [vmem:[#allocation93_spill] sm:$0xff] %v17675_v19  ;;  %v8846_v19 = vsub.f32 %v17622_v18, %v18971_v54  ;;  %v17695_v41 = vand.u32 4294901760, %v17658_v42  ;;  %v8913_v54 = vsub.f32 %v17639_v29, %v17673_v25 }
 0x25d   : > { %14438 = vmatpush3.msra.mxu1 %v17406_v39  ;;  %14452 = vmatpush3.msra.mxu0 %v17584_v17  ;;  %v17682_v39 = vsub.f32 %v8761_v57, %v17648_v37  ;;  %v18836_v57 = vand.u32 4294901760, %v17665_v50  ;;  %v8907_v6 = vand.u32 4294901760, %v8906_v51 }
 0x25e   : > { %14431 = vmatmul.mubr.f32.gmra.mxu0 %v17454_v22  ;;  %14439 = vmatprep.subr.mxu1 %v17420_v48  ;;  %v17687_v49 = vpop.f32.mrf.mxu0  ;;  %v8914_v30 = vand.u32 4294901760, %v8913_v54 }
 0x25f   : > { %14453 = vmatprep.subr.mxu0 %v17606_v7  ;;  %14440 = vmatpush3.msra.mxu1 %v17420_v48  ;;  %v13997_v20 = vpop.f32.mrf.mxu1  ;;  %v8837_v48 = vand.u32 4294901760, %v8836_v58 }
 0x260   : > { %14454 = vmatpush3.msra.mxu0 %v17606_v7  ;;  %14441 = vmatprep.subr.mxu1 %v17449_v36  ;;  %v5709_v56 = vadd.f32 %v13997_v20, %v13981_v44  ;;  %v8920_v44 = vsub.f32 %v17658_v42, %v17695_v41 }
 0x261   : > { %14455 = vmatprep.subr.mxu0 %v17619_v8  ;;  %14442 = vmatpush3.msra.mxu1 %v17449_v36  ;;  %v5702_v59 = vpop.f32.mrf.mxu1  ;;  %v8847_v36 = vand.u32 4294901760, %v8846_v19 }
 0x262   : > { %14443 = vmatprep.mubr.f32.mxu1 %v17379_v11  ;;  %14456 = vmatpush3.msra.mxu0 %v17619_v8  ;;  %v14013_v20 = vpop.f32.mrf.mxu0  ;;  %v8856_v11 = vsub.f32 %v17665_v50, %v18836_v57  ;;  %v8921_v57 = vand.u32 4294901760, %v8920_v44 }
 0x263   : > { %14444 = vmatmul.mubr.f32.vlgmr.msra.gmra.mxu1 %v17388_v55  ;;  %14457 = vmatprep.subr.mxu0 %v17643_v21  ;;  %v5810_v58 = vadd.f32 %v14013_v20, %v5709_v56  ;;  %v18972_v55 = vand.u32 4294901760, %v17682_v39  ;;  %v8927_v56 = vsub.f32 %v17685_v2, %v17708_v10 }
 0x264   : > { %14465 = vmatprep.subr.mxu1 %v8900_v1  ;;  %14458 = vmatpush3.msra.mxu0 %v17643_v21  ;;  %v5802_v51 = vpop.f32.mrf.mxu0 }
 0x265   : > { %14466 = vmatpush3.msra.mxu1 %v8900_v1  ;;  %14459 = vmatprep.mubr.f32.mxu0 %v8837_v48  ;;  %v14000_v27 = vpop.f32.mrf.mxu1  ;;  %v8866_v19 = vsub.f32 %v17682_v39, %v18972_v55  ;;  %v8857_v1 = vand.u32 4294901760, %v8856_v11  ;;  %v8928_v28 = vand.u32 4294901760, %v8927_v56 }
 0x266   : > { %14467 = vmatprep.subr.mxu1 %v8907_v6  ;;  %14481 = vmatprep.subr.mxu0 %v17598_v12  ;;  %v5721_v20 = vadd.f32 %v14000_v27, %v13984_v3 }
 0x267   : > { %14446 = vmatprep.mubr.f32.mxu1 %v17435_v23  ;;  %14460 = vmatmul.mubr.f32.vlgmr.msra.gmra.mxu0 %v8847_v36  ;;  %v8867_v55 = vand.u32 4294901760, %v8866_v19  ;;  %v5714_v27 = vpop.f32.mrf.mxu1  ;;  %v12216_v36 = vld [vmem:[%s15247_s28 + $0x31] sm:$0xff] }
 0x268   : > { %14468 = vmatpush3.msra.mxu1 %v8907_v6  ;;  %14482 = vmatpush3.msra.mxu0 %v17598_v12  ;;  %v14016_v48 = vpop.f32.mrf.mxu0  ;;  %v5715_v19 = vadd.f32 %v5714_v27, %v17687_v49 }
 0x269   : > { %14447 = vmatmul.mubr.f32.gmra.mxu1 %v17454_v22  ;;  %14469 = vmatprep.subr.mxu1 %v8914_v30  ;;  %v5824_v54 = vadd.f32 %v14016_v48, %v5721_v20  ;;  %v9412_v20 = vsel %vm252_vm0, %v12216_v36, 0 }
 0x26a   : > { %14483 = vmatprep.subr.mxu0 %v17615_v26  ;;  %14470 = vmatpush3.msra.mxu1 %v8914_v30  ;;  %v5816_v23 = vpop.f32.mrf.mxu0 }
 0x26b   : > { %14484 = vmatpush3.msra.mxu0 %v17615_v26  ;;  %14471 = vmatprep.subr.mxu1 %v8921_v57 }
 0x26c   : > { %14485 = vmatprep.subr.mxu0 %v17639_v29  ;;  %14462 = vmatprep.mubr.f32.mxu0 %v8857_v1 }
 0x26d   : > { %14472 = vmatpush3.msra.mxu1 %v8921_v57  ;;  %14486 = vmatpush3.msra.mxu0 %v17639_v29  ;;  %v14029_v6 = vpop.f32.mrf.mxu1  ;;  %v5703_v29 = vadd.f32 %v5702_v59, %v17632_v9  ;;  %v12215_v57 = vld [vmem:[%s15247_s28 + $0x21] sm:$0xff]  ;;  %v9407_v59 = vld [vmem:[#allocation3 + $0x138] sm:$0xff] }
 0x26e   : > { %14463 = vmatmul.mubr.f32.gmra.mxu0 %v8867_v55  ;;  %14473 = vmatprep.subr.mxu1 %v8928_v28  ;;  %v5910_v22 = vadd.f32 %v14029_v6, %v5810_v58  ;;  %v9406_v58 = vld [vmem:[#allocation3 + $0x130] sm:$0xff]  ;;  %v9409_v11 = vsel %vm252_vm0, %v12215_v57, 0  ;;  %v5817_v55 = vadd.f32 %v5816_v23, %v5715_v19  ;;  %v18974_v57 = vand.u32 4294901760, %v17622_v18 }
 0x26f   : > { %14487 = vmatprep.subr.mxu0 %v17658_v42  ;;  %14474 = vmatpush3.msra.mxu1 %v8928_v28  ;;  %v5901_v30 = vpop.f32.mrf.mxu1  ;;  %v5803_v9 = vadd.f32 %v5802_v51, %v5703_v29  ;;  %v17764_v49 = vand.u32 4294901760, %v9406_v58  ;;  %v17766_v1 = vand.u32 4294901760, %v9409_v11  ;;  %v12218_v23 = vld [vmem:[%s15247_s28 + $0x51] sm:$0xff] }
 0x270   : > { %14475 = vmatprep.mubr.f32.mxu1 %v17580_v60  ;;  %14488 = vmatpush3.msra.mxu0 %v17658_v42  ;;  %v14045_v12 = vpop.f32.mrf.mxu0 }
 0x271   : > { %14476 = vmatmul.mubr.f32.vlgmr.msra.gmra.mxu1 %v17588_v40  ;;  %14489 = vmatprep.subr.mxu0 %v17685_v2  ;;  %v6018_v26 = vadd.f32 %v14045_v12, %v5910_v22  ;;  %v5902_v56 = vadd.f32 %v5901_v30, %v5803_v9  ;;  %v17776_v30 = vand.u32 4294901760, %v9412_v20 }
 0x272   : > { %14497 = vmatprep.subr.mxu1 %v17575_v5  ;;  %14490 = vmatpush3.msra.mxu0 %v17685_v2  ;;  %v6011_v3 = vpop.f32.mrf.mxu0 }
 0x273   : > { %14491 = vmatprep.mubr.f32.mxu0 %v17609_v35  ;;  %14498 = vmatpush3.msra.mxu1 %v17575_v5  ;;  %v14032_v28 = vpop.f32.mrf.mxu1  ;;  %v6012_v27 = vadd.f32 %v6011_v3, %v5902_v56  ;;  %v17806_v36 = vsub.f32 %v9412_v20, %v17776_v30  ;;  %v18975_v20 = vand.u32 4294901760, %v17665_v50 }
 0x274   : > { %14492 = vmatmul.mubr.f32.vlgmr.msra.gmra.mxu0 %v17622_v18  ;;  %14499 = vmatprep.subr.mxu1 %v17584_v17  ;;  %v5926_v42 = vadd.f32 %v14032_v28, %v5824_v54  ;;  %v12217_v54 = vld [vmem:[%s15247_s28 + $0x41] sm:$0xff]  ;;  %v9403_v18 = vld [vmem:[#allocation3 + $0x118] sm:$0xff] }
 0x275   : > { %14513 = vmatprep.subr.mxu0 %v17628_v63  ;;  %14478 = vmatprep.mubr.f32.mxu1 %v17630_v14  ;;  %v5917_v51 = vpop.f32.mrf.mxu1  ;;  %v9404_v28 = vld [vmem:[#allocation3 + $0x120] sm:$0xff]  ;;  %v9415_v9 = vsel %vm252_vm0, %v12217_v54, 0 }
 0x276   : > { %14500 = vmatpush3.msra.mxu1 %v17584_v17  ;;  %14514 = vmatpush3.msra.mxu0 %v17628_v63  ;;  %v14048_v2 = vpop.f32.mrf.mxu0  ;;  %v17757_v63 = vand.u32 4294901760, %v9407_v59  ;;  %v5918_v3 = vadd.f32 %v5917_v51, %v5817_v55 }
 0x277   : > { %14479 = vmatmul.mubr.f32.gmra.mxu1 %v17648_v37  ;;  %14501 = vmatprep.subr.mxu1 %v17606_v7  ;;  %v6030_v44 = vadd.f32 %v14048_v2, %v5926_v42 }
 0x278   : > { %14515 = vmatprep.subr.mxu0 %v17646_v47  ;;  %14494 = vmatprep.mubr.f32.mxu0 %v17665_v50  ;;  %v17774_v22 = vsub.f32 %v9407_v59, %v17757_v63  ;;  %v6023_v12 = vpop.f32.mrf.mxu0 }
 0x279   : > { %14502 = vmatpush3.msra.mxu1 %v17606_v7  ;;  %14516 = vmatpush3.msra.mxu0 %v17646_v47  ;;  %v9405_v47 = vld [vmem:[#allocation3 + $0x128] sm:$0xff]  ;;  %v6024_v56 = vadd.f32 %v6023_v12, %v5918_v3 }
 0x27a   : > { %14495 = vmatmul.mubr.f32.gmra.mxu0 %v17682_v39  ;;  %14503 = vmatprep.subr.mxu1 %v17619_v8  ;;  %v17790_v59 = vand.u32 4294901760, %v9405_v47  ;;  %v17812_v19 = vand.u32 4294901760, %v17774_v22 }
 0x27b   : > { %14517 = vmatprep.subr.mxu0 %v17673_v25  ;;  %14504 = vmatpush3.msra.mxu1 %v17619_v8  ;;  %v14061_v48 = vpop.f32.mrf.mxu1 }
 0x27c   : > { %14518 = vmatpush3.msra.mxu0 %v17673_v25  ;;  %14505 = vmatprep.subr.mxu1 %v17643_v21  ;;  %v6112_v6 = vadd.f32 %v14061_v48, %v6018_v26  ;;  %v18973_v25 = vand.u32 4294901760, %v17609_v35  ;;  %v17793_v35 = vsub.f32 %v9409_v11, %v17766_v1  ;;  %v17824_v55 = vsub.f32 %v9405_v47, %v17790_v59 }
 0x27d   : > { %14519 = vmatprep.subr.mxu0 %v17695_v41  ;;  %14506 = vmatpush3.msra.mxu1 %v17643_v21  ;;  %v6105_v29 = vpop.f32.mrf.mxu1  ;;  %v18837_v47 = vand.u32 4294901760, %v17806_v36 }
 0x27e   : > { %14507 = vmatprep.mubr.f32.mxu1 %v18973_v25  ;;  %14520 = vmatpush3.msra.mxu0 %v17695_v41  ;;  %v17783_v26 = vadd.f32 %v6112_v6, %v17401_v15  ;;  %v17785_v42 = vadd.f32 %v6105_v29, %v6012_v27  ;;  %v17796_v41 = vsub.f32 %v9406_v58, %v17764_v49  ;;  %v17803_v15 = vand.u32 4294901760, %v9404_v28 }
 0x27f   : > { %14508 = vmatmul.mubr.f32.vlgmr.msra.gmra.mxu1 %v18974_v57  ;;  %14521 = vmatprep.subr.mxu0 %v17708_v10  ;;  %v14077_v2 = vpop.f32.mrf.mxu0  ;;  %v9418_v58 = vsel %vm252_vm0, %v12218_v23, 0  ;;  %v18838_v48 = vand.u32 4294901760, %v17793_v35  ;;  %v18977_v29 = vand.u32 4294901760, %v17682_v39 }
 0x280   : > { %14529 = vmatprep.subr.mxu1 %v17575_v5  ;;  %14522 = vmatpush3.msra.mxu0 %v17708_v10  ;;  %v17814_v10 = vand.u32 4294901760, %v9415_v9  ;;  %v17821_v54 = vand.u32 4294901760, %v17796_v41  ;;  %v17830_v6 = vand.u32 4294901760, %v9418_v58 }
 0x281   : > { %14523 = vmatprep.mubr.f32.mxu0 %v17580_v60  ;;  %14530 = vmatpush3.msra.mxu1 %v17575_v5  ;;  %v14064_v11 = vpop.f32.mrf.mxu1  ;;  %v6225_v51 = vpop.f32.mrf.mxu0  ;;  %v9493_v39 = vsub.f32 %v17793_v35, %v18838_v48 }
 0x282   : > { %14524 = vmatmul.mubr.f32.vlgmr.msra.gmra.mxu0 %v17588_v40  ;;  %14531 = vmatprep.subr.mxu1 %v17584_v17  ;;  %v6124_v5 = vadd.f32 %v14064_v11, %v6030_v44  ;;  %v17828_v44 = vand.u32 4294901760, %v9403_v18  ;;  %v17849_v25 = vsub.f32 %v9415_v9, %v17814_v10  ;;  %v9563_v3 = vsub.f32 %v17796_v41, %v17821_v54 }
 0x283   : > { %14545 = vmatprep.subr.mxu0 %v17757_v63  ;;  %14510 = vmatprep.mubr.f32.mxu1 %v18975_v20  ;;  %v6117_v27 = vpop.f32.mrf.mxu1  ;;  %v17864_v57 = vsub.f32 %v9418_v58, %v17830_v6  ;;  %v9503_v11 = vsub.f32 %v17806_v36, %v18837_v47 }
 0x284   : > { %14532 = vmatpush3.msra.mxu1 %v17584_v17  ;;  %14546 = vmatpush3.msra.mxu0 %v17757_v63  ;;  %v17833_v50 = vadd.f32 %v6124_v5, %v17457_v32  ;;  %v17835_v12 = vadd.f32 %v6117_v27, %v6024_v56  ;;  %v17842_v17 = vsub.f32 %v9404_v28, %v17803_v15  ;;  %v17857_v28 = vand.u32 4294901760, %v17824_v55 }
 0x285   : > { %14511 = vmatmul.mubr.f32.gmra.mxu1 %v18977_v29  ;;  %14533 = vmatprep.subr.mxu1 %v17606_v7  ;;  %v9556_v32 = vsub.f32 %v17774_v22, %v17812_v19  ;;  %v9564_v47 = vand.u32 4294901760, %v9563_v3 }
 0x286   : > { %18976 = vst [vmem:[#allocation94_spill] sm:$0xff] %v17833_v50  ;;  %14547 = vmatprep.subr.mxu0 %v17764_v49  ;;  %14526 = vmatprep.mubr.f32.mxu0 %v17630_v14  ;;  %v14080_v23 = vpop.f32.mrf.mxu0  ;;  %v17875_v56 = vand.u32 4294901760, %v17842_v17  ;;  %v9570_v27 = vsub.f32 %v17824_v55, %v17857_v28 }
 0x287   : > { %14534 = vmatpush3.msra.mxu1 %v17606_v7  ;;  %14548 = vmatpush3.msra.mxu0 %v17764_v49  ;;  %v17867_v7 = vsub.f32 %v9403_v18, %v17828_v44  ;;  %v9557_v58 = vand.u32 4294901760, %v9556_v32 }
 0x288   : > { %14527 = vmatmul.mubr.f32.gmra.mxu0 %v17648_v37  ;;  %14535 = vmatprep.subr.mxu1 %v17619_v8  ;;  %v6245_v9 = vpop.f32.mrf.mxu0 }
 0x289   : > { %14549 = vmatprep.subr.mxu0 %v17790_v59  ;;  %14536 = vmatpush3.msra.mxu1 %v17619_v8  ;;  %v14093_v5 = vpop.f32.mrf.mxu1  ;;  %v9494_v8 = vand.u32 4294901760, %v9493_v39  ;;  %v17888_v32 = vand.u32 4294901760, %v17867_v7  ;;  %v9577_v39 = vsub.f32 %v17842_v17, %v17875_v56 }
 0x28a   : > { %14550 = vmatpush3.msra.mxu0 %v17790_v59  ;;  %14537 = vmatprep.subr.mxu1 %v17643_v21  ;;  %v6358_v20 = vadd.f32 %v14093_v5, %v14077_v2 }
 0x28b   : > { %14551 = vmatprep.subr.mxu0 %v17803_v15  ;;  %14538 = vmatpush3.msra.mxu1 %v17643_v21  ;;  %v6351_v29 = vpop.f32.mrf.mxu1  ;;  %v9504_v21 = vand.u32 4294901760, %v9503_v11  ;;  %v18979_v11 = vand.u32 4294901760, %v17864_v57 }
 0x28c   : > { %14539 = vmatprep.mubr.f32.mxu1 %v17580_v60  ;;  %14552 = vmatpush3.msra.mxu0 %v17803_v15  ;;  %v6352_v2 = vadd.f32 %v6351_v29, %v6225_v51  ;;  %v14109_v5 = vpop.f32.mrf.mxu0  ;;  %v18978_v60 = vand.u32 4294901760, %v17849_v25  ;;  %v9571_v51 = vand.u32 4294901760, %v9570_v27 }
 0x28d   : > { %14540 = vmatmul.mubr.f32.vlgmr.msra.gmra.mxu1 %v17588_v40  ;;  %14553 = vmatprep.subr.mxu0 %v17828_v44  ;;  %v6459_v18 = vadd.f32 %v14109_v5, %v6358_v20  ;;  %v9523_v20 = vsub.f32 %v17864_v57, %v18979_v11  ;;  %v9584_v5 = vsub.f32 %v17867_v7, %v17888_v32 }
 0x28e   : > { %14561 = vmatprep.subr.mxu1 %v9557_v58  ;;  %14554 = vmatpush3.msra.mxu0 %v17828_v44  ;;  %v9513_v3 = vsub.f32 %v17849_v25, %v18978_v60  ;;  %v6451_v48 = vpop.f32.mrf.mxu0  ;;  %v9578_v60 = vand.u32 4294901760, %v9577_v39  ;;  %v9398_v39 = vld [vmem:[#allocation2 + $0x21] sm:$0xff] }
 0x28f   : > { %14562 = vmatpush3.msra.mxu1 %v9557_v58  ;;  %14555 = vmatprep.mubr.f32.mxu0 %v9494_v8  ;;  %v14096_v29 = vpop.f32.mrf.mxu1  ;;  %v6452_v40 = vadd.f32 %v6451_v48, %v6352_v2  ;;  %v9524_v11 = vand.u32 4294901760, %v9523_v20  ;;  %v9399_v20 = vld [vmem:[#allocation2 + $0x31] sm:$0xff] }
 0x290   : > { %14563 = vmatprep.subr.mxu1 %v9564_v47  ;;  %14577 = vmatprep.subr.mxu0 %v17774_v22  ;;  %v6370_v50 = vadd.f32 %v14096_v29, %v14080_v23  ;;  %v9514_v48 = vand.u32 4294901760, %v9513_v3  ;;  %v9585_v23 = vand.u32 4294901760, %v9584_v5 }
 0x291   : > { %14542 = vmatprep.mubr.f32.mxu1 %v17630_v14  ;;  %14556 = vmatmul.mubr.f32.vlgmr.msra.gmra.mxu0 %v9504_v21  ;;  %v6363_v58 = vpop.f32.mrf.mxu1 }
 0x292   : > { %14564 = vmatpush3.msra.mxu1 %v9564_v47  ;;  %14578 = vmatpush3.msra.mxu0 %v17774_v22  ;;  %v6364_v8 = vadd.f32 %v6363_v58, %v6245_v9  ;;  %v14112_v27 = vpop.f32.mrf.mxu0  ;;  %v10058_v58 = vsel %vm252_vm0, %v9398_v39, 0 }
 0x293   : > { %14543 = vmatmul.mubr.f32.gmra.mxu1 %v17648_v37  ;;  %14565 = vmatprep.subr.mxu1 %v9571_v51  ;;  %v6473_v2 = vadd.f32 %v14112_v27, %v6370_v50  ;;  %v10061_v27 = vsel %vm252_vm0, %v9399_v20, 0  ;;  %v18982_v20 = vand.u32 4294901760, %v17849_v25 }
 0x294   : > { %14579 = vmatprep.subr.mxu0 %v17796_v41  ;;  %14566 = vmatpush3.msra.mxu1 %v9571_v51  ;;  %v6465_v29 = vpop.f32.mrf.mxu0 }
 0x295   : > { %14580 = vmatpush3.msra.mxu0 %v17796_v41  ;;  %14567 = vmatprep.subr.mxu1 %v9578_v60  ;;  %v6466_v14 = vadd.f32 %v6465_v29, %v6364_v8  ;;  %v9400_v29 = vld [vmem:[#allocation2 + $0x41] sm:$0xff] }
 0x296   : > { %14581 = vmatprep.subr.mxu0 %v17824_v55  ;;  %14558 = vmatprep.mubr.f32.mxu0 %v9514_v48  ;;  %v10064_v39 = vsel %vm252_vm0, %v9400_v29, 0 }
 0x297   : > { %14568 = vmatpush3.msra.mxu1 %v9578_v60  ;;  %14582 = vmatpush3.msra.mxu0 %v17824_v55  ;;  %v14125_v22 = vpop.f32.mrf.mxu1  ;;  %v10055_v60 = vld [vmem:[#allocation6 + $0x130] sm:$0xff] }
 0x298   : > { %14559 = vmatmul.mubr.f32.gmra.mxu0 %v9524_v11  ;;  %14569 = vmatprep.subr.mxu1 %v9585_v23  ;;  %v6559_v37 = vadd.f32 %v14125_v22, %v6459_v18  ;;  %v17942_v11 = vand.u32 4294901760, %v10058_v58  ;;  %v17948_v22 = vand.u32 4294901760, %v10061_v27 }
 0x299   : > { %14583 = vmatprep.subr.mxu0 %v17842_v17  ;;  %14570 = vmatpush3.msra.mxu1 %v9585_v23  ;;  %v6550_v50 = vpop.f32.mrf.mxu1 }
 0x29a   : > { %14571 = vmatprep.mubr.f32.mxu1 %v17766_v1  ;;  %14584 = vmatpush3.msra.mxu0 %v17842_v17  ;;  %v6551_v41 = vadd.f32 %v6550_v50, %v6452_v40  ;;  %v14141_v47 = vpop.f32.mrf.mxu0  ;;  %v10056_v40 = vld [vmem:[#allocation6 + $0x138] sm:$0xff]  ;;  %v18980_v50 = vand.u32 4294901760, %v17793_v35 }
 0x29b   : > { %14572 = vmatmul.mubr.f32.vlgmr.msra.gmra.mxu1 %v17776_v30  ;;  %14585 = vmatprep.subr.mxu0 %v17867_v7  ;;  %v6667_v9 = vadd.f32 %v14141_v47, %v6559_v37  ;;  %v17935_v8 = vand.u32 4294901760, %v10056_v40  ;;  %v9401_v47 = vld [vmem:[#allocation2 + $0x51] sm:$0xff] }
 0x29c   : > { %14593 = vmatprep.subr.mxu1 %v17757_v63  ;;  %14586 = vmatpush3.msra.mxu0 %v17867_v7  ;;  %v6660_v55 = vpop.f32.mrf.mxu0 }
 0x29d   : > { %14587 = vmatprep.mubr.f32.mxu0 %v17793_v35  ;;  %14594 = vmatpush3.msra.mxu1 %v17757_v63  ;;  %v14128_v18 = vpop.f32.mrf.mxu1  ;;  %v6661_v21 = vadd.f32 %v6660_v55, %v6551_v41  ;;  %v10053_v41 = vld [vmem:[#allocation6 + $0x120] sm:$0xff]  ;;  %v17967_v35 = vsub.f32 %v10058_v58, %v17942_v11 }
 0x29e   : > { %14588 = vmatmul.mubr.f32.vlgmr.msra.gmra.mxu0 %v17806_v36  ;;  %14595 = vmatprep.subr.mxu1 %v17764_v49  ;;  %v6575_v17 = vadd.f32 %v14128_v18, %v6473_v2  ;;  %v17940_v2 = vand.u32 4294901760, %v10055_v60  ;;  %v18981_v18 = vand.u32 4294901760, %v17806_v36  ;;  %v17979_v36 = vand.u32 4294901760, %v10053_v41 }
 0x29f   : > { %14609 = vmatprep.subr.mxu0 %v17812_v19  ;;  %14574 = vmatprep.mubr.f32.mxu1 %v17814_v10  ;;  %v6566_v3 = vpop.f32.mrf.mxu1 }
 0x2a0   : > { %14596 = vmatpush3.msra.mxu1 %v17764_v49  ;;  %14610 = vmatpush3.msra.mxu0 %v17812_v19  ;;  %v6567_v7 = vadd.f32 %v6566_v3, %v6466_v14  ;;  %v14144_v51 = vpop.f32.mrf.mxu0 }
 0x2a1   : > { %14575 = vmatmul.mubr.f32.gmra.mxu1 %v17830_v6  ;;  %14597 = vmatprep.subr.mxu1 %v17790_v59  ;;  %v6679_v5 = vadd.f32 %v14144_v51, %v6575_v17  ;;  %v10067_v51 = vsel %vm252_vm0, %v9401_v47, 0 }
 0x2a2   : > { %14611 = vmatprep.subr.mxu0 %v17821_v54  ;;  %14590 = vmatprep.mubr.f32.mxu0 %v17849_v25  ;;  %v6672_v48 = vpop.f32.mrf.mxu0 }
 0x2a3   : > { %14598 = vmatpush3.msra.mxu1 %v17790_v59  ;;  %14612 = vmatpush3.msra.mxu0 %v17821_v54  ;;  %v6673_v19 = vadd.f32 %v6672_v48, %v6567_v7  ;;  %v10054_v54 = vld [vmem:[#allocation6 + $0x128] sm:$0xff]  ;;  %v17982_v7 = vsub.f32 %v10061_v27, %v17948_v22 }
 0x2a4   : > { %14591 = vmatmul.mubr.f32.gmra.mxu0 %v17864_v57  ;;  %14599 = vmatprep.subr.mxu1 %v17803_v15  ;;  %v17964_v17 = vand.u32 4294901760, %v10054_v54 }
 0x2a5   : > { %14613 = vmatprep.subr.mxu0 %v17857_v28  ;;  %14600 = vmatpush3.msra.mxu1 %v17803_v15  ;;  %v14157_v23 = vpop.f32.mrf.mxu1 }
 0x2a6   : > { %14614 = vmatpush3.msra.mxu0 %v17857_v28  ;;  %14601 = vmatprep.subr.mxu1 %v17828_v44  ;;  %v6761_v14 = vadd.f32 %v14157_v23, %v6667_v9  ;;  %v17954_v28 = vsub.f32 %v10056_v40, %v17935_v8  ;;  %v18000_v48 = vsub.f32 %v10054_v54, %v17964_v17  ;;  %v18006_v23 = vand.u32 4294901760, %v10067_v51 }
 0x2a7   : > { %14615 = vmatprep.subr.mxu0 %v17875_v56  ;;  %14602 = vmatpush3.msra.mxu1 %v17828_v44  ;;  %v6754_v37 = vpop.f32.mrf.mxu1  ;;  %v18019_v54 = vsub.f32 %v10053_v41, %v17979_v36 }
 0x2a8   : > { %14603 = vmatprep.mubr.f32.mxu1 %v18980_v50  ;;  %14616 = vmatpush3.msra.mxu0 %v17875_v56  ;;  %v17957_v55 = vadd.f32 %v6761_v14, %v17601_v46  ;;  %v17959_v9 = vadd.f32 %v6754_v37, %v6661_v21  ;;  %v17970_v56 = vsub.f32 %v10055_v60, %v17940_v2  ;;  %v10052_v21 = vld [vmem:[#allocation6 + $0x118] sm:$0xff]  ;;  %v10141_v60 = vand.u32 4294901760, %v17967_v35 }
 0x2a9   : > { %14604 = vmatmul.mubr.f32.vlgmr.msra.gmra.mxu1 %v18981_v18  ;;  %14617 = vmatprep.subr.mxu0 %v17888_v32  ;;  %v14173_v3 = vpop.f32.mrf.mxu0  ;;  %v513_v46 = vadd.f32 %v16134_v16, %v16074_v38  ;;  %v17990_v38 = vand.u32 4294901760, %v10064_v39  ;;  %v18983_v37 = vand.u32 4294901760, %v17864_v57  ;;  %v525_v57 = vadd.f32 %v16163_v34, %v16125_v24 }
 0x2aa   : > { %14625 = vmatprep.subr.mxu1 %v17757_v63  ;;  %14618 = vmatpush3.msra.mxu0 %v17888_v32  ;;  %v17988_v32 = vand.u32 4294901760, %v17954_v28  ;;  %v17997_v58 = vand.u32 4294901760, %v17970_v56  ;;  %v10142_v41 = vsub.f32 %v17967_v35, %v10141_v60  ;;  %v18037_v47 = vand.u32 4294901760, %v18000_v48 }
 0x2ab   : > { %14619 = vmatprep.mubr.f32.mxu0 %v17766_v1  ;;  %14626 = vmatpush3.msra.mxu1 %v17757_v63  ;;  %v14160_v40 = vpop.f32.mrf.mxu1  ;;  %v6882_v63 = vpop.f32.mrf.mxu0  ;;  %v613_v14 = vadd.f32 %v16150_v43, %v513_v46  ;;  %v18044_v34 = vsub.f32 %v10067_v51, %v18006_v23 }
 0x2ac   : > { %14620 = vmatmul.mubr.f32.vlgmr.msra.gmra.mxu0 %v17776_v30  ;;  %14627 = vmatprep.subr.mxu1 %v17764_v49  ;;  %v6773_v16 = vadd.f32 %v14160_v40, %v6679_v5  ;;  %v18004_v5 = vand.u32 4294901760, %v10052_v21  ;;  %v10212_v24 = vsub.f32 %v17970_v56, %v17997_v58 }
 0x2ad   : > { %14641 = vmatprep.subr.mxu0 %v17935_v8  ;;  %14606 = vmatprep.mubr.f32.mxu1 %v18982_v20  ;;  %v6766_v27 = vpop.f32.mrf.mxu1  ;;  %v712_v50 = vadd.f32 %v16170_v13, %v613_v14  ;;  %v10143_v20 = vand.u32 4294901760, %v10142_v41 }
 0x2ae   : > { %14628 = vmatpush3.msra.mxu1 %v17764_v49  ;;  %14642 = vmatpush3.msra.mxu0 %v17935_v8  ;;  %v18009_v25 = vadd.f32 %v6773_v16, %v17651_v45  ;;  %v18011_v29 = vadd.f32 %v6766_v27, %v6673_v19  ;;  %v10151_v49 = vand.u32 4294901760, %v17982_v7  ;;  %v10205_v45 = vsub.f32 %v17954_v28, %v17988_v32 }
 0x2af   : > { %14607 = vmatmul.mubr.f32.gmra.mxu1 %v18983_v37  ;;  %14629 = vmatprep.subr.mxu1 %v17790_v59  ;;  %v18026_v19 = vsub.f32 %v10064_v39, %v17990_v38  ;;  %v18047_v13 = vsub.f32 %v10052_v21, %v18004_v5  ;;  %v18055_v39 = vand.u32 4294901760, %v18019_v54  ;;  %v627_v16 = vadd.f32 %v16167_v53, %v525_v57 }
 0x2b0   : > { %14643 = vmatprep.subr.mxu0 %v17940_v2  ;;  %14622 = vmatprep.mubr.f32.mxu0 %v17814_v10  ;;  %v14176_v43 = vpop.f32.mrf.mxu0  ;;  %v10152_v18 = vsub.f32 %v17982_v7, %v10151_v49  ;;  %v10206_v51 = vand.u32 4294901760, %v10205_v45  ;;  %v10219_v27 = vsub.f32 %v18000_v48, %v18037_v47  ;;  %v10213_v37 = vand.u32 4294901760, %v10212_v24 }
 0x2b1   : > { %14630 = vmatpush3.msra.mxu1 %v17790_v59  ;;  %14644 = vmatpush3.msra.mxu0 %v17940_v2  ;;  %v10161_v21 = vand.u32 4294901760, %v18026_v19  ;;  %v18070_v53 = vand.u32 4294901760, %v18047_v13  ;;  %v728_v57 = vadd.f32 %v16197_v62, %v627_v16 }
 0x2b2   : > { %14623 = vmatmul.mubr.f32.gmra.mxu0 %v17830_v6  ;;  %14631 = vmatprep.subr.mxu1 %v17803_v15  ;;  %v6902_v59 = vpop.f32.mrf.mxu0  ;;  %v10220_v62 = vand.u32 4294901760, %v10219_v27 }
 0x2b3   : > { %14645 = vmatprep.subr.mxu0 %v17964_v17  ;;  %14632 = vmatpush3.msra.mxu1 %v17803_v15  ;;  %v14189_v46 = vpop.f32.mrf.mxu1  ;;  %v822_v15 = vadd.f32 %v16178_v52, %v712_v50  ;;  %v10162_v41 = vsub.f32 %v18026_v19, %v10161_v21 }
 0x2b4   : > { %14646 = vmatpush3.msra.mxu0 %v17964_v17  ;;  %14633 = vmatprep.subr.mxu1 %v17828_v44  ;;  %v7015_v40 = vadd.f32 %v14189_v46, %v14173_v3  ;;  %v10171_v3 = vand.u32 4294901760, %v18044_v34 }
 0x2b5   : > { %14647 = vmatprep.subr.mxu0 %v17979_v36  ;;  %14634 = vmatpush3.msra.mxu1 %v17828_v44  ;;  %v7008_v14 = vpop.f32.mrf.mxu1  ;;  %v10153_v44 = vand.u32 4294901760, %v10152_v18  ;;  %v916_v24 = vadd.f32 %v16219_v4, %v822_v15  ;;  %v10163_v15 = vand.u32 4294901760, %v10162_v41  ;;  %v18988_v41 = vld [vmem:[#allocation12_spill] sm:$0xff] }
 0x2b6   : > { %14635 = vmatprep.mubr.f32.mxu1 %v17766_v1  ;;  %14648 = vmatpush3.msra.mxu0 %v17979_v36  ;;  %v7009_v52 = vadd.f32 %v7008_v14, %v6882_v63  ;;  %v14205_v45 = vpop.f32.mrf.mxu0  ;;  %v10226_v1 = vsub.f32 %v18019_v54, %v18055_v39  ;;  %v10172_v18 = vsub.f32 %v18044_v34, %v10171_v3 }
 0x2b7   : > { %14636 = vmatmul.mubr.f32.vlgmr.msra.gmra.mxu1 %v17776_v30  ;;  %14649 = vmatprep.subr.mxu0 %v18004_v5  ;;  %v7116_v50 = vadd.f32 %v14205_v45, %v7015_v40  ;;  %v10233_v40 = vsub.f32 %v18047_v13, %v18070_v53  ;;  %v834_v14 = vadd.f32 %v16213_v33, %v728_v57  ;;  %v18984_v33 = vld [vmem:[#allocation48_spill] sm:$0xff] }
 0x2b8   : > { %14657 = vmatprep.subr.mxu1 %v10206_v51  ;;  %14650 = vmatpush3.msra.mxu0 %v18004_v5  ;;  %v7108_v63 = vpop.f32.mrf.mxu0  ;;  %v10227_v4 = vand.u32 4294901760, %v10226_v1  ;;  %v18987_v1 = vld [vmem:[#allocation72_spill] sm:$0xff] }
 0x2b9   : > { %14658 = vmatpush3.msra.mxu1 %v10206_v51  ;;  %14651 = vmatprep.mubr.f32.mxu0 %v10143_v20  ;;  %v14192_v30 = vpop.f32.mrf.mxu1  ;;  %v7109_v46 = vadd.f32 %v7108_v63, %v7009_v52  ;;  %v1026_v52 = vadd.f32 %v16241_v0, %v916_v24  ;;  %v928_v45 = vadd.f32 %v16302_v31, %v834_v14  ;;  %v10234_v57 = vand.u32 4294901760, %v10233_v40  ;;  %v18986_v31 = vld [vmem:[#allocation69_spill] sm:$0xff]  ;;  %v18991_v40 = vld [vmem:[#allocation15_spill] sm:$0xff] }
 0x2ba   : > { %14659 = vmatprep.subr.mxu1 %v10213_v37  ;;  %14673 = vmatprep.subr.mxu0 %v17954_v28  ;;  %v7027_v16 = vadd.f32 %v14192_v30, %v14176_v43  ;;  %v18989_v24 = vld [vmem:[#allocation49_spill] sm:$0xff]  ;;  %v18992_v14 = vld [vmem:[#allocation47_spill] sm:$0xff] }
 0x2bb   : > { %14638 = vmatprep.mubr.f32.mxu1 %v17814_v10  ;;  %14652 = vmatmul.mubr.f32.vlgmr.msra.gmra.mxu0 %v10153_v44  ;;  %v7020_v51 = vpop.f32.mrf.mxu1  ;;  %v3089_v10 = vadd.f32 %v18984_v33, %v16838_v61  ;;  %v18985_v44 = vld [vmem:[#allocation13_spill] sm:$0xff]  ;;  %v1046_v61 = vadd.f32 %v18988_v41, %v928_v45 }
 0x2bc   : > { %14660 = vmatpush3.msra.mxu1 %v10213_v37  ;;  %14674 = vmatpush3.msra.mxu0 %v17954_v28  ;;  %v7021_v20 = vadd.f32 %v7020_v51, %v6902_v59  ;;  %v14208_v27 = vpop.f32.mrf.mxu0  ;;  %v10173_v37 = vand.u32 4294901760, %v10172_v18  ;;  %v1152_v59 = vadd.f32 %v18985_v44, %v1026_v52  ;;  %v18993_v51 = vld [vmem:[#allocation50_spill] sm:$0xff]  ;;  %v18996_v33 = vld [vmem:[#allocation17_spill] sm:$0xff] }
 0x2bd   : > { %14639 = vmatmul.mubr.f32.gmra.mxu1 %v17830_v6  ;;  %14661 = vmatprep.subr.mxu1 %v10220_v62  ;;  %v7130_v43 = vadd.f32 %v14208_v27, %v7027_v16  ;;  %v4397_v6 = vadd.f32 %v18987_v1, %v18986_v31  ;;  %v1164_v16 = vadd.f32 %v18991_v40, %v1046_v61  ;;  %v19001_v61 = vld [vmem:[#allocation16_spill] sm:$0xff] }
 0x2be   : > { %14675 = vmatprep.subr.mxu0 %v17970_v56  ;;  %14662 = vmatpush3.msra.mxu1 %v10220_v62  ;;  %v7122_v28 = vpop.f32.mrf.mxu0  ;;  %v3189_v62 = vadd.f32 %v18989_v24, %v3089_v10  ;;  %v19002_v24 = vld [vmem:[#allocation53_spill] sm:$0xff] }
 0x2bf   : > { %14676 = vmatpush3.msra.mxu0 %v17970_v56  ;;  %14663 = vmatprep.subr.mxu1 %v10227_v4  ;;  %v7123_v0 = vadd.f32 %v7122_v28, %v7021_v20  ;;  %v18990_v56 = vld [vmem:[#allocation14_spill] sm:$0xff]  ;;  %v3101_v20 = vadd.f32 %v18993_v51, %v18992_v14  ;;  %v19005_v14 = vld [vmem:[#allocation75_spill] sm:$0xff] }
 0x2c0   : > { %14677 = vmatprep.subr.mxu0 %v18000_v48  ;;  %14654 = vmatprep.mubr.f32.mxu0 %v10163_v15  ;;  %v1252_v18 = vadd.f32 %v18990_v56, %v1152_v59  ;;  %v18998_v28 = vld [vmem:[#allocation74_spill] sm:$0xff]  ;;  %v18999_v59 = vld [vmem:[#allocation76_spill] sm:$0xff] }
 0x2c1   : > { %14664 = vmatpush3.msra.mxu1 %v10227_v4  ;;  %14678 = vmatpush3.msra.mxu0 %v18000_v48  ;;  %v14221_v63 = vpop.f32.mrf.mxu1  ;;  %v18994_v4 = vld [vmem:[#allocation52_spill] sm:$0xff]  ;;  %v18995_v48 = vld [vmem:[#allocation73_spill] sm:$0xff] }
 0x2c2   : > { %14655 = vmatmul.mubr.f32.gmra.mxu0 %v10173_v37  ;;  %14665 = vmatprep.subr.mxu1 %v10234_v57  ;;  %v7216_v30 = vadd.f32 %v14221_v63, %v7116_v50  ;;  %v3288_v27 = vadd.f32 %v18994_v4, %v3189_v62  ;;  %v4497_v52 = vadd.f32 %v18995_v48, %v4397_v6  ;;  %v18997_v37 = vld [vmem:[#allocation71_spill] sm:$0xff] }
 0x2c3   : > { %14679 = vmatprep.subr.mxu0 %v18019_v54  ;;  %14666 = vmatpush3.msra.mxu1 %v10234_v57  ;;  %v7207_v15 = vpop.f32.mrf.mxu1  ;;  %v1351_v10 = vadd.f32 %v18996_v33, %v1252_v18  ;;  %v4409_v44 = vadd.f32 %v18998_v28, %v18997_v37  ;;  %v1266_v63 = vadd.f32 %v19001_v61, %v1164_v16  ;;  %v19004_v18 = vld [vmem:[#allocation54_spill] sm:$0xff]  ;;  %v12220_v28 = vld [vmem:[%s15247_s28 + $0x32] sm:$0xff] }
 0x2c4   : > { %14667 = vmatprep.mubr.f32.mxu1 %v17942_v11  ;;  %14680 = vmatpush3.msra.mxu0 %v18019_v54  ;;  %v7208_v50 = vadd.f32 %v7207_v15, %v7109_v46  ;;  %v14237_v45 = vpop.f32.mrf.mxu0  ;;  %v4596_v31 = vadd.f32 %v18999_v59, %v4497_v52  ;;  %v19000_v46 = vld [vmem:[#allocation51_spill] sm:$0xff]  ;;  %v3398_v62 = vadd.f32 %v19002_v24, %v3288_v27  ;;  %v19006_v15 = vld [vmem:[#allocation56_spill] sm:$0xff]  ;;  %v19007_v27 = vld [vmem:[#allocation77_spill] sm:$0xff] }
 0x2c5   : > { %14668 = vmatmul.mubr.f32.vlgmr.msra.gmra.mxu1 %v17948_v22  ;;  %14681 = vmatprep.subr.mxu0 %v18047_v13  ;;  %v18119_v57 = vadd.f32 %v14237_v45, %v7216_v30  ;;  %v3203_v1 = vadd.f32 %v19000_v46, %v3101_v20  ;;  %v19003_v30 = vld [vmem:[#allocation18_spill] sm:$0xff]  ;;  %v4511_v51 = vadd.f32 %v19005_v14, %v4409_v44  ;;  %v19008_v45 = vld [vmem:[#allocation19_spill] sm:$0xff]  ;;  %v19010_v59 = vld [vmem:[#allocation21_spill] sm:$0xff] }
 0x2c6   : > { %14689 = vmatprep.subr.mxu1 %v17935_v8  ;;  %14682 = vmatpush3.msra.mxu0 %v18047_v13  ;;  %v7317_v54 = vpop.f32.mrf.mxu0  ;;  %v1461_v56 = vadd.f32 %v19003_v30, %v1351_v10  ;;  %v12219_v20 = vld [vmem:[%s15247_s28 + $0x22] sm:$0xff]  ;;  %v3492_v4 = vadd.f32 %v19006_v15, %v3398_v62  ;;  %v4706_v48 = vadd.f32 %v19007_v27, %v4596_v31  ;;  %v19013_v30 = vld [vmem:[#allocation20_spill] sm:$0xff] }
 0x2c7   : > { %14683 = vmatprep.mubr.f32.mxu0 %v17967_v35  ;;  %14690 = vmatpush3.msra.mxu1 %v17935_v8  ;;  %v14224_v6 = vpop.f32.mrf.mxu1  ;;  %v18127_v41 = vadd.f32 %v7317_v54, %v7208_v50  ;;  %v3304_v40 = vadd.f32 %v19004_v18, %v3203_v1  ;;  %v1367_v33 = vadd.f32 %v19008_v45, %v1266_v63  ;;  %v19009_v10 = vld [vmem:[#allocation78_spill] sm:$0xff]  ;;  %v19011_v54 = vld [vmem:[#allocation80_spill] sm:$0xff]  ;;  %v19012_v63 = vld [vmem:[#allocation55_spill] sm:$0xff] }
 0x2c8   : > { %14684 = vmatmul.mubr.f32.vlgmr.msra.gmra.mxu0 %v17982_v7  ;;  %14691 = vmatprep.subr.mxu1 %v17940_v2  ;;  %v7232_v13 = vadd.f32 %v14224_v6, %v7130_v43  ;;  %v10713_v43 = vld [vmem:[#allocation3 + $0x160] sm:$0xff]  ;;  %v4612_v37 = vadd.f32 %v19009_v10, %v4511_v51  ;;  %v1555_v31 = vadd.f32 %v19010_v59, %v1461_v56  ;;  %v19014_v18 = vld [vmem:[#allocation79_spill] sm:$0xff]  ;;  %v12222_v59 = vld [vmem:[%s15247_s28 + $0x52] sm:$0xff] }
 0x2c9   : > { %14705 = vmatprep.subr.mxu0 %v17988_v32  ;;  %14670 = vmatprep.mubr.f32.mxu1 %v17990_v38  ;;  %v7223_v16 = vpop.f32.mrf.mxu1  ;;  %v4800_v46 = vadd.f32 %v19011_v54, %v4706_v48  ;;  %v18157_v6 = vand.u32 4294901760, %v10713_v43  ;;  %v3410_v24 = vadd.f32 %v19012_v63, %v3304_v40  ;;  %v1473_v56 = vadd.f32 %v19013_v30, %v1367_v33  ;;  %v12221_v27 = vld [vmem:[%s15247_s28 + $0x42] sm:$0xff] }
 0x2ca   : > { %14692 = vmatpush3.msra.mxu1 %v17940_v2  ;;  %14706 = vmatpush3.msra.mxu0 %v17988_v32  ;;  %v7224_v52 = vadd.f32 %v7223_v16, %v7123_v0  ;;  %v14240_v50 = vpop.f32.mrf.mxu0  ;;  %v10712_v32 = vld [vmem:[#allocation3 + $0x158] sm:$0xff]  ;;  %v10715_v0 = vsel %vm252_vm0, %v12219_v20, 0  ;;  %v3513_v62 = vadd.f32 %v3492_v4, %v1555_v31  ;;  %v4718_v14 = vadd.f32 %v19014_v18, %v4612_v37  ;;  %v19015_v20 = vld [vmem:[#allocation58_spill] sm:$0xff]  ;;  %v10711_v4 = vld [vmem:[#allocation3 + $0x150] sm:$0xff] }
 0x2cb   : > { %14671 = vmatmul.mubr.f32.gmra.mxu1 %v18006_v23  ;;  %14693 = vmatprep.subr.mxu1 %v17964_v17  ;;  %v18148_v44 = vadd.f32 %v14240_v50, %v7232_v13  ;;  %v10718_v13 = vsel %vm252_vm0, %v12220_v28, 0  ;;  %v18171_v51 = vand.u32 4294901760, %v10715_v0  ;;  %v3504_v16 = vadd.f32 %v19015_v20, %v3410_v24  ;;  %v19017_v45 = vld [vmem:[#allocation82_spill] sm:$0xff] }
 0x2cc   : > { %14707 = vmatprep.subr.mxu0 %v17997_v58  ;;  %14686 = vmatprep.mubr.f32.mxu0 %v18026_v19  ;;  %v7329_v1 = vpop.f32.mrf.mxu0  ;;  %v4821_v15 = vadd.f32 %v4800_v46, %v3513_v62  ;;  %v4812_v33 = vadd.f32 %v19017_v45, %v4718_v14  ;;  %v18183_v10 = vsub.f32 %v10713_v43, %v18157_v6  ;;  %v18185_v37 = vand.u32 4294901760, %v10718_v13  ;;  %v10709_v7 = vld [vmem:[#allocation3 + $0x140] sm:$0xff]  ;;  %v19019_v46 = vld [vmem:[#allocation25_spill] sm:$0xff] }
 0x2cd   : > { %14694 = vmatpush3.msra.mxu1 %v17964_v17  ;;  %14708 = vmatpush3.msra.mxu0 %v17997_v58  ;;  %v18159_v61 = vadd.f32 %v7329_v1, %v7224_v52  ;;  %v18169_v58 = vand.u32 4294901760, %v10712_v32  ;;  %v19016_v52 = vld [vmem:[#allocation23_spill] sm:$0xff]  ;;  %v18199_v43 = vand.u32 4294901760, %v10711_v4  ;;  %v10724_v63 = vsel %vm252_vm0, %v12222_v59, 0  ;;  %v19020_v19 = vld [vmem:[#allocation94_spill] sm:$0xff] }
 0x2ce   : > { %14687 = vmatmul.mubr.f32.gmra.mxu0 %v18044_v34  ;;  %14695 = vmatprep.subr.mxu1 %v17979_v36  ;;  %v1567_v50 = vadd.f32 %v19016_v52, %v1473_v56  ;;  %v6127_v28 = vadd.f32 %v17785_v42, %v4821_v15  ;;  %v18202_v42 = vsub.f32 %v10715_v0, %v18171_v51 }
 0x2cf   : > { %14709 = vmatprep.subr.mxu0 %v18037_v47  ;;  %14696 = vmatpush3.msra.mxu1 %v17979_v36  ;;  %v14253_v40 = vpop.f32.mrf.mxu1  ;;  %v18205_v35 = vsub.f32 %v10712_v32, %v18169_v58  ;;  %v18221_v0 = vsub.f32 %v10718_v13, %v18185_v37  ;;  %v18235_v13 = vand.u32 4294901760, %v10709_v7 }
 0x2d0   : > { %14710 = vmatpush3.msra.mxu0 %v18037_v47  ;;  %14697 = vmatprep.subr.mxu1 %v18004_v5  ;;  %v7418_v48 = vadd.f32 %v14253_v40, %v18119_v57  ;;  %v10710_v57 = vld [vmem:[#allocation3 + $0x148] sm:$0xff]  ;;  %v10798_v18 = vand.u32 4294901760, %v18202_v42  ;;  %v18242_v40 = vsub.f32 %v10711_v4, %v18199_v43 }
 0x2d1   : > { %14711 = vmatprep.subr.mxu0 %v18055_v39  ;;  %14698 = vmatpush3.msra.mxu1 %v18004_v5  ;;  %v7411_v47 = vpop.f32.mrf.mxu1  ;;  %v18218_v32 = vand.u32 4294901760, %v10710_v57  ;;  %v18239_v14 = vand.u32 4294901760, %v18205_v35 }
 0x2d2   : > { %14699 = vmatprep.mubr.f32.mxu1 %v10141_v60  ;;  %14712 = vmatpush3.msra.mxu0 %v18055_v39  ;;  %v18193_v31 = vadd.f32 %v7418_v48, %v17783_v26  ;;  %v7412_v54 = vadd.f32 %v7411_v47, %v18127_v41  ;;  %v10721_v60 = vsel %vm252_vm0, %v12221_v27, 0  ;;  %v3515_v26 = vadd.f32 %v3504_v16, %v1567_v50  ;;  %v19018_v41 = vld [vmem:[#allocation22_spill] sm:$0xff]  ;;  %v19023_v50 = vld [vmem:[#allocation27_spill] sm:$0xff] }
 0x2d3   : > { %14700 = vmatmul.mubr.f32.vlgmr.msra.gmra.mxu1 %v10151_v49  ;;  %14713 = vmatprep.subr.mxu0 %v18070_v53  ;;  %v18208_v39 = vpop.f32.mrf.mxu0  ;;  %v1797_v1 = vadd.f32 %v19019_v46, %v19018_v41  ;;  %v18229_v30 = vand.u32 4294901760, %v10721_v60  ;;  %v19021_v27 = vld [vmem:[#allocation26_spill] sm:$0xff]  ;;  %v10869_v59 = vsub.f32 %v18205_v35, %v18239_v14 }
 0x2d4   : > { %14721 = vmatprep.subr.mxu1 %v17935_v8  ;;  %14714 = vmatpush3.msra.mxu0 %v18070_v53  ;;  %v18212_v49 = vadd.f32 %v7412_v54, %v6127_v28  ;;  %v4823_v62 = vadd.f32 %v4812_v33, %v3515_v26  ;;  %v18227_v53 = vand.u32 4294901760, %v18183_v10  ;;  %v19024_v33 = vld [vmem:[#allocation29_spill] sm:$0xff]  ;;  %v10799_v28 = vsub.f32 %v18202_v42, %v10798_v18 }
 0x2d5   : > { %14715 = vmatprep.mubr.f32.mxu0 %v17942_v11  ;;  %14722 = vmatpush3.msra.mxu1 %v17935_v8  ;;  %v14256_v24 = vpop.f32.mrf.mxu1  ;;  %v7531_v56 = vpop.f32.mrf.mxu0  ;;  %v1897_v48 = vadd.f32 %v19021_v27, %v1797_v1 }
 0x2d6   : > { %14716 = vmatmul.mubr.f32.vlgmr.msra.gmra.mxu0 %v17948_v22  ;;  %14723 = vmatprep.subr.mxu1 %v17940_v2  ;;  %v7430_v8 = vadd.f32 %v14256_v24, %v18148_v44  ;;  %v6129_v16 = vadd.f32 %v17835_v12, %v4823_v62  ;;  %v18247_v44 = vand.u32 4294901760, %v10724_v63  ;;  %v10808_v12 = vand.u32 4294901760, %v18221_v0  ;;  %v19025_v24 = vld [vmem:[#allocation28_spill] sm:$0xff] }
 0x2d7   : > { %14737 = vmatprep.subr.mxu0 %v18157_v6  ;;  %14702 = vmatprep.mubr.f32.mxu1 %v10161_v21  ;;  %v7423_v20 = vpop.f32.mrf.mxu1  ;;  %v10862_v4 = vsub.f32 %v18183_v10, %v18227_v53  ;;  %v1996_v47 = vadd.f32 %v19024_v33, %v1897_v48 }
 0x2d8   : > { %14724 = vmatpush3.msra.mxu1 %v17940_v2  ;;  %14738 = vmatpush3.msra.mxu0 %v18157_v6  ;;  %v18250_v21 = vadd.f32 %v7430_v8, %v19020_v19  ;;  %v7424_v15 = vadd.f32 %v7423_v20, %v18159_v61  ;;  %v18259_v2 = vsub.f32 %v10710_v57, %v18218_v32  ;;  %v18279_v57 = vand.u32 4294901760, %v18242_v40 }
 0x2d9   : > { %14703 = vmatmul.mubr.f32.gmra.mxu1 %v10171_v3  ;;  %14725 = vmatprep.subr.mxu1 %v17964_v17  ;;  %v18266_v61 = vsub.f32 %v10721_v60, %v18229_v30  ;;  %v19022_v3 = vld [vmem:[#allocation24_spill] sm:$0xff]  ;;  %v18286_v54 = vsub.f32 %v10724_v63, %v18247_v44  ;;  %v10809_v26 = vsub.f32 %v18221_v0, %v10808_v12  ;;  %v10863_v1 = vand.u32 4294901760, %v10862_v4 }
 0x2da   : > { %14739 = vmatprep.subr.mxu0 %v18169_v58  ;;  %14718 = vmatprep.mubr.f32.mxu0 %v17990_v38  ;;  %v18268_v52 = vadd.f32 %v7424_v15, %v6129_v16  ;;  %v14272_v34 = vpop.f32.mrf.mxu0  ;;  %v1809_v45 = vadd.f32 %v19023_v50, %v19022_v3  ;;  %v18297_v41 = vand.u32 4294901760, %v18259_v2  ;;  %v10800_v20 = vand.u32 4294901760, %v10799_v28  ;;  %v19027_v3 = vld [vmem:[#allocation31_spill] sm:$0xff] }
 0x2db   : > { %14726 = vmatpush3.msra.mxu1 %v17964_v17  ;;  %14740 = vmatpush3.msra.mxu0 %v18169_v58  ;;  %v18289_v17 = vsub.f32 %v10709_v7, %v18235_v13  ;;  %v10818_v7 = vand.u32 4294901760, %v18266_v61  ;;  %v10876_v16 = vsub.f32 %v18242_v40, %v18279_v57  ;;  %v10870_v15 = vand.u32 4294901760, %v10869_v59 }
 0x2dc   : > { %14719 = vmatmul.mubr.f32.gmra.mxu0 %v18006_v23  ;;  %14727 = vmatprep.subr.mxu1 %v17979_v36  ;;  %v7551_v60 = vpop.f32.mrf.mxu0  ;;  %v1911_v62 = vadd.f32 %v19025_v24, %v1809_v45 }
 0x2dd   : > { %14741 = vmatprep.subr.mxu0 %v18199_v43  ;;  %14728 = vmatpush3.msra.mxu1 %v17979_v36  ;;  %v14285_v46 = vpop.f32.mrf.mxu1  ;;  %v19026_v36 = vld [vmem:[#allocation30_spill] sm:$0xff]  ;;  %v18313_v27 = vand.u32 4294901760, %v18289_v17  ;;  %v10819_v33 = vsub.f32 %v18266_v61, %v10818_v7 }
 0x2de   : > { %14742 = vmatpush3.msra.mxu0 %v18199_v43  ;;  %14729 = vmatprep.subr.mxu1 %v18004_v5  ;;  %v7664_v63 = vadd.f32 %v14285_v46, %v18208_v39  ;;  %v2106_v8 = vadd.f32 %v19026_v36, %v1996_v47  ;;  %v10828_v39 = vand.u32 4294901760, %v18286_v54  ;;  %v2012_v50 = vadd.f32 %v19027_v3, %v1911_v62  ;;  %v19028_v47 = vld [vmem:[#allocation33_spill] sm:$0xff]  ;;  %v19029_v62 = vld [vmem:[#allocation32_spill] sm:$0xff]  ;;  %v19031_v3 = vld [vmem:[#allocation35_spill] sm:$0xff] }
 0x2df   : > { %14743 = vmatprep.subr.mxu0 %v18218_v32  ;;  %14730 = vmatpush3.msra.mxu1 %v18004_v5  ;;  %v7657_v19 = vpop.f32.mrf.mxu1  ;;  %v10810_v5 = vand.u32 4294901760, %v10809_v26 }
 0x2e0   : > { %14731 = vmatprep.mubr.f32.mxu1 %v17942_v11  ;;  %14744 = vmatpush3.msra.mxu0 %v18218_v32  ;;  %v7658_v48 = vadd.f32 %v7657_v19, %v7531_v56  ;;  %v14301_v4 = vpop.f32.mrf.mxu0  ;;  %v10883_v11 = vsub.f32 %v18259_v2, %v18297_v41  ;;  %v2200_v28 = vadd.f32 %v19028_v47, %v2106_v8  ;;  %v19033_v47 = vld [vmem:[#allocation60_spill] sm:$0xff] }
 0x2e1   : > { %14732 = vmatmul.mubr.f32.vlgmr.msra.gmra.mxu1 %v17948_v22  ;;  %14745 = vmatprep.subr.mxu0 %v18235_v13  ;;  %v7765_v45 = vadd.f32 %v14301_v4, %v7664_v63  ;;  %v10877_v22 = vand.u32 4294901760, %v10876_v16  ;;  %v10829_v26 = vsub.f32 %v18286_v54, %v10828_v39  ;;  %v10890_v63 = vsub.f32 %v18289_v17, %v18313_v27 }
 0x2e2   : > { %14753 = vmatprep.subr.mxu1 %v10863_v1  ;;  %14746 = vmatpush3.msra.mxu0 %v18235_v13  ;;  %v7757_v56 = vpop.f32.mrf.mxu0  ;;  %v2118_v36 = vadd.f32 %v19029_v62, %v2012_v50  ;;  %v19032_v50 = vld [vmem:[#allocation57_spill] sm:$0xff] }
 0x2e3   : > { %14754 = vmatpush3.msra.mxu1 %v10863_v1  ;;  %14747 = vmatprep.mubr.f32.mxu0 %v10800_v20  ;;  %v14288_v59 = vpop.f32.mrf.mxu1  ;;  %v7758_v46 = vadd.f32 %v7757_v56, %v7658_v48  ;;  %v10884_v1 = vand.u32 4294901760, %v10883_v11  ;;  %v10820_v20 = vand.u32 4294901760, %v10819_v33  ;;  %v19030_v48 = vld [vmem:[#allocation34_spill] sm:$0xff]  ;;  %v19034_v11 = vld [vmem:[#allocation37_spill] sm:$0xff] }
 0x2e4   : > { %14755 = vmatprep.subr.mxu1 %v10870_v15  ;;  %14769 = vmatprep.subr.mxu0 %v18183_v10  ;;  %v7676_v24 = vadd.f32 %v14288_v59, %v14272_v34  ;;  %v2310_v4 = vadd.f32 %v19030_v48, %v2200_v28  ;;  %v2212_v56 = vadd.f32 %v19031_v3, %v2118_v36  ;;  %v19035_v28 = vld [vmem:[#allocation81_spill] sm:$0xff]  ;;  %v19036_v59 = vld [vmem:[#allocation84_spill] sm:$0xff]  ;;  %v19041_v48 = vld [vmem:[#allocation59_spill] sm:$0xff] }
 0x2e5   : > { %14734 = vmatprep.mubr.f32.mxu1 %v17990_v38  ;;  %14748 = vmatmul.mubr.f32.vlgmr.msra.gmra.mxu0 %v10810_v5  ;;  %v7669_v8 = vpop.f32.mrf.mxu1  ;;  %v3738_v38 = vadd.f32 %v19033_v47, %v19032_v50  ;;  %v10891_v5 = vand.u32 4294901760, %v10890_v63 }
 0x2e6   : > { %14756 = vmatpush3.msra.mxu1 %v10870_v15  ;;  %14770 = vmatpush3.msra.mxu0 %v18183_v10  ;;  %v7670_v16 = vadd.f32 %v7669_v8, %v7551_v60  ;;  %v14304_v19 = vpop.f32.mrf.mxu0  ;;  %v10830_v15 = vand.u32 4294901760, %v10829_v26  ;;  %v2436_v60 = vadd.f32 %v19034_v11, %v2310_v4  ;;  %v19038_v26 = vld [vmem:[#allocation61_spill] sm:$0xff]  ;;  %v19042_v4 = vld [vmem:[#allocation62_spill] sm:$0xff] }
 0x2e7   : > { %14735 = vmatmul.mubr.f32.gmra.mxu1 %v18006_v23  ;;  %14757 = vmatprep.subr.mxu1 %v10877_v22  ;;  %v7779_v34 = vadd.f32 %v14304_v19, %v7676_v24  ;;  %v5046_v23 = vadd.f32 %v19036_v59, %v19035_v28  ;;  %v19037_v24 = vld [vmem:[#allocation36_spill] sm:$0xff]  ;;  %v3838_v63 = vadd.f32 %v19038_v26, %v3738_v38  ;;  %v19045_v38 = vld [vmem:[#allocation41_spill] sm:$0xff]  ;;  %v19047_v11 = vld [vmem:[#allocation86_spill] sm:$0xff] }
 0x2e8   : > { %14771 = vmatprep.subr.mxu0 %v18205_v35  ;;  %14758 = vmatpush3.msra.mxu1 %v10877_v22  ;;  %v7771_v10 = vpop.f32.mrf.mxu0  ;;  %v2330_v62 = vadd.f32 %v19037_v24, %v2212_v56  ;;  %v3750_v3 = vadd.f32 %v19042_v4, %v19041_v48  ;;  %v19048_v28 = vld [vmem:[#allocation88_spill] sm:$0xff]  ;;  %v19054_v4 = vld [vmem:[#allocation87_spill] sm:$0xff] }
 0x2e9   : > { %14772 = vmatpush3.msra.mxu0 %v18205_v35  ;;  %14759 = vmatprep.subr.mxu1 %v10884_v1  ;;  %v7772_v33 = vadd.f32 %v7771_v10, %v7670_v16  ;;  %v19039_v35 = vld [vmem:[#allocation38_spill] sm:$0xff]  ;;  %v19040_v16 = vld [vmem:[#allocation39_spill] sm:$0xff] }
 0x2ea   : > { %14773 = vmatprep.subr.mxu0 %v18242_v40  ;;  %14750 = vmatprep.mubr.f32.mxu0 %v10820_v20  ;;  %v2536_v8 = vadd.f32 %v19039_v35, %v2436_v60  ;;  %v2448_v19 = vadd.f32 %v19040_v16, %v2330_v62  ;;  %v19046_v10 = vld [vmem:[#allocation83_spill] sm:$0xff]  ;;  %v19053_v16 = vld [vmem:[#allocation66_spill] sm:$0xff] }
 0x2eb   : > { %14760 = vmatpush3.msra.mxu1 %v10884_v1  ;;  %14774 = vmatpush3.msra.mxu0 %v18242_v40  ;;  %v14317_v22 = vpop.f32.mrf.mxu1  ;;  %v19043_v1 = vld [vmem:[#allocation64_spill] sm:$0xff]  ;;  %v19044_v40 = vld [vmem:[#allocation85_spill] sm:$0xff]  ;;  %v5058_v60 = vadd.f32 %v19047_v11, %v19046_v10  ;;  %v19058_v10 = vld [vmem:[#allocation90_spill] sm:$0xff] }
 0x2ec   : > { %14751 = vmatmul.mubr.f32.gmra.mxu0 %v10830_v15  ;;  %14761 = vmatprep.subr.mxu1 %v10891_v5  ;;  %v7865_v36 = vadd.f32 %v14317_v22, %v7765_v45  ;;  %v3937_v56 = vadd.f32 %v19043_v1, %v3838_v63  ;;  %v5146_v50 = vadd.f32 %v19044_v40, %v5046_v23  ;;  %v19050_v22 = vld [vmem:[#allocation40_spill] sm:$0xff]  ;;  %v19051_v63 = vld [vmem:[#allocation65_spill] sm:$0xff] }
 0x2ed   : > { %14775 = vmatprep.subr.mxu0 %v18259_v2  ;;  %14762 = vmatpush3.msra.mxu1 %v10891_v5  ;;  %v7856_v20 = vpop.f32.mrf.mxu1  ;;  %v2635_v15 = vadd.f32 %v19045_v38, %v2536_v8  ;;  %v2550_v26 = vadd.f32 %v19050_v22, %v2448_v19  ;;  %v19055_v19 = vld [vmem:[#allocation68_spill] sm:$0xff]  ;;  %v19057_v38 = vld [vmem:[#allocation43_spill] sm:$0xff] }
 0x2ee   : > { %14763 = vmatprep.mubr.f32.mxu1 %v18171_v51  ;;  %14776 = vmatpush3.msra.mxu0 %v18259_v2  ;;  %v7857_v45 = vadd.f32 %v7856_v20, %v7758_v46  ;;  %v14333_v47 = vpop.f32.mrf.mxu0  ;;  %v5245_v59 = vadd.f32 %v19048_v28, %v5146_v50  ;;  %v19049_v46 = vld [vmem:[#allocation63_spill] sm:$0xff] }
 0x2ef   : > { %14764 = vmatmul.mubr.f32.vlgmr.msra.gmra.mxu1 %v18185_v37  ;;  %14777 = vmatprep.subr.mxu0 %v18289_v17  ;;  %v18362_v5 = vadd.f32 %v14333_v47, %v7865_v36  ;;  %v3852_v23 = vadd.f32 %v19049_v46, %v3750_v3  ;;  %v4047_v36 = vadd.f32 %v19051_v63, %v3937_v56  ;;  %v10704_v20 = vld [vmem:[#allocation2 + $0x22] sm:$0xff]  ;;  %v19056_v56 = vld [vmem:[#allocation89_spill] sm:$0xff]  ;;  %v19060_v46 = vld [vmem:[#allocation92_spill] sm:$0xff] }
 0x2f0   : > { %14785 = vmatprep.subr.mxu1 %v18157_v6  ;;  %14778 = vmatpush3.msra.mxu0 %v18289_v17  ;;  %v7966_v2 = vpop.f32.mrf.mxu0  ;;  %v19052_v17 = vld [vmem:[#allocation42_spill] sm:$0xff]  ;;  %v5160_v3 = vadd.f32 %v19054_v4, %v5058_v60  ;;  %v5355_v50 = vadd.f32 %v19056_v56, %v5245_v59  ;;  %v10705_v60 = vld [vmem:[#allocation2 + $0x32] sm:$0xff]  ;;  %v19061_v63 = vld [vmem:[#allocation67_spill] sm:$0xff] }
 0x2f1   : > { %14779 = vmatprep.mubr.f32.mxu0 %v18202_v42  ;;  %14786 = vmatpush3.msra.mxu1 %v18157_v6  ;;  %v14320_v24 = vpop.f32.mrf.mxu1  ;;  %v18370_v62 = vadd.f32 %v7966_v2, %v7857_v45  ;;  %v2745_v8 = vadd.f32 %v19052_v17, %v2635_v15  ;;  %v3953_v48 = vadd.f32 %v19053_v16, %v3852_v23  ;;  %v19059_v2 = vld [vmem:[#allocation45_spill] sm:$0xff]  ;;  %v11367_v17 = vsel %vm252_vm0, %v10705_v60, 0  ;;  %v19063_v4 = vld [vmem:[#allocation91_spill] sm:$0xff] }
 0x2f2   : > { %14780 = vmatmul.mubr.f32.vlgmr.msra.gmra.mxu0 %v18221_v0  ;;  %14787 = vmatprep.subr.mxu1 %v18169_v58  ;;  %v7881_v35 = vadd.f32 %v14320_v24, %v7779_v34  ;;  %v4141_v40 = vadd.f32 %v19055_v19, %v4047_v36  ;;  %v11362_v34 = vld [vmem:[#allocation6 + $0x160] sm:$0xff]  ;;  %v2651_v15 = vadd.f32 %v19057_v38, %v2550_v26  ;;  %v11360_v56 = vld [vmem:[#allocation6 + $0x150] sm:$0xff]  ;;  %v18425_v60 = vand.u32 4294901760, %v11367_v17 }
 0x2f3   : > { %14801 = vmatprep.subr.mxu0 %v18227_v53  ;;  %14766 = vmatprep.mubr.f32.mxu1 %v18229_v30  ;;  %v7872_v1 = vpop.f32.mrf.mxu1  ;;  %v5261_v11 = vadd.f32 %v19058_v10, %v5160_v3  ;;  %v2839_v59 = vadd.f32 %v19059_v2, %v2745_v8  ;;  %v5449_v23 = vadd.f32 %v19060_v46, %v5355_v50  ;;  %v18398_v22 = vand.u32 4294901760, %v11362_v34  ;;  %v19062_v8 = vld [vmem:[#allocation44_spill] sm:$0xff]  ;;  %v10706_v50 = vld [vmem:[#allocation2 + $0x42] sm:$0xff] }
 0x2f4   : > { %14788 = vmatpush3.msra.mxu1 %v18169_v58  ;;  %14802 = vmatpush3.msra.mxu0 %v18227_v53  ;;  %v7873_v45 = vadd.f32 %v7872_v1, %v7772_v33  ;;  %v14336_v47 = vpop.f32.mrf.mxu0  ;;  %v11361_v53 = vld [vmem:[#allocation6 + $0x158] sm:$0xff]  ;;  %v11364_v33 = vsel %vm252_vm0, %v10704_v20, 0  ;;  %v4059_v36 = vadd.f32 %v19061_v63, %v3953_v48  ;;  %v2757_v16 = vadd.f32 %v19062_v8, %v2651_v15  ;;  %v19066_v15 = vld [vmem:[#allocation93_spill] sm:$0xff]  ;;  %v11358_v0 = vld [vmem:[#allocation6 + $0x140] sm:$0xff] }
 0x2f5   : > { %14767 = vmatmul.mubr.f32.gmra.mxu1 %v18247_v44  ;;  %14789 = vmatprep.subr.mxu1 %v18199_v43  ;;  %v18389_v28 = vadd.f32 %v14336_v47, %v7881_v35  ;;  %v4162_v35 = vadd.f32 %v4141_v40, %v2839_v59  ;;  %v5367_v3 = vadd.f32 %v19063_v4, %v5261_v11  ;;  %v18412_v20 = vand.u32 4294901760, %v11364_v33  ;;  %v19064_v1 = vld [vmem:[#allocation70_spill] sm:$0xff]  ;;  %v10707_v59 = vld [vmem:[#allocation2 + $0x52] sm:$0xff] }
 0x2f6   : > { %14803 = vmatprep.subr.mxu0 %v18239_v14  ;;  %14782 = vmatprep.mubr.f32.mxu0 %v18266_v61  ;;  %v7978_v24 = vpop.f32.mrf.mxu0  ;;  %v4153_v19 = vadd.f32 %v19064_v1, %v4059_v36  ;;  %v19065_v47 = vld [vmem:[#allocation46_spill] sm:$0xff]  ;;  %v18423_v11 = vsub.f32 %v11362_v34, %v18398_v22  ;;  %v18438_v34 = vand.u32 4294901760, %v11360_v56 }
 0x2f7   : > { %14790 = vmatpush3.msra.mxu1 %v18199_v43  ;;  %14804 = vmatpush3.msra.mxu0 %v18239_v14  ;;  %v18400_v26 = vadd.f32 %v7978_v24, %v7873_v45  ;;  %v18410_v14 = vand.u32 4294901760, %v11361_v53  ;;  %v5470_v40 = vadd.f32 %v5449_v23, %v4162_v35  ;;  %v2851_v38 = vadd.f32 %v19065_v47, %v2757_v16 }
 0x2f8   : > { %14783 = vmatmul.mubr.f32.gmra.mxu0 %v18286_v54  ;;  %14791 = vmatprep.subr.mxu1 %v18218_v32  ;;  %v5461_v10 = vadd.f32 %v19066_v15, %v5367_v3  ;;  %v18477_v4 = vsub.f32 %v11360_v56, %v18438_v34 }
 0x2f9   : > { %14805 = vmatprep.subr.mxu0 %v18279_v57  ;;  %14792 = vmatpush3.msra.mxu1 %v18218_v32  ;;  %v14349_v48 = vpop.f32.mrf.mxu1  ;;  %v6776_v2 = vadd.f32 %v17959_v9, %v5470_v40  ;;  %v18441_v9 = vsub.f32 %v11364_v33, %v18412_v20  ;;  %v18444_v42 = vsub.f32 %v11361_v53, %v18410_v14  ;;  %v11373_v33 = vsel %vm252_vm0, %v10707_v59, 0 }
 0x2fa   : > { %14806 = vmatpush3.msra.mxu0 %v18279_v57  ;;  %14793 = vmatprep.subr.mxu1 %v18235_v13  ;;  %v8067_v45 = vadd.f32 %v14349_v48, %v18362_v5  ;;  %v11359_v5 = vld [vmem:[#allocation6 + $0x148] sm:$0xff]  ;;  %v18456_v53 = vsub.f32 %v11367_v17, %v18425_v60  ;;  %v18470_v17 = vand.u32 4294901760, %v11358_v0 }
 0x2fb   : > { %14807 = vmatprep.subr.mxu0 %v18297_v41  ;;  %14794 = vmatpush3.msra.mxu1 %v18235_v13  ;;  %v8060_v57 = vpop.f32.mrf.mxu1  ;;  %v11447_v8 = vand.u32 4294901760, %v18441_v9  ;;  %v18474_v16 = vand.u32 4294901760, %v18444_v42 }
 0x2fc   : > { %14795 = vmatprep.mubr.f32.mxu1 %v10798_v18  ;;  %14808 = vmatpush3.msra.mxu0 %v18297_v41  ;;  %v18432_v46 = vadd.f32 %v8067_v45, %v17957_v55  ;;  %v8061_v23 = vadd.f32 %v8060_v57, %v18370_v62  ;;  %v11370_v18 = vsel %vm252_vm0, %v10706_v50, 0  ;;  %v4164_v55 = vadd.f32 %v4153_v19, %v2851_v38 }
 0x2fd   : > { %14796 = vmatmul.mubr.f32.vlgmr.msra.gmra.mxu1 %v10808_v12  ;;  %14809 = vmatprep.subr.mxu0 %v18313_v27  ;;  %v14365_v41 = vpop.f32.mrf.mxu0  ;;  %v18453_v62 = vand.u32 4294901760, %v11359_v5  ;;  %v18464_v36 = vand.u32 4294901760, %v11370_v18  ;;  %v11457_v1 = vand.u32 4294901760, %v18456_v53  ;;  %v18510_v19 = vand.u32 4294901760, %v18477_v4 }
 0x2fe   : > { %14817 = vmatprep.subr.mxu1 %v18157_v6  ;;  %14810 = vmatpush3.msra.mxu0 %v18313_v27  ;;  %v18449_v12 = vadd.f32 %v8061_v23, %v6776_v2  ;;  %v5472_v63 = vadd.f32 %v5461_v10, %v4164_v55  ;;  %v18462_v27 = vand.u32 4294901760, %v18423_v11  ;;  %v11518_v40 = vsub.f32 %v18444_v42, %v18474_v16 }
 0x2ff   : > { %14811 = vmatprep.mubr.f32.mxu0 %v18171_v51  ;;  %14818 = vmatpush3.msra.mxu1 %v18157_v6  ;;  %v14352_v24 = vpop.f32.mrf.mxu1  ;;  %v8190_v35 = vpop.f32.mrf.mxu0  ;;  %v11458_v45 = vsub.f32 %v18456_v53, %v11457_v1  ;;  %v11525_v2 = vsub.f32 %v18477_v4, %v18510_v19 }
 0x300   : > { %14812 = vmatmul.mubr.f32.vlgmr.msra.gmra.mxu0 %v18185_v37  ;;  %14819 = vmatprep.subr.mxu1 %v18169_v58  ;;  %v8079_v6 = vadd.f32 %v14352_v24, %v18389_v28  ;;  %v6778_v48 = vadd.f32 %v18011_v29, %v5472_v63  ;;  %v18482_v28 = vand.u32 4294901760, %v11373_v33  ;;  %v18493_v29 = vsub.f32 %v11359_v5, %v18453_v62 }
 0x301   : > { %14833 = vmatprep.subr.mxu0 %v18398_v22  ;;  %14798 = vmatprep.mubr.f32.mxu1 %v10818_v7  ;;  %v8072_v3 = vpop.f32.mrf.mxu1  ;;  %v11519_v59 = vand.u32 4294901760, %v11518_v40  ;;  %v11526_v63 = vand.u32 4294901760, %v11525_v2 }
 0x302   : > { %14820 = vmatpush3.msra.mxu1 %v18169_v58  ;;  %14834 = vmatpush3.msra.mxu0 %v18398_v22  ;;  %v18485_v61 = vadd.f32 %v8079_v6, %v18009_v25  ;;  %v8073_v7 = vadd.f32 %v8072_v3, %v18400_v26  ;;  %v11511_v25 = vsub.f32 %v18423_v11, %v18462_v27  ;;  %v18528_v47 = vand.u32 4294901760, %v18493_v29 }
 0x303   : > { %14799 = vmatmul.mubr.f32.gmra.mxu1 %v10828_v39  ;;  %14821 = vmatprep.subr.mxu1 %v18199_v43  ;;  %v18500_v58 = vsub.f32 %v11370_v18, %v18464_v36  ;;  %v11448_v39 = vsub.f32 %v18441_v9, %v11447_v8  ;;  %v18517_v56 = vsub.f32 %v11373_v33, %v18482_v28 }
 0x304   : > { %14835 = vmatprep.subr.mxu0 %v18410_v14  ;;  %14814 = vmatprep.mubr.f32.mxu0 %v18229_v30  ;;  %v18502_v26 = vadd.f32 %v8073_v7, %v6778_v48  ;;  %v14368_v54 = vpop.f32.mrf.mxu0  ;;  %v11512_v15 = vand.u32 4294901760, %v11511_v25 }
 0x305   : > { %14822 = vmatpush3.msra.mxu1 %v18199_v43  ;;  %14836 = vmatpush3.msra.mxu0 %v18410_v14  ;;  %v18520_v43 = vsub.f32 %v11358_v0, %v18470_v17  ;;  %v11467_v10 = vand.u32 4294901760, %v18500_v58  ;;  %v11477_v23 = vand.u32 4294901760, %v18517_v56  ;;  %v11532_v0 = vsub.f32 %v18493_v29, %v18528_v47 }
 0x306   : > { %14815 = vmatmul.mubr.f32.gmra.mxu0 %v18247_v44  ;;  %14823 = vmatprep.subr.mxu1 %v18218_v32  ;;  %v8210_v50 = vpop.f32.mrf.mxu0 }
 0x307   : > { %14837 = vmatprep.subr.mxu0 %v18438_v34  ;;  %14824 = vmatpush3.msra.mxu1 %v18218_v32  ;;  %v14381_v38 = vpop.f32.mrf.mxu1  ;;  %v11449_v32 = vand.u32 4294901760, %v11448_v39  ;;  %v18541_v18 = vand.u32 4294901760, %v18520_v43  ;;  %v11533_v7 = vand.u32 4294901760, %v11532_v0 }
 0x308   : > { %14838 = vmatpush3.msra.mxu0 %v18438_v34  ;;  %14825 = vmatprep.subr.mxu1 %v18235_v13  ;;  %v8323_v57 = vadd.f32 %v14381_v38, %v14365_v41 }
 0x309   : > { %14839 = vmatprep.subr.mxu0 %v18453_v62  ;;  %14826 = vmatpush3.msra.mxu1 %v18235_v13  ;;  %v8316_v5 = vpop.f32.mrf.mxu1  ;;  %v11459_v13 = vand.u32 4294901760, %v11458_v45  ;;  %v11539_v3 = vsub.f32 %v18520_v43, %v18541_v18 }
 0x30a   : > { %14827 = vmatprep.mubr.f32.mxu1 %v18171_v51  ;;  %14840 = vmatpush3.msra.mxu0 %v18453_v62  ;;  %v8317_v41 = vadd.f32 %v8316_v5, %v8190_v35  ;;  %v14397_v55 = vpop.f32.mrf.mxu0  ;;  %v11468_v51 = vsub.f32 %v18500_v58, %v11467_v10  ;;  %v11478_v35 = vsub.f32 %v18517_v56, %v11477_v23 }
 0x30b   : > { %14828 = vmatmul.mubr.f32.vlgmr.msra.gmra.mxu1 %v18185_v37  ;;  %14841 = vmatprep.subr.mxu0 %v18470_v17  ;;  %v8424_v33 = vadd.f32 %v14397_v55, %v8323_v57 }
 0x30c   : > { %14849 = vmatprep.subr.mxu1 %v11512_v15  ;;  %14842 = vmatpush3.msra.mxu0 %v18470_v17  ;;  %v8416_v24 = vpop.f32.mrf.mxu0  ;;  %v11469_v39 = vand.u32 4294901760, %v11468_v51 }
 0x30d   : > { %14850 = vmatpush3.msra.mxu1 %v11512_v15  ;;  %14843 = vmatprep.mubr.f32.mxu0 %v11449_v32  ;;  %v14384_v6 = vpop.f32.mrf.mxu1  ;;  %v8417_v37 = vadd.f32 %v8416_v24, %v8317_v41  ;;  %v11479_v15 = vand.u32 4294901760, %v11478_v35 }
 0x30e   : > { %14851 = vmatprep.subr.mxu1 %v11519_v59  ;;  %14865 = vmatprep.subr.mxu0 %v18423_v11  ;;  %v8335_v48 = vadd.f32 %v14384_v6, %v14368_v54  ;;  %v11540_v54 = vand.u32 4294901760, %v11539_v3 }
 0x30f   : > { %14830 = vmatprep.mubr.f32.mxu1 %v18229_v30  ;;  %14844 = vmatmul.mubr.f32.vlgmr.msra.gmra.mxu0 %v11459_v13  ;;  %v8328_v25 = vpop.f32.mrf.mxu1 }
 0x310   : > { %14852 = vmatpush3.msra.mxu1 %v11519_v59  ;;  %14866 = vmatpush3.msra.mxu0 %v18423_v11  ;;  %v8329_v40 = vadd.f32 %v8328_v25, %v8210_v50  ;;  %v14400_v45 = vpop.f32.mrf.mxu0 }
 0x311   : > { %14831 = vmatmul.mubr.f32.gmra.mxu1 %v18247_v44  ;;  %14853 = vmatprep.subr.mxu1 %v11526_v63  ;;  %v8438_v38 = vadd.f32 %v14400_v45, %v8335_v48 }
 0x312   : > { %14867 = vmatprep.subr.mxu0 %v18444_v42  ;;  %14854 = vmatpush3.msra.mxu1 %v11526_v63  ;;  %v8430_v57 = vpop.f32.mrf.mxu0 }
 0x313   : > { %14868 = vmatpush3.msra.mxu0 %v18444_v42  ;;  %14855 = vmatprep.subr.mxu1 %v11533_v7  ;;  %v8431_v30 = vadd.f32 %v8430_v57, %v8329_v40 }
 0x314   : > { %14869 = vmatprep.subr.mxu0 %v18477_v4  ;;  %14846 = vmatprep.mubr.f32.mxu0 %v11469_v39 }
 0x315   : > { %14856 = vmatpush3.msra.mxu1 %v11533_v7  ;;  %14870 = vmatpush3.msra.mxu0 %v18477_v4  ;;  %v14413_v11 = vpop.f32.mrf.mxu1 }
 0x316   : > { %14847 = vmatmul.mubr.f32.gmra.mxu0 %v11479_v15  ;;  %14857 = vmatprep.subr.mxu1 %v11540_v54  ;;  %v8524_v44 = vadd.f32 %v14413_v11, %v8424_v33 }
 0x317   : > { %14871 = vmatprep.subr.mxu0 %v18493_v29  ;;  %14858 = vmatpush3.msra.mxu1 %v11540_v54  ;;  %v8515_v50 = vpop.f32.mrf.mxu1 }
 0x318   : > { %14859 = vmatprep.mubr.f32.mxu1 %v18412_v20  ;;  %14872 = vmatpush3.msra.mxu0 %v18493_v29  ;;  %v8516_v42 = vadd.f32 %v8515_v50, %v8417_v37  ;;  %v14429_v32 = vpop.f32.mrf.mxu0 }
 0x319   : > { %14860 = vmatmul.mubr.f32.vlgmr.msra.gmra.mxu1 %v18425_v60  ;;  %14873 = vmatprep.subr.mxu0 %v18520_v43  ;;  %v8632_v2 = vadd.f32 %v14429_v32, %v8524_v44 }
 0x31a   : > { %14881 = vmatprep.subr.mxu1 %v18398_v22  ;;  %14874 = vmatpush3.msra.mxu0 %v18520_v43  ;;  %v8625_v4 = vpop.f32.mrf.mxu0 }
 0x31b   : > { %14875 = vmatprep.mubr.f32.mxu0 %v18441_v9  ;;  %14882 = vmatpush3.msra.mxu1 %v18398_v22  ;;  %v14416_v5 = vpop.f32.mrf.mxu1  ;;  %v8626_v59 = vadd.f32 %v8625_v4, %v8516_v42 }
 0x31c   : > { %14876 = vmatmul.mubr.f32.vlgmr.msra.gmra.mxu0 %v18456_v53  ;;  %14883 = vmatprep.subr.mxu1 %v18410_v14  ;;  %v8540_v29 = vadd.f32 %v14416_v5, %v8438_v38 }
 0x31d   : > { %14897 = vmatprep.subr.mxu0 %v18462_v27  ;;  %14862 = vmatprep.mubr.f32.mxu1 %v18464_v36  ;;  %v8531_v41 = vpop.f32.mrf.mxu1 }
 0x31e   : > { %14884 = vmatpush3.msra.mxu1 %v18410_v14  ;;  %14898 = vmatpush3.msra.mxu0 %v18462_v27  ;;  %v8532_v43 = vadd.f32 %v8531_v41, %v8431_v30  ;;  %v14432_v55 = vpop.f32.mrf.mxu0 }
 0x31f   : > { %14863 = vmatmul.mubr.f32.gmra.mxu1 %v18482_v28  ;;  %14885 = vmatprep.subr.mxu1 %v18438_v34  ;;  %v8644_v13 = vadd.f32 %v14432_v55, %v8540_v29 }
 0x320   : > { %14899 = vmatprep.subr.mxu0 %v18474_v16  ;;  %14878 = vmatprep.mubr.f32.mxu0 %v18500_v58  ;;  %v8637_v0 = vpop.f32.mrf.mxu0 }
 0x321   : > { %14886 = vmatpush3.msra.mxu1 %v18438_v34  ;;  %14900 = vmatpush3.msra.mxu0 %v18474_v16  ;;  %v8638_v33 = vadd.f32 %v8637_v0, %v8532_v43 }
 0x322   : > { %14879 = vmatmul.mubr.f32.gmra.mxu0 %v18517_v56  ;;  %14887 = vmatprep.subr.mxu1 %v18453_v62 }
 0x323   : > { %14901 = vmatprep.subr.mxu0 %v18510_v19  ;;  %14888 = vmatpush3.msra.mxu1 %v18453_v62  ;;  %v14445_v27 = vpop.f32.mrf.mxu1 }
 0x324   : > { %14902 = vmatpush3.msra.mxu0 %v18510_v19  ;;  %14889 = vmatprep.subr.mxu1 %v18470_v17  ;;  %v8726_v51 = vadd.f32 %v14445_v27, %v8632_v2 }
 0x325   : > { %14903 = vmatprep.subr.mxu0 %v18528_v47  ;;  %14890 = vmatpush3.msra.mxu1 %v18470_v17  ;;  %v8719_v16 = vpop.f32.mrf.mxu1 }
 0x326   : > { %14891 = vmatprep.mubr.f32.mxu1 %v11447_v8  ;;  %14904 = vmatpush3.msra.mxu0 %v18528_v47  ;;  %v18597_v24 = vadd.f32 %v8726_v51, %v18193_v31  ;;  %v8720_v63 = vadd.f32 %v8719_v16, %v8626_v59 }
 0x327   : > { %14892 = vmatmul.mubr.f32.vlgmr.msra.gmra.mxu1 %v11457_v1  ;;  %14905 = vmatprep.subr.mxu0 %v18541_v18  ;;  %v14461_v19 = vpop.f32.mrf.mxu0 }
 0x328   : > { %14913 = vmatprep.subr.mxu1 %v18398_v22  ;;  %14906 = vmatpush3.msra.mxu0 %v18541_v18  ;;  %v18605_v6 = vadd.f32 %v8720_v63, %v18212_v49 }
 0x329   : > { %14907 = vmatprep.mubr.f32.mxu0 %v18412_v20  ;;  %14914 = vmatpush3.msra.mxu1 %v18398_v22  ;;  %v14448_v31 = vpop.f32.mrf.mxu1  ;;  %v8839_v53 = vpop.f32.mrf.mxu0 }
 0x32a   : > { %14908 = vmatmul.mubr.f32.vlgmr.msra.gmra.mxu0 %v18425_v60  ;;  %14915 = vmatprep.subr.mxu1 %v18410_v14  ;;  %v8738_v9 = vadd.f32 %v14448_v31, %v8644_v13 }
 0x32b   : > { %14894 = vmatprep.mubr.f32.mxu1 %v11467_v10  ;;  %14916 = vmatpush3.msra.mxu1 %v18410_v14  ;;  %v8731_v8 = vpop.f32.mrf.mxu1 }
 0x32c   : > { %14895 = vmatmul.mubr.f32.gmra.mxu1 %v11477_v23  ;;  %14917 = vmatprep.subr.mxu1 %v18438_v34  ;;  %v18618_v49 = vadd.f32 %v8738_v9, %v18250_v21  ;;  %v8732_v22 = vadd.f32 %v8731_v8, %v8638_v33 }
 0x32d   : > { %14910 = vmatprep.mubr.f32.mxu0 %v18464_v36  ;;  %14918 = vmatpush3.msra.mxu1 %v18438_v34 }
 0x32e   : > { %14911 = vmatmul.mubr.f32.gmra.mxu0 %v18482_v28  ;;  %14919 = vmatprep.subr.mxu1 %v18453_v62  ;;  %v18625_v14 = vadd.f32 %v8732_v22, %v18268_v52  ;;  %v14464_v1 = vpop.f32.mrf.mxu0 }
 0x32f   : > { %14920 = vmatpush3.msra.mxu1 %v18453_v62  ;;  %14923 = vmatprep.mubr.f32.mxu1 %v18412_v20 }
 0x330   : > { %14921 = vmatprep.subr.mxu1 %v18470_v17  ;;  %v8859_v21 = vpop.f32.mrf.mxu0 }
 0x331   : > { %14922 = vmatpush3.msra.mxu1 %v18470_v17  ;;  %v14477_v58 = vpop.f32.mrf.mxu1 }
 0x332   : > { %14924 = vmatmul.mubr.f32.vlgmr.msra.gmra.mxu1 %v18425_v60  ;;  %v8972_v34 = vadd.f32 %v14477_v58, %v14461_v19 }
 0x333   : > { %14926 = vmatprep.mubr.f32.mxu1 %v18464_v36  ;;  %v8965_v56 = vpop.f32.mrf.mxu1 }
 0x334   : > { %v8966_v47 = vadd.f32 %v8965_v56, %v8839_v53  ;;  %v14493_v52 = vpop.f32.mrf.mxu0 }
 0x335   : > { %v9073_v10 = vadd.f32 %v14493_v52, %v8972_v34 }
 0x336   : > { %14927 = vmatmul.mubr.f32.gmra.mxu1 %v18482_v28  ;;  %v9065_v62 = vpop.f32.mrf.mxu0 }
 0x337   : > { %v14480_v23 = vpop.f32.mrf.mxu1  ;;  %v9066_v20 = vadd.f32 %v9065_v62, %v8966_v47 }
 0x338   : > { %v8984_v18 = vadd.f32 %v14480_v23, %v14464_v1 }
 0x339   : > { %v8977_v37 = vpop.f32.mrf.mxu1 }
 0x33a   : > { %v8978_v35 = vadd.f32 %v8977_v37, %v8859_v21  ;;  %v14496_v3 = vpop.f32.mrf.mxu0 }
 0x33b   : > { %v9087_v17 = vadd.f32 %v14496_v3, %v8984_v18 }
 0x33c   : > { %v9079_v48 = vpop.f32.mrf.mxu0 }
 0x33d   : > { %v9080_v7 = vadd.f32 %v9079_v48, %v8978_v35 }
 0x33f   : > { %v14509_v60 = vpop.f32.mrf.mxu1 }
 0x340   : > { %v9173_v25 = vadd.f32 %v14509_v60, %v9073_v10 }
 0x341   : > { %v9164_v39 = vpop.f32.mrf.mxu1 }
 0x342   : > { %v9165_v36 = vadd.f32 %v9164_v39, %v9066_v20  ;;  %v14525_v40 = vpop.f32.mrf.mxu0 }
 0x343   : > { %v9281_v45 = vadd.f32 %v14525_v40, %v9173_v25 }
 0x344   : > { %v9274_v38 = vpop.f32.mrf.mxu0 }
 0x345   : > { %v14512_v15 = vpop.f32.mrf.mxu1  ;;  %v9275_v54 = vadd.f32 %v9274_v38, %v9165_v36 }
 0x346   : > { %v9189_v28 = vadd.f32 %v14512_v15, %v9087_v17 }
 0x347   : > { %v9180_v57 = vpop.f32.mrf.mxu1 }
 0x348   : > { %v9181_v30 = vadd.f32 %v9180_v57, %v9080_v7  ;;  %v14528_v11 = vpop.f32.mrf.mxu0 }
 0x349   : > { %v9293_v44 = vadd.f32 %v14528_v11, %v9189_v28 }
 0x34a   : > { %v9286_v50 = vpop.f32.mrf.mxu0 }
 0x34b   : > { %v9287_v42 = vadd.f32 %v9286_v50, %v9181_v30 }
 0x34d   : > { %v14541_v32 = vpop.f32.mrf.mxu1 }
 0x34e   : > { %v9375_v2 = vadd.f32 %v14541_v32, %v9281_v45 }
 0x34f   : > { %v9368_v4 = vpop.f32.mrf.mxu1 }
 0x350   : > { %v18635_v5 = vadd.f32 %v9375_v2, %v18432_v46  ;;  %v9369_v59 = vadd.f32 %v9368_v4, %v9275_v54 }
 0x351   : > { %v18637_v29 = vpop.f32.mrf.mxu0 }
 0x352   : > { %v18640_v41 = vadd.f32 %v9369_v59, %v18449_v12 }
 0x353   : > { %v14544_v43 = vpop.f32.mrf.mxu1  ;;  %v18642_v13 = vpop.f32.mrf.mxu0 }
 0x354   : > { %v9387_v55 = vadd.f32 %v14544_v43, %v9293_v44 }
 0x355   : > { %v9380_v0 = vpop.f32.mrf.mxu1 }
 0x356   : > { %v18645_v33 = vadd.f32 %v9387_v55, %v18485_v61  ;;  %v9381_v27 = vadd.f32 %v9380_v0, %v9287_v42 }
 0x358   : > { %v18648_v51 = vadd.f32 %v9381_v27, %v18502_v26  ;;  %v18650_v46 = vpop.f32.mrf.mxu0 }
 0x35a   : > { %v18652_v16 = vpop.f32.mrf.mxu0 }
 0x35b   : > { %v18654_v63 = vpop.f32.mrf.mxu1 }
 0x35d   : > { %v18656_v12 = vpop.f32.mrf.mxu1 }
 0x35e   : > { %v18658_v19 = vpop.f32.mrf.mxu0 }
 0x360   : > { %v18662_v9 = vpop.f32.mrf.mxu0 }
 0x361   : > { %v18660_v31 = vpop.f32.mrf.mxu1 }
 0x363   : > { %v18664_v61 = vpop.f32.mrf.mxu1 }
 0x364   : > { %v18666_v53 = vpop.f32.mrf.mxu0 }
 0x366   : > { %v18670_v8 = vpop.f32.mrf.mxu0 }
 0x369   : > { %v18668_v26 = vpop.f32.mrf.mxu1 }
 0x36b   : > { %v18672_v22 = vpop.f32.mrf.mxu1 }
 0x36c   : > { %v18674_v1 = vpop.f32.mrf.mxu0 }
 0x36e   : > { %v18678_v58 = vpop.f32.mrf.mxu0 }
 0x36f   : > { %v18676_v21 = vpop.f32.mrf.mxu1 }
 0x371   : > { %v18680_v34 = vpop.f32.mrf.mxu1 }
 0x372   : > { %v18682_v56 = vpop.f32.mrf.mxu0 }
 0x374   : > { %v18686_v52 = vpop.f32.mrf.mxu0 }
 0x377   : > { %v18684_v47 = vpop.f32.mrf.mxu1 }
 0x379   : > { %v18688_v10 = vpop.f32.mrf.mxu1 }
 0x37b   : > { %v14653_v62 = vpop.f32.mrf.mxu0 }
 0x37d   : > { %v10145_v23 = vpop.f32.mrf.mxu0  ;;  %v18690_v20 = vpop.f32.mrf.mxu1 }
 0x37f   : > { %v18692_v37 = vpop.f32.mrf.mxu1 }
 0x382   : > { %v14656_v18 = vpop.f32.mrf.mxu0 }
 0x384   : > { %v10165_v35 = vpop.f32.mrf.mxu0 }
 0x385   : > { %v14669_v3 = vpop.f32.mrf.mxu1 }
 0x386   : > { %v10278_v17 = vadd.f32 %v14669_v3, %v14653_v62 }
 0x387   : > { %v10271_v48 = vpop.f32.mrf.mxu1 }
 0x388   : > { %v10272_v7 = vadd.f32 %v10271_v48, %v10145_v23  ;;  %v14685_v60 = vpop.f32.mrf.mxu0 }
 0x389   : > { %v10379_v25 = vadd.f32 %v14685_v60, %v10278_v17 }
 0x38a   : > { %v10371_v39 = vpop.f32.mrf.mxu0 }
 0x38b   : > { %v14672_v36 = vpop.f32.mrf.mxu1  ;;  %v10372_v40 = vadd.f32 %v10371_v39, %v10272_v7 }
 0x38c   : > { %v10290_v45 = vadd.f32 %v14672_v36, %v14656_v18 }
 0x38d   : > { %v10283_v38 = vpop.f32.mrf.mxu1 }
 0x38e   : > { %v10284_v15 = vadd.f32 %v10283_v38, %v10165_v35  ;;  %v14688_v54 = vpop.f32.mrf.mxu0 }
 0x38f   : > { %v10393_v28 = vadd.f32 %v14688_v54, %v10290_v45 }
 0x390   : > { %v10385_v57 = vpop.f32.mrf.mxu0 }
 0x391   : > { %v10386_v30 = vadd.f32 %v10385_v57, %v10284_v15 }
 0x393   : > { %v14701_v11 = vpop.f32.mrf.mxu1 }
 0x394   : > { %v10479_v44 = vadd.f32 %v14701_v11, %v10379_v25 }
 0x395   : > { %v10470_v50 = vpop.f32.mrf.mxu1 }
 0x396   : > { %v10471_v42 = vadd.f32 %v10470_v50, %v10372_v40  ;;  %v14717_v32 = vpop.f32.mrf.mxu0 }
 0x397   : > { %v10587_v27 = vadd.f32 %v14717_v32, %v10479_v44 }
 0x398   : > { %v10580_v59 = vpop.f32.mrf.mxu0 }
 0x399   : > { %v14704_v2 = vpop.f32.mrf.mxu1  ;;  %v10581_v23 = vadd.f32 %v10580_v59, %v10471_v42  ;;  %v9629_v42 = vadd.f32 %v18654_v63, %v18637_v29  ;;  %v9635_v63 = vadd.f32 %v18664_v61, %v18652_v16 }
 0x39a   : > { %v10495_v4 = vadd.f32 %v14704_v2, %v10393_v28 }
 0x39b   : > { %v10486_v43 = vpop.f32.mrf.mxu1  ;;  %v9730_v59 = vadd.f32 %v18658_v19, %v9629_v42 }
 0x39c   : > { %v10487_v55 = vadd.f32 %v10486_v43, %v10386_v30  ;;  %v14720_v0 = vpop.f32.mrf.mxu0 }
 0x39d   : > { %v10599_v60 = vadd.f32 %v14720_v0, %v10495_v4  ;;  %v9830_v0 = vadd.f32 %v18668_v26, %v9730_v59 }
 0x39e   : > { %v10592_v35 = vpop.f32.mrf.mxu0 }
 0x39f   : > { %v10593_v36 = vadd.f32 %v10592_v35, %v10487_v55  ;;  %v9641_v55 = vadd.f32 %v18660_v31, %v18650_v46  ;;  %v9938_v19 = vadd.f32 %v18674_v1, %v9830_v0 }
 0x3a1   : > { %v14733_v62 = vpop.f32.mrf.mxu1 }
 0x3a2   : > { %v10681_v18 = vadd.f32 %v14733_v62, %v10587_v27 }
 0x3a3   : > { %v10674_v3 = vpop.f32.mrf.mxu1 }
 0x3a4   : > { %v18695_v17 = vadd.f32 %v10681_v18, %v18635_v5  ;;  %v10675_v48 = vadd.f32 %v10674_v3, %v10581_v23 }
 0x3a5   : > { %v14749_v7 = vpop.f32.mrf.mxu0 }
 0x3a6   : > { %v18698_v25 = vadd.f32 %v10675_v48, %v18640_v41  ;;  %v9737_v48 = vadd.f32 %v18670_v8, %v9635_v63 }
 0x3a7   : > { %v14736_v39 = vpop.f32.mrf.mxu1  ;;  %v10802_v45 = vpop.f32.mrf.mxu0 }
 0x3a8   : > { %v10693_v40 = vadd.f32 %v14736_v39, %v10599_v60  ;;  %v9838_v60 = vadd.f32 %v18680_v34, %v9737_v48 }
 0x3a9   : > { %v10686_v38 = vpop.f32.mrf.mxu1 }
 0x3aa   : > { %v18701_v15 = vadd.f32 %v10693_v40, %v18645_v33  ;;  %v10687_v54 = vadd.f32 %v10686_v38, %v10593_v36  ;;  %v9623_v33 = vadd.f32 %v18656_v12, %v18642_v13  ;;  %v9744_v12 = vadd.f32 %v18666_v53, %v9641_v55 }
 0x3ac   : > { %v18704_v28 = vadd.f32 %v10687_v54, %v18648_v51  ;;  %v14752_v5 = vpop.f32.mrf.mxu0  ;;  %v9723_v23 = vadd.f32 %v18662_v9, %v9623_v33  ;;  %v9846_v9 = vadd.f32 %v18676_v21, %v9744_v12 }
 0x3ae   : > { %v10822_v57 = vpop.f32.mrf.mxu0  ;;  %v9822_v18 = vadd.f32 %v18672_v22, %v9723_v23 }
 0x3af   : > { %v14765_v30 = vpop.f32.mrf.mxu1 }
 0x3b0   : > { %v10935_v43 = vadd.f32 %v14765_v30, %v14749_v7  ;;  %v10032_v7 = vadd.f32 %v18684_v47, %v9938_v19  ;;  %v9932_v16 = vadd.f32 %v18678_v58, %v9822_v18  ;;  %v9944_v58 = vadd.f32 %v18686_v52, %v9838_v60 }
 0x3b1   : > { %v10928_v11 = vpop.f32.mrf.mxu1 }
 0x3b2   : > { %v14781_v44 = vpop.f32.mrf.mxu0  ;;  %v10929_v29 = vadd.f32 %v10928_v11, %v10802_v45  ;;  %v10026_v1 = vadd.f32 %v18688_v10, %v9932_v16  ;;  %v9950_v45 = vadd.f32 %v18682_v56, %v9846_v9  ;;  %v10048_v8 = vadd.f32 %v10032_v7, %v18597_v24 }
 0x3b3   : > { %v11036_v13 = vadd.f32 %v14781_v44, %v10935_v43  ;;  %v10038_v56 = vadd.f32 %v18692_v37, %v9944_v58 }
 0x3b4   : > { %v11028_v41 = vpop.f32.mrf.mxu0  ;;  %v10047_v11 = vadd.f32 %v10026_v1, %v18605_v6 }
 0x3b5   : > { %v14768_v50 = vpop.f32.mrf.mxu1  ;;  %v11029_v31 = vadd.f32 %v11028_v41, %v10929_v29  ;;  %v10049_v37 = vadd.f32 %v10038_v56, %v18625_v14 }
 0x3b6   : > { %v10947_v46 = vadd.f32 %v14768_v50, %v14752_v5 }
 0x3b7   : > { %v10940_v32 = vpop.f32.mrf.mxu1 }
 0x3b8   : > { %v14784_v2 = vpop.f32.mrf.mxu0  ;;  %v10941_v61 = vadd.f32 %v10940_v32, %v10822_v57  ;;  %v10044_v57 = vadd.f32 %v18690_v20, %v9950_v45 }
 0x3b9   : > { %v11050_v36 = vadd.f32 %v14784_v2, %v10947_v46 }
 0x3ba   : > { %v11042_v51 = vpop.f32.mrf.mxu0  ;;  %v10050_v20 = vadd.f32 %v10044_v57, %v18618_v49 }
 0x3bb   : > { %v11043_v21 = vadd.f32 %v11042_v51, %v10941_v61 }
 0x3bd   : > { %v14797_v4 = vpop.f32.mrf.mxu1 }
 0x3be   : > { %v11136_v26 = vadd.f32 %v14797_v4, %v11036_v13 }
 0x3bf   : > { %v11127_v27 = vpop.f32.mrf.mxu1 }
 0x3c0   : > { %v14813_v62 = vpop.f32.mrf.mxu0  ;;  %v11128_v22 = vadd.f32 %v11127_v27, %v11029_v31 }
 0x3c1   : > { %v11244_v40 = vadd.f32 %v14813_v62, %v11136_v26 }
 0x3c2   : > { %v11237_v3 = vpop.f32.mrf.mxu0 }
 0x3c3   : > { %v14800_v35 = vpop.f32.mrf.mxu1  ;;  %v11238_v47 = vadd.f32 %v11237_v3, %v11128_v22 }
 0x3c4   : > { %v11152_v54 = vadd.f32 %v14800_v35, %v11050_v36 }
 0x3c5   : > { %v11143_v53 = vpop.f32.mrf.mxu1 }
 0x3c6   : > { %v14816_v39 = vpop.f32.mrf.mxu0  ;;  %v11144_v10 = vadd.f32 %v11143_v53, %v11043_v21 }
 0x3c7   : > { %v11256_v41 = vadd.f32 %v14816_v39, %v11152_v54 }
 0x3c8   : > { %v11249_v34 = vpop.f32.mrf.mxu0 }
 0x3c9   : > { %v11250_v2 = vadd.f32 %v11249_v34, %v11144_v10 }
 0x3cb   : > { %v14829_v38 = vpop.f32.mrf.mxu1 }
 0x3cc   : > { %v11338_v5 = vadd.f32 %v14829_v38, %v11244_v40 }
 0x3cd   : > { %v11331_v30 = vpop.f32.mrf.mxu1 }
 0x3ce   : > { %v18731_v44 = vadd.f32 %v11338_v5, %v10048_v8  ;;  %v11332_v50 = vadd.f32 %v11331_v30, %v11238_v47 }
 0x3cf   : > { %v14845_v24 = vpop.f32.mrf.mxu0 }
 0x3d0   : > { %v18734_v42 = vadd.f32 %v11332_v50, %v10047_v11  ;;  %vm12039_vm2 = vcmp.gt.f32.partialorder %v18731_v44, 0.0  ;;  %v12043_v52 = vmul.f32 0.01, %v18731_v44 }
 0x3d1   : > { %v14832_v32 = vpop.f32.mrf.mxu1  ;;  %v11451_v6 = vpop.f32.mrf.mxu0 }
 0x3d2   : > { %v11350_v4 = vadd.f32 %v14832_v32, %v11256_v41  ;;  %v12047_v33 = vsel %vm12039_vm2, %v18731_v44, %v12043_v52  ;;  %v12042_v59 = vmul.f32 0.01, %v18734_v42  ;;  %vm12038_vm3 = vcmp.gt.f32.partialorder %v18734_v42, 0.0 }
 0x3d3   : > { %v11343_v51 = vpop.f32.mrf.mxu1  ;;  %12056 = vrot.lane.b32.xlu0 %v12047_v33, %s15124_s13 }
 0x3d4   : > { %v18744_v43 = vadd.f32 %v11350_v4, %v10050_v20  ;;  %v11344_v55 = vadd.f32 %v11343_v51, %v11250_v2  ;;  %v12046_v62 = vsel %vm12038_vm3, %v18734_v42, %v12042_v59 }
 0x3d6   : > { %v18746_v49 = vadd.f32 %v11344_v55, %v10049_v37  ;;  %v14848_v0 = vpop.f32.mrf.mxu0  ;;  %vm12041_vm4 = vcmp.gt.f32.partialorder %v18744_v43, 0.0  ;;  %v12045_v27 = vmul.f32 0.01, %v18744_v43 }
 0x3d7   : > { %12054 = vrot.lane.b32.xlu0 %v12046_v62, %s15124_s13 }
 0x3d8   : > { %v11471_v23 = vpop.f32.mrf.mxu0  ;;  %v12049_v29 = vsel %vm12041_vm4, %v18744_v43, %v12045_v27  ;;  %v12044_v63 = vmul.f32 0.01, %v18746_v49  ;;  %vm12040_vm5 = vcmp.gt.f32.partialorder %v18746_v49, 0.0 }
 0x3d9   : > { %v14861_v14 = vpop.f32.mrf.mxu1  ;;  %12060 = vrot.lane.b32.xlu1 %v12049_v29, %s15124_s13 }
 0x3da   : > { %v12048_v13 = vsel %vm12040_vm5, %v18746_v49, %v12044_v63  ;;  %v11584_v31 = vadd.f32 %v14861_v14, %v14845_v24 }
 0x3db   : > { %v11577_v12 = vpop.f32.mrf.mxu1 }
 0x3dc   : > { %v14877_v18 = vpop.f32.mrf.mxu0  ;;  %v11578_v9 = vadd.f32 %v11577_v12, %v11451_v6 }
 0x3dd   : > { %12058 = vrot.lane.b32.xlu1 %v12048_v13, %s15124_s13  ;;  %v11685_v61 = vadd.f32 %v14877_v18, %v11584_v31 }
 0x3de   : > { %v11677_v19 = vpop.f32.mrf.mxu0 }
 0x3df   : > { %v14864_v35 = vpop.f32.mrf.mxu1  ;;  %v11678_v1 = vadd.f32 %v11677_v19, %v11578_v9 }
 0x3e0   : > { %v11596_v22 = vadd.f32 %v14864_v35, %v14848_v0 }
 0x3e1   : > { %v11589_v46 = vpop.f32.mrf.mxu1 }
 0x3e2   : > { %v14880_v3 = vpop.f32.mrf.mxu0  ;;  %v11590_v60 = vadd.f32 %v11589_v46, %v11471_v23 }
 0x3e3   : > { %v11699_v40 = vadd.f32 %v14880_v3, %v11596_v22 }
 0x3e4   : > { %v11691_v48 = vpop.f32.mrf.mxu0 }
 0x3e5   : > { %v11692_v21 = vadd.f32 %v11691_v48, %v11590_v60 }
 0x3e7   : > { %v14893_v26 = vpop.f32.mrf.mxu1 }
 0x3e8   : > { %v11785_v36 = vadd.f32 %v14893_v26, %v11685_v61 }
 0x3e9   : > { %v11776_v7 = vpop.f32.mrf.mxu1 }
 0x3ea   : > { %v14909_v16 = vpop.f32.mrf.mxu0  ;;  %v11777_v45 = vadd.f32 %v11776_v7, %v11678_v1 }
 0x3eb   : > { %v11893_v54 = vadd.f32 %v14909_v16, %v11785_v36 }
 0x3ec   : > { %v14896_v53 = vpop.f32.mrf.mxu1  ;;  %v11886_v39 = vpop.f32.mrf.mxu0 }
 0x3ed   : > { %v11801_v47 = vadd.f32 %v14896_v53, %v11699_v40  ;;  %v11887_v57 = vadd.f32 %v11886_v39, %v11777_v45 }
 0x3ee   : > { %v11792_v8 = vpop.f32.mrf.mxu1  ;;  %v14912_v38 = vpop.f32.mrf.mxu0 }
 0x3ef   : > { %v11793_v5 = vadd.f32 %v11792_v8, %v11692_v21  ;;  %v11905_v10 = vadd.f32 %v14912_v38, %v11801_v47 }
 0x3f0   : > { %v11898_v34 = vpop.f32.mrf.mxu0 }
 0x3f1   : > { %v11899_v24 = vadd.f32 %v11898_v34, %v11793_v5 }
 0x3f2   : > { %v14925_v58 = vpop.f32.mrf.mxu1 }
 0x3f3   : > { %v11987_v30 = vadd.f32 %v14925_v58, %v11893_v54 }
 0x3f4   : > { %v11980_v11 = vpop.f32.mrf.mxu1 }
 0x3f5   : > { %v12003_v50 = vadd.f32 %v11987_v30, %v18695_v17  ;;  %v11981_v56 = vadd.f32 %v11980_v11, %v11887_v57 }
 0x3f6   : > { %v14928_v41 = vpop.f32.mrf.mxu1 }
 0x3f7   : > { %v12002_v52 = vadd.f32 %v11981_v56, %v18698_v25  ;;  %v11999_v20 = vadd.f32 %v14928_v41, %v11905_v10  ;;  %vm12007_vm6 = vcmp.gt.f32.partialorder %v12003_v50, 0.0  ;;  %v12011_v32 = vmul.f32 0.01, %v12003_v50 }
 0x3f8   : > { %v11992_v2 = vpop.f32.mrf.mxu1  ;;  %v12019_v4 = vsub.f32 %v18731_v44, %v12003_v50 }
 0x3f9   : > { %v12005_v6 = vadd.f32 %v11999_v20, %v18701_v15  ;;  %v11993_v33 = vadd.f32 %v11992_v2, %v11899_v24  ;;  %v12015_v59 = vsel %vm12007_vm6, %v12003_v50, %v12011_v32  ;;  %v12010_v37 = vmul.f32 0.01, %v12002_v52 }
 0x3fa   : > { %vm12023_vm7 = vcmp.gt.f32.partialorder %v12019_v4, 0.0  ;;  %v12027_v51 = vmul.f32 0.01, %v12019_v4  ;;  %v12018_v17 = vsub.f32 %v18734_v42, %v12002_v52  ;;  %vm12006_vm8 = vcmp.gt.f32.partialorder %v12002_v52, 0.0 }
 0x3fb   : > { %v12004_v55 = vadd.f32 %v11993_v33, %v18704_v28  ;;  %v12013_v0 = vmul.f32 0.01, %v12005_v6  ;;  %v12021_v25 = vsub.f32 %v18744_v43, %v12005_v6  ;;  %vm12009_vm10 = vcmp.gt.f32.partialorder %v12005_v6, 0.0 }
 0x3fc   : > { %v12031_v27 = vsel %vm12023_vm7, %v12019_v4, %v12027_v51  ;;  %vm12022_vm9 = vcmp.gt.f32.partialorder %v12018_v17, 0.0  ;;  %v12026_v62 = vmul.f32 0.01, %v12018_v17  ;;  %v12014_v23 = vsel %vm12006_vm8, %v12002_v52, %v12010_v37 }
 0x3fd   : > { %v12035_v44 = vadd.f32 %v12031_v27, %v12015_v59  ;;  %vm12025_vm11 = vcmp.gt.f32.partialorder %v12021_v25, 0.0  ;;  %v12029_v15 = vmul.f32 0.01, %v12021_v25  ;;  %v12012_v63 = vmul.f32 0.01, %v12004_v55 }
 0x3fe   : > { %v12030_v29 = vsel %vm12022_vm9, %v12018_v17, %v12026_v62  ;;  %v12020_v14 = vsub.f32 %v18746_v49, %v12004_v55  ;;  %v12017_v42 = vsel %vm12009_vm10, %v12005_v6, %v12013_v0  ;;  %vm12008_vm12 = vcmp.gt.f32.partialorder %v12004_v55, 0.0 }
 0x3ff   : > { %12072 = vrot.lane.b32.xlu1 %v12035_v44, %s15124_s13  ;;  %v12034_v28 = vadd.f32 %v12030_v29, %v12014_v23  ;;  %v12033_v18 = vsel %vm12025_vm11, %v12021_v25, %v12029_v15  ;;  %v12016_v12 = vsel %vm12008_vm12, %v12004_v55, %v12012_v63 }
 0x400   : > { %v12037_v43 = vadd.f32 %v12033_v18, %v12017_v42  ;;  %vm12024_vm13 = vcmp.gt.f32.partialorder %v12020_v14, 0.0  ;;  %v12028_v13 = vmul.f32 0.01, %v12020_v14 }
 0x401   : > { %12070 = vrot.lane.b32.xlu0 %v12034_v28, %s15124_s13 }
 0x402   : > { %v12032_v19 = vsel %vm12024_vm13, %v12020_v14, %v12028_v13 }
 0x403   : > { %12076 = vrot.lane.b32.xlu1 %v12037_v43, %s15124_s13  ;;  %v12036_v35 = vadd.f32 %v12032_v19, %v12016_v12 }
 0x405   : > { %12074 = vrot.lane.b32.xlu0 %v12036_v35, %s15124_s13 }
 0x445   : > { %v12057_v3 = vpop.permute.xlu0 %12056 }
 0x449   : > { %v12055_v31 = vpop.permute.xlu0 %12054 }
 0x44b   : > { %v12061_v49 = vpop.permute.xlu1 %12060 }
 0x44f   : > { %v12059_v46 = vpop.permute.xlu1 %12058 }
 0x471   : > { %v12073_v26 = vpop.permute.xlu1 %12072 }
 0x472   : > { %v12084_v48 = vsel %vm12082_vm14, %v12057_v3, %v12073_v26 }
 0x473   : > { %12088 = vst [vmem:[%s220_s22 + $0x8] sm:$0xff] %v12084_v48  ;;  %v12071_v9 = vpop.permute.xlu0 %12070 }
 0x474   : > { %v12083_v7 = vsel %vm12082_vm14, %v12055_v31, %v12071_v9 }
 0x475   : > { %12087 = vst [vmem:[%s220_s22] sm:$0xff] %v12083_v7  ;;  %v12077_v16 = vpop.permute.xlu1 %12076 }
 0x476   : > { %v12086_v61 = vsel %vm12082_vm14, %v12061_v49, %v12077_v16 }
 0x477   : > { %12090 = vst [vmem:[%s220_s22 + $0x18] sm:$0xff] %v12086_v61  ;;  %v12075_v22 = vpop.permute.xlu0 %12074 }
 0x478   : > { %v12085_v60 = vsel %vm12082_vm14, %v12059_v46, %v12075_v22 }
 0x479   : > { %12089 = vst [vmem:[%s220_s22 + $0x10] sm:$0xff] %v12085_v60 }
 0x47a   : > { %15063 = shalt.err (!%p15060_p3)
}
 0x47b   : > { %s15064_s9 = scalar_lea.hbm %s18780_s30, 512  ;;  %s15068_s12 = scalar_lea.hbm %s18827_s4, 1024 }
 0x47c   : > { %p15065_p2 = scmp.ne.s32.totalorder %s18780_s30, %s15064_s9  ;;  %p15069_p7 = scmp.lt.s32.totalorder %s18780_s30, %s18827_s4 }
 0x47d   : > { %p15070_p6 = scmp.lt.s32.totalorder %s15068_s12, %s15064_s9 }
 0x47e   : > { %p15066_p4 = pnand %p15065_p2, %p15191_p5 }
 0x47f   : > { %p15071_p9 = por %p15070_p6, %p15069_p7 }
 0x480   : > { %p15067_p13 = pneg %p15066_p4 }
 0x482   : > { %p15072_p10 = pnand %p15071_p9, %p15067_p13 }
 0x484   : > { %15075 = shalt.err (!%p15072_p10)
}
 0x485   : > { %s15126_s20 = smov 128   ;;  %s15127_s22 = smov 8  }
 0x486   : > { %14938 = dma.vmem_to_hbm [thread:$0]  (%p15191_p5), %s18774_s23, 512, %s18780_s30, %s18783_s19, %s15126_s20, %s15126_s20, %s15127_s22  }
 0x487 PF: > { %p14955_p12 = scmp.ge.s32.totalorder %s15118_s18, 2  ;;  %s12120_s27 = sand.u32 1, %s15106_s15  }
 0x488   : > { %p19067_p8 = scmp.ne.s32.totalorder %s18840_s26, 0  ;;  %s12121_s28 = scalar_lea.sflag [#allocation5], %s12120_s27 }
 0x48a   : > { %p14948_p11 = pnand %p14955_p12, %p19067_p8 }
 0x48c   : > { %p14949_p0 = pneg %p14948_p11 }
 0x48e   : > { %15101 = dma.done.wait (%p14949_p0), %s12121_s28, 512  }
 0x48f   : > { %15103 = vsyncadd (%p14949_p0), %s12121_s28, 4294966784  ;;  %p16_p1 = scmp.ge.s32.totalorder %s15178_s21, 4   ;;  %s19068_s15 = smov %s15110_s16 }
 0x490   : > { %s19069_s16 = smov %s15114_s17  ;;  %s19070_s17 = smov %s15189_s24 }
 0x491   : > { %s19071_s18 = smov %s15178_s21  ;;  %18 = sbr.rel (!%p16_p1) target bundleno = 5 (0x5), region = 100 }
 0x496   :  { %12126 = vsyncpa [#allocation4], 1 }
 0x497   :  { %12128 = vsyncpa [#allocation4 + $0x1], 1 }
 0x498   :  { %12129 = vsyncpa [#allocation7], 1 }
 0x499   :  { %12130 = vsyncpa [#allocation5], 1 }
 0x49a   :  { %12132 = vsyncpa [#allocation5 + $0x1], 1 }

</bundles_post_ra>
